<compile_context>
chip_gen: v7x
topology: tpu7x:2x2x1
jax: 0.10.0
libtpu: 0.0.40
codegen_flags: <defaults>
</compile_context>

<pallas_src>
import functools

import jax
import jax.numpy as jnp
from jax import lax
from jax.experimental import pallas as pl
from jax.experimental.pallas import tpu as pltpu

LANE = 128


def _ceil_to(x, m):
    return ((x + m - 1) // m) * m


def _pick_m_tile(m):
    """Prefer a tile that divides m exactly (no M padding / un-pad copies)."""
    for cand in (1024, 512, 256, 128, 64, 32, 16, 8):
        if m % cand == 0:
            return cand, m
    mp = _ceil_to(m, 8)
    tm = min(512, mp)
    mp = _ceil_to(mp, tm)
    return tm, mp


def _pick_div_tile(dim, candidates):
    for c in candidates:
        if dim % c == 0:
            return c
    return dim


@functools.lru_cache(maxsize=None)
def _vmem_limit():
    """Generation-aware scoped-VMEM cap (v7x has 64 MiB physical, v5e/v6e 128)."""
    try:
        cap = int(pltpu.get_tpu_info().vmem_capacity_bytes)
    except Exception:
        cap = 0
    if cap <= 0:
        return 32 * 1024 * 1024
    return min(64 * 1024 * 1024, (cap * 3) // 4)


# ----------------------------------------------------------------------------
# Pallas kernel: tiled conv-as-matmul with f32 accumulator and fused epilogue
# ----------------------------------------------------------------------------
def _make_conv_mm_kernel(*, act, slope, has_bias, want_stats, tk):
    """Epilogue options: LeakyReLU, bias+sigmoid, per-tile BN partial stats."""

    def kernel(*refs):
        p_ref, w_ref = refs[0], refs[1]
        pos = 2
        b_ref = None
        if has_bias:
            b_ref = refs[pos]
            pos += 1
        y_ref = refs[pos]
        pos += 1
        st_ref = refs[pos] if want_stats else None
        acc_ref = refs[-1]

        k = pl.program_id(2)

        @pl.when(k == 0)
        def _init():
            acc_ref[...] = jnp.zeros_like(acc_ref)

        # Weight column (Kp, tn) is resident across the K loop; take this
        # step's (tk, tn) slice locally (aligned dynamic slice).
        koff = pl.multiple_of(k * tk, tk)
        acc_ref[...] += jnp.dot(
            p_ref[...], w_ref[pl.ds(koff, tk), :],
            preferred_element_type=jnp.float32,
        )

        @pl.when(k == pl.num_programs(2) - 1)
        def _finalize():
            acc = acc_ref[...]
            if want_stats:
                # Row 0 = partial sum, row 1 = partial sum of squares.
                # Rows 2..7 are layout padding and are never read.
                ps = jnp.sum(acc, axis=0, keepdims=True)          # (1, tn)
                pq = jnp.sum(acc * acc, axis=0, keepdims=True)    # (1, tn)
                st_ref[0:1, 0:1, :] = ps[None]
                st_ref[0:1, 1:2, :] = pq[None]
            y = acc
            if has_bias:
                y = y + b_ref[...]
            if act == "lrelu":
                y = jnp.where(y >= 0, y, slope * y)
            elif act == "sigmoid":
                y = jax.nn.sigmoid(y)
            y_ref[...] = y.astype(y_ref.dtype)

    return kernel


def pallas_conv_matmul(patches, weights, bias, *, act, want_stats,
                       tm, tk, tn, out_dtype, slope=0.2):
    mp, kp = patches.shape
    _, ocp = weights.shape
    gm, gn, gk = mp // tm, ocp // tn, kp // tk

    kernel = _make_conv_mm_kernel(act=act, slope=slope,
                                  has_bias=bias is not None,
                                  want_stats=want_stats, tk=tk)

    in_specs = [
        pl.BlockSpec((tm, tk), lambda i, j, k: (i, k)),
        # Full K column of the weight stays resident in VMEM across the k loop
        # (re-fetched only when j changes) -> weight HBM traffic / gk.
        pl.BlockSpec((kp, tn), lambda i, j, k: (0, j)),
    ]
    inputs = [patches, weights]
    if bias is not None:
        in_specs.append(pl.BlockSpec((1, tn), lambda i, j, k: (0, j)))
        inputs.append(bias)

    out_shape = [jax.ShapeDtypeStruct((mp, ocp), out_dtype)]
    out_specs = [pl.BlockSpec((tm, tn), lambda i, j, k: (i, j))]
    if want_stats:
        out_shape.append(jax.ShapeDtypeStruct((gm, 8, ocp), jnp.float32))
        out_specs.append(pl.BlockSpec((1, 8, tn), lambda i, j, k: (i, 0, j)))

    res = pl.pallas_call(
        kernel,
        out_shape=tuple(out_shape) if want_stats else out_shape[0],
        grid=(gm, gn, gk),
        in_specs=in_specs,
        out_specs=tuple(out_specs) if want_stats else out_specs[0],
        scratch_shapes=[pltpu.VMEM((tm, tn), jnp.float32)],
        compiler_params=pltpu.CompilerParams(
            dimension_semantics=("parallel", "parallel", "arbitrary"),
            vmem_limit_bytes=_vmem_limit(),
        ),
    )(*inputs)

    if want_stats:
        return res[0], res[1]
    return res, None


# ----------------------------------------------------------------------------
# Glue: im2col + layer plumbing (plain JAX, bf16; fused by XLA into the gather)
# ----------------------------------------------------------------------------
def _im2col(x, kh, kw, stride, pad):
    n, h, w, c = x.shape
    xp = jnp.pad(x, ((0, 0), (pad, pad), (pad, pad), (0, 0)))
    oh = (h + 2 * pad - kh) // stride + 1
    ow = (w + 2 * pad - kw) // stride + 1
    cols = []
    for i in range(kh):
        for j in range(kw):
            cols.append(
                xp[:, i: i + stride * (oh - 1) + 1: stride,
                      j: j + stride * (ow - 1) + 1: stride, :])
    patches = jnp.stack(cols, axis=3)          # (N, OH, OW, KH*KW, C)
    return patches.reshape(n * oh * ow, kh * kw * c), oh, ow


def conv_layer(x_nhwc, w_oihw, stride, pad, *, act="none",
               want_stats=False, bias=None):
    """Conv via the Pallas matmul.  x carries only its real channels."""
    n, h, w, cin = x_nhwc.shape
    oc, ic, kh, kw = w_oihw.shape
    assert ic == cin, (ic, cin)

    ocp = _ceil_to(oc, LANE)
    wt = jnp.transpose(w_oihw, (2, 3, 1, 0)).reshape(kh * kw * ic, oc)
    wmat = jnp.pad(wt, ((0, 0), (0, ocp - oc))).astype(jnp.bfloat16)

    patches, oh, ow = _im2col(x_nhwc.astype(jnp.bfloat16), kh, kw, stride, pad)
    m, k = patches.shape
    kp = _ceil_to(k, LANE)                     # K padded only at the tail
    if kp != k:
        patches = jnp.pad(patches, ((0, 0), (0, kp - k)))
        wmat = jnp.pad(wmat, ((0, kp - k), (0, 0)))

    tm, mp = _pick_m_tile(m)
    if mp != m:
        patches = jnp.pad(patches, ((0, mp - m), (0, 0)))
    tk = _pick_div_tile(kp, (512, 256, 128))
    tn = _pick_div_tile(ocp, (512, 256, 128))

    b = None
    if bias is not None:
        b = jnp.pad(bias.reshape(1, oc).astype(jnp.float32),
                    ((0, 0), (0, ocp - oc)))

    out_dtype = jnp.float32 if act == "sigmoid" else jnp.bfloat16
    y, stats = pallas_conv_matmul(patches, wmat, b, act=act,
                                  want_stats=want_stats, tm=tm, tk=tk, tn=tn,
                                  out_dtype=out_dtype)
    meta = dict(n=n, oh=oh, ow=ow, m=m, mp=mp, oc=oc, ocp=ocp)
    return y, stats, meta


def _to_nhwc(y, mt):
    """(Mp, OCp) conv output -> (N, OH, OW, OC) with real channels only."""
    if y.shape[0] != mt["m"]:
        y = y[: mt["m"]]
    y = y.reshape(mt["n"], mt["oh"], mt["ow"], y.shape[-1])
    if y.shape[-1] != mt["oc"]:
        y = y[..., : mt["oc"]]
    return y


def dnet_forward(params, x_nchw):
    """Equivalent of Dnet.forward(x): x is NCHW, returns a flat vector."""
    eps = 1e-5
    slope = 0.2
    x = jnp.transpose(x_nchw, (0, 2, 3, 1)).astype(jnp.bfloat16)   # NCHW -> NHWC

    # conv1 (k5, s3, p1, no bias) + LeakyReLU(0.2), fused in the matmul epilogue
    y, _, mt = conv_layer(x, params["w1"], 3, 1, act="lrelu")
    x = _to_nhwc(y, mt)

    # conv2..4 (k4, s2, p1, no bias) + BatchNorm(batch stats) + LeakyReLU(0.2).
    # The matmul epilogue provides per-tile sum / sum-of-squares; the folded
    # scale/shift + LeakyReLU below is fused by XLA into the next layer's
    # patch-matrix gather (no standalone activation round trip to HBM).
    for idx in (2, 3, 4):
        y, stats, mt = conv_layer(x, params[f"w{idx}"], 2, 1,
                                  act="none", want_stats=True)
        m, oc = mt["m"], mt["oc"]
        total = stats[:, 0, :oc].sum(axis=0)
        total_sq = stats[:, 1, :oc].sum(axis=0)
        mean = total / m
        var = jnp.maximum(total_sq / m - mean * mean, 0.0)   # biased, as PyTorch
        scale = params[f"g{idx}"] * lax.rsqrt(var + eps)
        shift = params[f"b{idx}"] - mean * scale
        z = _to_nhwc(y, mt).astype(jnp.float32) * scale + shift
        x = jnp.where(z >= 0, z, slope * z).astype(jnp.bfloat16)

    # conv5 (k4, s1, p0, bias=True) + Sigmoid, fused bias+sigmoid epilogue
    y, _, mt = conv_layer(x, params["w5"], 1, 0, act="sigmoid",
                          bias=params["b5"])
    return y[: mt["m"], 0]          # matches .view(-1) on (N, 1, 1, 1)


# ----------------------------------------------------------------------------
# Deterministic parameter init (DCGAN-style N(0, 0.02) for conv weights)
# ----------------------------------------------------------------------------
def init_params(key, feats):
    ks = jax.random.split(key, 6)

    def nrm(k, shape):
        return 0.02 * jax.random.normal(k, shape, dtype=jnp.float32)

    return {
        "w1": nrm(ks[0], (feats, 3, 5, 5)),
        "w2": nrm(ks[1], (feats * 2, feats, 4, 4)),
        "w3": nrm(ks[2], (feats * 4, feats * 2, 4, 4)),
        "w4": nrm(ks[3], (feats * 8, feats * 4, 4, 4)),
        "w5": nrm(ks[4], (1, feats * 8, 4, 4)),
        "b5": 0.02 * jax.random.normal(ks[5], (1,), dtype=jnp.float32),
        "g2": jnp.ones((feats * 2,), jnp.float32),
        "b2": jnp.zeros((feats * 2,), jnp.float32),
        "g3": jnp.ones((feats * 4,), jnp.float32),
        "b3": jnp.zeros((feats * 4,), jnp.float32),
        "g4": jnp.ones((feats * 8,), jnp.float32),
        "b4": jnp.zeros((feats * 8,), jnp.float32),
    }


# ----------------------------------------------------------------------------
# Pure-JAX f32 reference (ground-truth module semantics)
# ----------------------------------------------------------------------------
def reference_forward(params, x_nchw):
    x = jnp.transpose(x_nchw, (0, 2, 3, 1)).astype(jnp.float32)

    def conv(x, w, s, p):
        return lax.conv_general_dilated(
            x, jnp.transpose(w, (2, 3, 1, 0)), (s, s), [(p, p), (p, p)],
            dimension_numbers=("NHWC", "HWIO", "NHWC"),
            precision=lax.Precision.HIGHEST)

    def lrelu(x):
        return jnp.where(x >= 0, x, 0.2 * x)

    def bn(x, g, b, eps=1e-5):
        m = jnp.mean(x, axis=(0, 1, 2), keepdims=True)
        v = jnp.mean((x - m) ** 2, axis=(0, 1, 2), keepdims=True)
        return (x - m) * lax.rsqrt(v + eps) * g + b

    x = lrelu(conv(x, params["w1"], 3, 1))
    x = lrelu(bn(conv(x, params["w2"], 2, 1), params["g2"], params["b2"]))
    x = lrelu(bn(conv(x, params["w3"], 2, 1), params["g3"], params["b3"]))
    x = lrelu(bn(conv(x, params["w4"], 2, 1), params["g4"], params["b4"]))
    x = jax.nn.sigmoid(conv(x, params["w5"], 1, 0) + params["b5"])
    return x.reshape(-1)


# ----------------------------------------------------------------------------
if __name__ == "__main__":
    key = jax.random.PRNGKey(0)
    k_par, k_in = jax.random.split(key)

    # Small-but-consistent shapes: the conv chain (k5s3p1, 3x k4s2p1, k4s1p0)
    # needs a 96x96 input to end at 1x1; shrink batch and channel width instead.
    batch = 2
    feats = 8          # opt.feats_channel scaled down from 64
    img = 96           # opt.img_size (required by the stride/kernel chain)

    params = init_params(k_par, feats)
    x = jax.random.normal(k_in, (batch, 3, img, img), dtype=jnp.float32)

    fwd = jax.jit(dnet_forward)
    out = jax.block_until_ready(fwd(params, x))

    ref = jax.block_until_ready(jax.jit(reference_forward)(params, x))
    assert out.shape == (batch,), out.shape
    assert bool(jnp.all(jnp.isfinite(out)))
    # bf16 MXU operands (f32 accumulation) + single-pass BN variance vs f32
    # HIGHEST two-pass reference -> loose tolerance.
    assert jnp.allclose(out, ref, atol=3e-2, rtol=3e-2), (out, ref)

    print("KERNEL_OK")
</pallas_src>

<mosaic_0001>
module attributes {stable_mosaic.version = 11 : i64} {
  func.func @kernel(%arg0: i32, %arg1: i32, %arg2: i32, %arg3: memref<1024x128xbf16, #tpu.memory_space<vmem>>, %arg4: memref<128x128xbf16, #tpu.memory_space<vmem>>, %arg5: memref<1024x128xbf16, #tpu.memory_space<vmem>>, %arg6: memref<1024x128xf32, #tpu.memory_space<vmem>>) attributes {dimension_semantics = [#tpu.dimension_semantics<parallel>, #tpu.dimension_semantics<parallel>, #tpu.dimension_semantics<arbitrary>], iteration_bounds = array<i64: 2, 1, 1>, scalar_prefetch = 0 : i64, scratch_operands = 1 : i64, tpu.core_type = #tpu.core_type<tc>, window_params = [{transform_indices = @transform_0, window_bounds = array<i64: 1024, 128>}, {transform_indices = @transform_1, window_bounds = array<i64: 128, 128>}, {transform_indices = @transform_2, window_bounds = array<i64: 1024, 128>}]} {
    %c0_i32 = arith.constant 0 : i32
    %0 = arith.cmpi eq, %arg2, %c0_i32 : i32
    %1 = arith.extui %0 : i1 to i32
    %c0_i32_0 = arith.constant 0 : i32
    %2 = arith.cmpi ne, %1, %c0_i32_0 : i32
    scf.if %2 {
      %cst_9 = arith.constant 0.000000e+00 : f32
      %15 = vector.broadcast %cst_9 : f32 to vector<1024x128xf32>
      %c0_10 = arith.constant 0 : index
      %c0_11 = arith.constant 0 : index
      %16 = vector.load %arg6[%c0_10, %c0_11] : memref<1024x128xf32, #tpu.memory_space<vmem>>, vector<1024x128xf32>
      tpu.vector_store %arg6[%c0_10, %c0_11], %15 {strides = array<i32>} : memref<1024x128xf32, #tpu.memory_space<vmem>>, vector<1024x128xf32>,
    } else {
    }
    %c128_i32 = arith.constant 128 : i32
    %3 = arith.muli %arg2, %c128_i32 : i32
    %4 = tpu.assume_multiple %3, 128 : i32
    %c0 = arith.constant 0 : index
    %c0_1 = arith.constant 0 : index
    %5 = vector.load %arg6[%c0, %c0_1] : memref<1024x128xf32, #tpu.memory_space<vmem>>, vector<1024x128xf32>
    %c0_2 = arith.constant 0 : index
    %c0_3 = arith.constant 0 : index
    %6 = vector.load %arg3[%c0_2, %c0_3] : memref<1024x128xbf16, #tpu.memory_space<vmem>>, vector<1024x128xbf16>
    %7 = arith.index_cast %4 : i32 to index
    %c0_4 = arith.constant 0 : index
    %8 = vector.load %arg4[%7, %c0_4] : memref<128x128xbf16, #tpu.memory_space<vmem>>, vector<128x128xbf16>
    %cst = arith.constant dense<0.000000e+00> : vector<1024x128xf32>
    %9 = tpu.matmul %6, %8, %cst {dimension_numbers = #tpu.dot_dimension_numbers<[1], [0], [0], [1], [0, 0, 1, 1], [], []>} : vector<1024x128xbf16>, vector<128x128xbf16>, vector<1024x128xf32> -> vector<1024x128xf32>
    %10 = arith.addf %5, %9 : vector<1024x128xf32>
    %c0_5 = arith.constant 0 : index
    %c0_6 = arith.constant 0 : index
    %11 = vector.load %arg6[%c0_5, %c0_6] : memref<1024x128xf32, #tpu.memory_space<vmem>>, vector<1024x128xf32>
    tpu.vector_store %arg6[%c0_5, %c0_6], %10 {strides = array<i32>} : memref<1024x128xf32, #tpu.memory_space<vmem>>, vector<1024x128xf32>,
    %c0_i32_7 = arith.constant 0 : i32
    %12 = arith.cmpi eq, %arg2, %c0_i32_7 : i32
    %13 = arith.extui %12 : i1 to i32
    %c0_i32_8 = arith.constant 0 : i32
    %14 = arith.cmpi ne, %13, %c0_i32_8 : i32
    scf.if %14 {
      %c0_9 = arith.constant 0 : index
      %c0_10 = arith.constant 0 : index
      %15 = vector.load %arg6[%c0_9, %c0_10] : memref<1024x128xf32, #tpu.memory_space<vmem>>, vector<1024x128xf32>
      %cst_11 = arith.constant 0.000000e+00 : f32
      %16 = vector.broadcast %cst_11 : f32 to vector<1024x128xf32>
      %17 = arith.cmpf oge, %15, %16 : vector<1024x128xf32>
      %cst_12 = arith.constant 2.000000e-01 : f32
      %18 = vector.broadcast %cst_12 : f32 to vector<1024x128xf32>
      %19 = arith.mulf %18, %15 : vector<1024x128xf32>
      %20 = arith.select %17, %15, %19 : vector<1024x128xi1>, vector<1024x128xf32>
      %21 = arith.truncf %20 : vector<1024x128xf32> to vector<1024x128xbf16>
      %c0_13 = arith.constant 0 : index
      %c0_14 = arith.constant 0 : index
      %22 = vector.load %arg5[%c0_13, %c0_14] : memref<1024x128xbf16, #tpu.memory_space<vmem>>, vector<1024x128xbf16>
      tpu.vector_store %arg5[%c0_13, %c0_14], %21 {strides = array<i32>} : memref<1024x128xbf16, #tpu.memory_space<vmem>>, vector<1024x128xbf16>,
    } else {
    }
    return
  }
  func.func @transform_0(%arg0: i32, %arg1: i32, %arg2: i32) -> (i32, i32) {
    %c0_i32 = arith.constant 0 : i32
    return %arg0, %arg2 : i32, i32
  }
  func.func @transform_1(%arg0: i32, %arg1: i32, %arg2: i32) -> (i32, i32) {
    %c0_i32 = arith.constant 0 : i32
    %c0_i32_0 = arith.constant 0 : i32
    return %c0_i32, %arg1 : i32, i32
  }
  func.func @transform_2(%arg0: i32, %arg1: i32, %arg2: i32) -> (i32, i32) {
    %c0_i32 = arith.constant 0 : i32
    return %arg0, %arg1 : i32, i32
  }
}

module attributes {stable_mosaic.version = 11 : i64} {
  func.func @kernel(%arg0: i32, %arg1: i32, %arg2: i32, %arg3: memref<512x128xbf16, #tpu.memory_space<vmem>>, %arg4: memref<128x128xbf16, #tpu.memory_space<vmem>>, %arg5: memref<512x128xbf16, #tpu.memory_space<vmem>>, %arg6: memref<1x8x128xf32, #tpu.memory_space<vmem>>, %arg7: memref<512x128xf32, #tpu.memory_space<vmem>>) attributes {dimension_semantics = [#tpu.dimension_semantics<parallel>, #tpu.dimension_semantics<parallel>, #tpu.dimension_semantics<arbitrary>], iteration_bounds = array<i64: 1, 1, 1>, scalar_prefetch = 0 : i64, scratch_operands = 1 : i64, tpu.core_type = #tpu.core_type<tc>, window_params = [{transform_indices = @transform_0, window_bounds = array<i64: 512, 128>}, {transform_indices = @transform_1, window_bounds = array<i64: 128, 128>}, {transform_indices = @transform_2, window_bounds = array<i64: 512, 128>}, {transform_indices = @transform_3, window_bounds = array<i64: 1, 8, 128>}]} {
    %c0_i32 = arith.constant 0 : i32
    %0 = arith.cmpi eq, %arg2, %c0_i32 : i32
    %1 = arith.extui %0 : i1 to i32
    %c0_i32_0 = arith.constant 0 : i32
    %2 = arith.cmpi ne, %1, %c0_i32_0 : i32
    scf.if %2 {
      %cst_9 = arith.constant 0.000000e+00 : f32
      %15 = vector.broadcast %cst_9 : f32 to vector<512x128xf32>
      %c0_10 = arith.constant 0 : index
      %c0_11 = arith.constant 0 : index
      %16 = vector.load %arg7[%c0_10, %c0_11] : memref<512x128xf32, #tpu.memory_space<vmem>>, vector<512x128xf32>
      tpu.vector_store %arg7[%c0_10, %c0_11], %15 {strides = array<i32>} : memref<512x128xf32, #tpu.memory_space<vmem>>, vector<512x128xf32>,
    } else {
    }
    %c128_i32 = arith.constant 128 : i32
    %3 = arith.muli %arg2, %c128_i32 : i32
    %4 = tpu.assume_multiple %3, 128 : i32
    %c0 = arith.constant 0 : index
    %c0_1 = arith.constant 0 : index
    %5 = vector.load %arg7[%c0, %c0_1] : memref<512x128xf32, #tpu.memory_space<vmem>>, vector<512x128xf32>
    %c0_2 = arith.constant 0 : index
    %c0_3 = arith.constant 0 : index
    %6 = vector.load %arg3[%c0_2, %c0_3] : memref<512x128xbf16, #tpu.memory_space<vmem>>, vector<512x128xbf16>
    %7 = arith.index_cast %4 : i32 to index
    %c0_4 = arith.constant 0 : index
    %8 = vector.load %arg4[%7, %c0_4] : memref<128x128xbf16, #tpu.memory_space<vmem>>, vector<128x128xbf16>
    %cst = arith.constant dense<0.000000e+00> : vector<512x128xf32>
    %9 = tpu.matmul %6, %8, %cst {dimension_numbers = #tpu.dot_dimension_numbers<[1], [0], [0], [1], [0, 0, 1, 1], [], []>} : vector<512x128xbf16>, vector<128x128xbf16>, vector<512x128xf32> -> vector<512x128xf32>
    %10 = arith.addf %5, %9 : vector<512x128xf32>
    %c0_5 = arith.constant 0 : index
    %c0_6 = arith.constant 0 : index
    %11 = vector.load %arg7[%c0_5, %c0_6] : memref<512x128xf32, #tpu.memory_space<vmem>>, vector<512x128xf32>
    tpu.vector_store %arg7[%c0_5, %c0_6], %10 {strides = array<i32>} : memref<512x128xf32, #tpu.memory_space<vmem>>, vector<512x128xf32>,
    %c0_i32_7 = arith.constant 0 : i32
    %12 = arith.cmpi eq, %arg2, %c0_i32_7 : i32
    %13 = arith.extui %12 : i1 to i32
    %c0_i32_8 = arith.constant 0 : i32
    %14 = arith.cmpi ne, %13, %c0_i32_8 : i32
    scf.if %14 {
      %c0_9 = arith.constant 0 : index
      %c0_10 = arith.constant 0 : index
      %15 = vector.load %arg7[%c0_9, %c0_10] : memref<512x128xf32, #tpu.memory_space<vmem>>, vector<512x128xf32>
      %cst_11 = arith.constant dense<0.000000e+00> : vector<128xf32>
      %16 = vector.multi_reduction <add>, %15, %cst_11 [0] : vector<512x128xf32> to vector<128xf32>
      %17 = vector.shape_cast %16 : vector<128xf32> to vector<1x128xf32>
      %18 = arith.mulf %15, %15 : vector<512x128xf32>
      %cst_12 = arith.constant dense<0.000000e+00> : vector<128xf32>
      %19 = vector.multi_reduction <add>, %18, %cst_12 [0] : vector<512x128xf32> to vector<128xf32>
      %20 = vector.shape_cast %19 : vector<128xf32> to vector<1x128xf32>
      %21 = vector.shape_cast %17 : vector<1x128xf32> to vector<1x1x128xf32>
      %c0_13 = arith.constant 0 : index
      %c0_14 = arith.constant 0 : index
      %c0_15 = arith.constant 0 : index
      %22 = vector.load %arg6[%c0_13, %c0_14, %c0_15] : memref<1x8x128xf32, #tpu.memory_space<vmem>>, vector<1x1x128xf32>
      tpu.vector_store %arg6[%c0_13, %c0_14, %c0_15], %21 {strides = array<i32>} : memref<1x8x128xf32, #tpu.memory_space<vmem>>, vector<1x1x128xf32>,
      %23 = vector.shape_cast %20 : vector<1x128xf32> to vector<1x1x128xf32>
      %c0_16 = arith.constant 0 : index
      %c1 = arith.constant 1 : index
      %c0_17 = arith.constant 0 : index
      %24 = vector.load %arg6[%c0_16, %c1, %c0_17] : memref<1x8x128xf32, #tpu.memory_space<vmem>>, vector<1x1x128xf32>
      tpu.vector_store %arg6[%c0_16, %c1, %c0_17], %23 {strides = array<i32>} : memref<1x8x128xf32, #tpu.memory_space<vmem>>, vector<1x1x128xf32>,
      %25 = arith.truncf %15 : vector<512x128xf32> to vector<512x128xbf16>
      %c0_18 = arith.constant 0 : index
      %c0_19 = arith.constant 0 : index
      %26 = vector.load %arg5[%c0_18, %c0_19] : memref<512x128xbf16, #tpu.memory_space<vmem>>, vector<512x128xbf16>
      tpu.vector_store %arg5[%c0_18, %c0_19], %25 {strides = array<i32>} : memref<512x128xbf16, #tpu.memory_space<vmem>>, vector<512x128xbf16>,
    } else {
    }
    return
  }
  func.func @transform_0(%arg0: i32, %arg1: i32, %arg2: i32) -> (i32, i32) {
    %c0_i32 = arith.constant 0 : i32
    return %arg0, %arg2 : i32, i32
  }
  func.func @transform_1(%arg0: i32, %arg1: i32, %arg2: i32) -> (i32, i32) {
    %c0_i32 = arith.constant 0 : i32
    %c0_i32_0 = arith.constant 0 : i32
    return %c0_i32, %arg1 : i32, i32
  }
  func.func @transform_2(%arg0: i32, %arg1: i32, %arg2: i32) -> (i32, i32) {
    %c0_i32 = arith.constant 0 : i32
    return %arg0, %arg1 : i32, i32
  }
  func.func @transform_3(%arg0: i32, %arg1: i32, %arg2: i32) -> (i32, i32, i32) {
    %c0_i32 = arith.constant 0 : i32
    %c0_i32_0 = arith.constant 0 : i32
    return %arg0, %c0_i32, %arg1 : i32, i32, i32
  }
}

module attributes {stable_mosaic.version = 11 : i64} {
  func.func @kernel(%arg0: i32, %arg1: i32, %arg2: i32, %arg3: memref<128x256xbf16, #tpu.memory_space<vmem>>, %arg4: memref<256x128xbf16, #tpu.memory_space<vmem>>, %arg5: memref<128x128xbf16, #tpu.memory_space<vmem>>, %arg6: memref<1x8x128xf32, #tpu.memory_space<vmem>>, %arg7: memref<128x128xf32, #tpu.memory_space<vmem>>) attributes {dimension_semantics = [#tpu.dimension_semantics<parallel>, #tpu.dimension_semantics<parallel>, #tpu.dimension_semantics<arbitrary>], iteration_bounds = array<i64: 1, 1, 1>, scalar_prefetch = 0 : i64, scratch_operands = 1 : i64, tpu.core_type = #tpu.core_type<tc>, window_params = [{transform_indices = @transform_0, window_bounds = array<i64: 128, 256>}, {transform_indices = @transform_1, window_bounds = array<i64: 256, 128>}, {transform_indices = @transform_2, window_bounds = array<i64: 128, 128>}, {transform_indices = @transform_3, window_bounds = array<i64: 1, 8, 128>}]} {
    %c0_i32 = arith.constant 0 : i32
    %0 = arith.cmpi eq, %arg2, %c0_i32 : i32
    %1 = arith.extui %0 : i1 to i32
    %c0_i32_0 = arith.constant 0 : i32
    %2 = arith.cmpi ne, %1, %c0_i32_0 : i32
    scf.if %2 {
      %cst_9 = arith.constant 0.000000e+00 : f32
      %15 = vector.broadcast %cst_9 : f32 to vector<128x128xf32>
      %c0_10 = arith.constant 0 : index
      %c0_11 = arith.constant 0 : index
      %16 = vector.load %arg7[%c0_10, %c0_11] : memref<128x128xf32, #tpu.memory_space<vmem>>, vector<128x128xf32>
      tpu.vector_store %arg7[%c0_10, %c0_11], %15 {strides = array<i32>} : memref<128x128xf32, #tpu.memory_space<vmem>>, vector<128x128xf32>,
    } else {
    }
    %c256_i32 = arith.constant 256 : i32
    %3 = arith.muli %arg2, %c256_i32 : i32
    %4 = tpu.assume_multiple %3, 256 : i32
    %c0 = arith.constant 0 : index
    %c0_1 = arith.constant 0 : index
    %5 = vector.load %arg7[%c0, %c0_1] : memref<128x128xf32, #tpu.memory_space<vmem>>, vector<128x128xf32>
    %c0_2 = arith.constant 0 : index
    %c0_3 = arith.constant 0 : index
    %6 = vector.load %arg3[%c0_2, %c0_3] : memref<128x256xbf16, #tpu.memory_space<vmem>>, vector<128x256xbf16>
    %7 = arith.index_cast %4 : i32 to index
    %c0_4 = arith.constant 0 : index
    %8 = vector.load %arg4[%7, %c0_4] : memref<256x128xbf16, #tpu.memory_space<vmem>>, vector<256x128xbf16>
    %cst = arith.constant dense<0.000000e+00> : vector<128x128xf32>
    %9 = tpu.matmul %6, %8, %cst {dimension_numbers = #tpu.dot_dimension_numbers<[1], [0], [0], [1], [0, 0, 1, 1], [], []>} : vector<128x256xbf16>, vector<256x128xbf16>, vector<128x128xf32> -> vector<128x128xf32>
    %10 = arith.addf %5, %9 : vector<128x128xf32>
    %c0_5 = arith.constant 0 : index
    %c0_6 = arith.constant 0 : index
    %11 = vector.load %arg7[%c0_5, %c0_6] : memref<128x128xf32, #tpu.memory_space<vmem>>, vector<128x128xf32>
    tpu.vector_store %arg7[%c0_5, %c0_6], %10 {strides = array<i32>} : memref<128x128xf32, #tpu.memory_space<vmem>>, vector<128x128xf32>,
    %c0_i32_7 = arith.constant 0 : i32
    %12 = arith.cmpi eq, %arg2, %c0_i32_7 : i32
    %13 = arith.extui %12 : i1 to i32
    %c0_i32_8 = arith.constant 0 : i32
    %14 = arith.cmpi ne, %13, %c0_i32_8 : i32
    scf.if %14 {
      %c0_9 = arith.constant 0 : index
      %c0_10 = arith.constant 0 : index
      %15 = vector.load %arg7[%c0_9, %c0_10] : memref<128x128xf32, #tpu.memory_space<vmem>>, vector<128x128xf32>
      %cst_11 = arith.constant dense<0.000000e+00> : vector<128xf32>
      %16 = vector.multi_reduction <add>, %15, %cst_11 [0] : vector<128x128xf32> to vector<128xf32>
      %17 = vector.shape_cast %16 : vector<128xf32> to vector<1x128xf32>
      %18 = arith.mulf %15, %15 : vector<128x128xf32>
      %cst_12 = arith.constant dense<0.000000e+00> : vector<128xf32>
      %19 = vector.multi_reduction <add>, %18, %cst_12 [0] : vector<128x128xf32> to vector<128xf32>
      %20 = vector.shape_cast %19 : vector<128xf32> to vector<1x128xf32>
      %21 = vector.shape_cast %17 : vector<1x128xf32> to vector<1x1x128xf32>
      %c0_13 = arith.constant 0 : index
      %c0_14 = arith.constant 0 : index
      %c0_15 = arith.constant 0 : index
      %22 = vector.load %arg6[%c0_13, %c0_14, %c0_15] : memref<1x8x128xf32, #tpu.memory_space<vmem>>, vector<1x1x128xf32>
      tpu.vector_store %arg6[%c0_13, %c0_14, %c0_15], %21 {strides = array<i32>} : memref<1x8x128xf32, #tpu.memory_space<vmem>>, vector<1x1x128xf32>,
      %23 = vector.shape_cast %20 : vector<1x128xf32> to vector<1x1x128xf32>
      %c0_16 = arith.constant 0 : index
      %c1 = arith.constant 1 : index
      %c0_17 = arith.constant 0 : index
      %24 = vector.load %arg6[%c0_16, %c1, %c0_17] : memref<1x8x128xf32, #tpu.memory_space<vmem>>, vector<1x1x128xf32>
      tpu.vector_store %arg6[%c0_16, %c1, %c0_17], %23 {strides = array<i32>} : memref<1x8x128xf32, #tpu.memory_space<vmem>>, vector<1x1x128xf32>,
      %25 = arith.truncf %15 : vector<128x128xf32> to vector<128x128xbf16>
      %c0_18 = arith.constant 0 : index
      %c0_19 = arith.constant 0 : index
      %26 = vector.load %arg5[%c0_18, %c0_19] : memref<128x128xbf16, #tpu.memory_space<vmem>>, vector<128x128xbf16>
      tpu.vector_store %arg5[%c0_18, %c0_19], %25 {strides = array<i32>} : memref<128x128xbf16, #tpu.memory_space<vmem>>, vector<128x128xbf16>,
    } else {
    }
    return
  }
  func.func @transform_0(%arg0: i32, %arg1: i32, %arg2: i32) -> (i32, i32) {
    %c0_i32 = arith.constant 0 : i32
    return %arg0, %arg2 : i32, i32
  }
  func.func @transform_1(%arg0: i32, %arg1: i32, %arg2: i32) -> (i32, i32) {
    %c0_i32 = arith.constant 0 : i32
    %c0_i32_0 = arith.constant 0 : i32
    return %c0_i32, %arg1 : i32, i32
  }
  func.func @transform_2(%arg0: i32, %arg1: i32, %arg2: i32) -> (i32, i32) {
    %c0_i32 = arith.constant 0 : i32
    return %arg0, %arg1 : i32, i32
  }
  func.func @transform_3(%arg0: i32, %arg1: i32, %arg2: i32) -> (i32, i32, i32) {
    %c0_i32 = arith.constant 0 : i32
    %c0_i32_0 = arith.constant 0 : i32
    return %arg0, %c0_i32, %arg1 : i32, i32, i32
  }
}

module attributes {stable_mosaic.version = 11 : i64} {
  func.func @kernel(%arg0: i32, %arg1: i32, %arg2: i32, %arg3: memref<32x512xbf16, #tpu.memory_space<vmem>>, %arg4: memref<512x128xbf16, #tpu.memory_space<vmem>>, %arg5: memref<32x128xbf16, #tpu.memory_space<vmem>>, %arg6: memref<1x8x128xf32, #tpu.memory_space<vmem>>, %arg7: memref<32x128xf32, #tpu.memory_space<vmem>>) attributes {dimension_semantics = [#tpu.dimension_semantics<parallel>, #tpu.dimension_semantics<parallel>, #tpu.dimension_semantics<arbitrary>], iteration_bounds = array<i64: 1, 1, 1>, scalar_prefetch = 0 : i64, scratch_operands = 1 : i64, tpu.core_type = #tpu.core_type<tc>, window_params = [{transform_indices = @transform_0, window_bounds = array<i64: 32, 512>}, {transform_indices = @transform_1, window_bounds = array<i64: 512, 128>}, {transform_indices = @transform_2, window_bounds = array<i64: 32, 128>}, {transform_indices = @transform_3, window_bounds = array<i64: 1, 8, 128>}]} {
    %c0_i32 = arith.constant 0 : i32
    %0 = arith.cmpi eq, %arg2, %c0_i32 : i32
    %1 = arith.extui %0 : i1 to i32
    %c0_i32_0 = arith.constant 0 : i32
    %2 = arith.cmpi ne, %1, %c0_i32_0 : i32
    scf.if %2 {
      %cst_9 = arith.constant 0.000000e+00 : f32
      %15 = vector.broadcast %cst_9 : f32 to vector<32x128xf32>
      %c0_10 = arith.constant 0 : index
      %c0_11 = arith.constant 0 : index
      %16 = vector.load %arg7[%c0_10, %c0_11] : memref<32x128xf32, #tpu.memory_space<vmem>>, vector<32x128xf32>
      tpu.vector_store %arg7[%c0_10, %c0_11], %15 {strides = array<i32>} : memref<32x128xf32, #tpu.memory_space<vmem>>, vector<32x128xf32>,
    } else {
    }
    %c512_i32 = arith.constant 512 : i32
    %3 = arith.muli %arg2, %c512_i32 : i32
    %4 = tpu.assume_multiple %3, 512 : i32
    %c0 = arith.constant 0 : index
    %c0_1 = arith.constant 0 : index
    %5 = vector.load %arg7[%c0, %c0_1] : memref<32x128xf32, #tpu.memory_space<vmem>>, vector<32x128xf32>
    %c0_2 = arith.constant 0 : index
    %c0_3 = arith.constant 0 : index
    %6 = vector.load %arg3[%c0_2, %c0_3] : memref<32x512xbf16, #tpu.memory_space<vmem>>, vector<32x512xbf16>
    %7 = arith.index_cast %4 : i32 to index
    %c0_4 = arith.constant 0 : index
    %8 = vector.load %arg4[%7, %c0_4] : memref<512x128xbf16, #tpu.memory_space<vmem>>, vector<512x128xbf16>
    %cst = arith.constant dense<0.000000e+00> : vector<32x128xf32>
    %9 = tpu.matmul %6, %8, %cst {dimension_numbers = #tpu.dot_dimension_numbers<[1], [0], [0], [1], [0, 0, 1, 1], [], []>} : vector<32x512xbf16>, vector<512x128xbf16>, vector<32x128xf32> -> vector<32x128xf32>
    %10 = arith.addf %5, %9 : vector<32x128xf32>
    %c0_5 = arith.constant 0 : index
    %c0_6 = arith.constant 0 : index
    %11 = vector.load %arg7[%c0_5, %c0_6] : memref<32x128xf32, #tpu.memory_space<vmem>>, vector<32x128xf32>
    tpu.vector_store %arg7[%c0_5, %c0_6], %10 {strides = array<i32>} : memref<32x128xf32, #tpu.memory_space<vmem>>, vector<32x128xf32>,
    %c0_i32_7 = arith.constant 0 : i32
    %12 = arith.cmpi eq, %arg2, %c0_i32_7 : i32
    %13 = arith.extui %12 : i1 to i32
    %c0_i32_8 = arith.constant 0 : i32
    %14 = arith.cmpi ne, %13, %c0_i32_8 : i32
    scf.if %14 {
      %c0_9 = arith.constant 0 : index
      %c0_10 = arith.constant 0 : index
      %15 = vector.load %arg7[%c0_9, %c0_10] : memref<32x128xf32, #tpu.memory_space<vmem>>, vector<32x128xf32>
      %cst_11 = arith.constant dense<0.000000e+00> : vector<128xf32>
      %16 = vector.multi_reduction <add>, %15, %cst_11 [0] : vector<32x128xf32> to vector<128xf32>
      %17 = vector.shape_cast %16 : vector<128xf32> to vector<1x128xf32>
      %18 = arith.mulf %15, %15 : vector<32x128xf32>
      %cst_12 = arith.constant dense<0.000000e+00> : vector<128xf32>
      %19 = vector.multi_reduction <add>, %18, %cst_12 [0] : vector<32x128xf32> to vector<128xf32>
      %20 = vector.shape_cast %19 : vector<128xf32> to vector<1x128xf32>
      %21 = vector.shape_cast %17 : vector<1x128xf32> to vector<1x1x128xf32>
      %c0_13 = arith.constant 0 : index
      %c0_14 = arith.constant 0 : index
      %c0_15 = arith.constant 0 : index
      %22 = vector.load %arg6[%c0_13, %c0_14, %c0_15] : memref<1x8x128xf32, #tpu.memory_space<vmem>>, vector<1x1x128xf32>
      tpu.vector_store %arg6[%c0_13, %c0_14, %c0_15], %21 {strides = array<i32>} : memref<1x8x128xf32, #tpu.memory_space<vmem>>, vector<1x1x128xf32>,
      %23 = vector.shape_cast %20 : vector<1x128xf32> to vector<1x1x128xf32>
      %c0_16 = arith.constant 0 : index
      %c1 = arith.constant 1 : index
      %c0_17 = arith.constant 0 : index
      %24 = vector.load %arg6[%c0_16, %c1, %c0_17] : memref<1x8x128xf32, #tpu.memory_space<vmem>>, vector<1x1x128xf32>
      tpu.vector_store %arg6[%c0_16, %c1, %c0_17], %23 {strides = array<i32>} : memref<1x8x128xf32, #tpu.memory_space<vmem>>, vector<1x1x128xf32>,
      %25 = arith.truncf %15 : vector<32x128xf32> to vector<32x128xbf16>
      %c0_18 = arith.constant 0 : index
      %c0_19 = arith.constant 0 : index
      %26 = vector.load %arg5[%c0_18, %c0_19] : memref<32x128xbf16, #tpu.memory_space<vmem>>, vector<32x128xbf16>
      tpu.vector_store %arg5[%c0_18, %c0_19], %25 {strides = array<i32>} : memref<32x128xbf16, #tpu.memory_space<vmem>>, vector<32x128xbf16>,
    } else {
    }
    return
  }
  func.func @transform_0(%arg0: i32, %arg1: i32, %arg2: i32) -> (i32, i32) {
    %c0_i32 = arith.constant 0 : i32
    return %arg0, %arg2 : i32, i32
  }
  func.func @transform_1(%arg0: i32, %arg1: i32, %arg2: i32) -> (i32, i32) {
    %c0_i32 = arith.constant 0 : i32
    %c0_i32_0 = arith.constant 0 : i32
    return %c0_i32, %arg1 : i32, i32
  }
  func.func @transform_2(%arg0: i32, %arg1: i32, %arg2: i32) -> (i32, i32) {
    %c0_i32 = arith.constant 0 : i32
    return %arg0, %arg1 : i32, i32
  }
  func.func @transform_3(%arg0: i32, %arg1: i32, %arg2: i32) -> (i32, i32, i32) {
    %c0_i32 = arith.constant 0 : i32
    %c0_i32_0 = arith.constant 0 : i32
    return %arg0, %c0_i32, %arg1 : i32, i32, i32
  }
}

module attributes {stable_mosaic.version = 11 : i64} {
  func.func @kernel(%arg0: i32, %arg1: i32, %arg2: i32, %arg3: memref<8x512xbf16, #tpu.memory_space<vmem>>, %arg4: memref<1024x128xbf16, #tpu.memory_space<vmem>>, %arg5: memref<1x128xf32, #tpu.memory_space<vmem>>, %arg6: memref<8x128xf32, #tpu.memory_space<vmem>>, %arg7: memref<8x128xf32, #tpu.memory_space<vmem>>) attributes {dimension_semantics = [#tpu.dimension_semantics<parallel>, #tpu.dimension_semantics<parallel>, #tpu.dimension_semantics<arbitrary>], iteration_bounds = array<i64: 1, 1, 2>, scalar_prefetch = 0 : i64, scratch_operands = 1 : i64, tpu.core_type = #tpu.core_type<tc>, window_params = [{transform_indices = @transform_0, window_bounds = array<i64: 8, 512>}, {transform_indices = @transform_1, window_bounds = array<i64: 1024, 128>}, {transform_indices = @transform_2, window_bounds = array<i64: 1, 128>}, {transform_indices = @transform_3, window_bounds = array<i64: 8, 128>}]} {
    %c0_i32 = arith.constant 0 : i32
    %0 = arith.cmpi eq, %arg2, %c0_i32 : i32
    %1 = arith.extui %0 : i1 to i32
    %c0_i32_0 = arith.constant 0 : i32
    %2 = arith.cmpi ne, %1, %c0_i32_0 : i32
    scf.if %2 {
      %cst_8 = arith.constant 0.000000e+00 : f32
      %15 = vector.broadcast %cst_8 : f32 to vector<8x128xf32>
      %c0_9 = arith.constant 0 : index
      %c0_10 = arith.constant 0 : index
      %16 = vector.load %arg7[%c0_9, %c0_10] : memref<8x128xf32, #tpu.memory_space<vmem>>, vector<8x128xf32>
      tpu.vector_store %arg7[%c0_9, %c0_10], %15 {strides = array<i32>} : memref<8x128xf32, #tpu.memory_space<vmem>>, vector<8x128xf32>,
    } else {
    }
    %c512_i32 = arith.constant 512 : i32
    %3 = arith.muli %arg2, %c512_i32 : i32
    %4 = tpu.assume_multiple %3, 512 : i32
    %c0 = arith.constant 0 : index
    %c0_1 = arith.constant 0 : index
    %5 = vector.load %arg7[%c0, %c0_1] : memref<8x128xf32, #tpu.memory_space<vmem>>, vector<8x128xf32>
    %c0_2 = arith.constant 0 : index
    %c0_3 = arith.constant 0 : index
    %6 = vector.load %arg3[%c0_2, %c0_3] : memref<8x512xbf16, #tpu.memory_space<vmem>>, vector<8x512xbf16>
    %7 = arith.index_cast %4 : i32 to index
    %c0_4 = arith.constant 0 : index
    %8 = vector.load %arg4[%7, %c0_4] : memref<1024x128xbf16, #tpu.memory_space<vmem>>, vector<512x128xbf16>
    %cst = arith.constant dense<0.000000e+00> : vector<8x128xf32>
    %9 = tpu.matmul %6, %8, %cst {dimension_numbers = #tpu.dot_dimension_numbers<[1], [0], [0], [1], [0, 0, 1, 1], [], []>} : vector<8x512xbf16>, vector<512x128xbf16>, vector<8x128xf32> -> vector<8x128xf32>
    %10 = arith.addf %5, %9 : vector<8x128xf32>
    %c0_5 = arith.constant 0 : index
    %c0_6 = arith.constant 0 : index
    %11 = vector.load %arg7[%c0_5, %c0_6] : memref<8x128xf32, #tpu.memory_space<vmem>>, vector<8x128xf32>
    tpu.vector_store %arg7[%c0_5, %c0_6], %10 {strides = array<i32>} : memref<8x128xf32, #tpu.memory_space<vmem>>, vector<8x128xf32>,
    %c1_i32 = arith.constant 1 : i32
    %12 = arith.cmpi eq, %arg2, %c1_i32 : i32
    %13 = arith.extui %12 : i1 to i32
    %c0_i32_7 = arith.constant 0 : i32
    %14 = arith.cmpi ne, %13, %c0_i32_7 : i32
    scf.if %14 {
      %c0_8 = arith.constant 0 : index
      %c0_9 = arith.constant 0 : index
      %15 = vector.load %arg7[%c0_8, %c0_9] : memref<8x128xf32, #tpu.memory_space<vmem>>, vector<8x128xf32>
      %c0_10 = arith.constant 0 : index
      %c0_11 = arith.constant 0 : index
      %16 = vector.load %arg5[%c0_10, %c0_11] : memref<1x128xf32, #tpu.memory_space<vmem>>, vector<1x128xf32>
      %17 = vector.broadcast %16 : vector<1x128xf32> to vector<8x128xf32>
      %18 = arith.addf %15, %17 : vector<8x128xf32>
      %19 = arith.negf %18 : vector<8x128xf32>
      %20 = math.exp %19 : vector<8x128xf32>
      %cst_12 = arith.constant 1.000000e+00 : f32
      %21 = vector.broadcast %cst_12 : f32 to vector<8x128xf32>
      %22 = arith.addf %21, %20 : vector<8x128xf32>
      %23 = arith.divf %21, %22 : vector<8x128xf32>
      %c0_13 = arith.constant 0 : index
      %c0_14 = arith.constant 0 : index
      %24 = vector.load %arg6[%c0_13, %c0_14] : memref<8x128xf32, #tpu.memory_space<vmem>>, vector<8x128xf32>
      tpu.vector_store %arg6[%c0_13, %c0_14], %23 {strides = array<i32>} : memref<8x128xf32, #tpu.memory_space<vmem>>, vector<8x128xf32>,
    } else {
    }
    return
  }
  func.func @transform_0(%arg0: i32, %arg1: i32, %arg2: i32) -> (i32, i32) {
    %c0_i32 = arith.constant 0 : i32
    return %arg0, %arg2 : i32, i32
  }
  func.func @transform_1(%arg0: i32, %arg1: i32, %arg2: i32) -> (i32, i32) {
    %c0_i32 = arith.constant 0 : i32
    %c0_i32_0 = arith.constant 0 : i32
    return %c0_i32, %arg1 : i32, i32
  }
  func.func @transform_2(%arg0: i32, %arg1: i32, %arg2: i32) -> (i32, i32) {
    %c0_i32 = arith.constant 0 : i32
    %c0_i32_0 = arith.constant 0 : i32
    return %c0_i32, %arg1 : i32, i32
  }
  func.func @transform_3(%arg0: i32, %arg1: i32, %arg2: i32) -> (i32, i32) {
    %c0_i32 = arith.constant 0 : i32
    return %arg0, %arg1 : i32, i32
  }
}

</mosaic_0001>

<bundles_post_ra>
// kernel: dnet_forward.5
= control target key start
LH: loop header
LB: loop body
LE: loop exit
PB: predicated region body
PF: predicated region fallthrough
CT: control target
= control target key end

     0   :  { %s4188_s9 = smov 0   ;;  %s4190_s10 = smov 0   ;;  %s4399_s0 = inlined_call_operand.vmem [shape: bf16[2048,128], index: 0, kind: input, shape index: {}]   ;;  %s4400_s1 = inlined_call_operand.vmem [shape: bf16[128,128], index: 1, kind: input, shape index: {}]   ;;  %s4401_s2 = inlined_call_operand.vmem [shape: bf16[2048,128], index: 2, kind: output, shape index: {}]  }
   0x1   :  { %s4192_s11 = smov 0  }
   0x2 LB: > { %s31_s12 = sadd.s32 1, %s4167_s10  ;;  %p3103_p0 = scmp.ge.s32.totalorder %s4171_s11, 1  ;;  %s4171_s11 = sphi %s4192_s11, %s12_s11   ;;  %s4167_s10 = sphi %s4190_s10, %s4403_s10   ;;  %s4163_s9 = sphi %s4188_s9, %s4402_s9  }
   0x3   : > { %p33_p1 = scmp.ge.s32.totalorder %s31_s12, 2  ;;  %p148_p2 = scmp.lt.s32.totalorder %s4171_s11, 3 }
   0x5   : > { %s4405_s12 = smov (%p33_p1, %s31_s12), 0  ;;  %p149_p3 = pnand %p3103_p0, %p148_p2 }
   0x6   : > { %v4077_v0 = vld [vmem:[%s4400_s1] sm:$0xff] (!%p149_p3)   ;;  %s3104_s15 = sshll.u32 (!%p149_p3), %s4163_s9, 7  ;;  %v4078_v1 = vld [vmem:[%s4400_s1 + $0x8] sm:$0xff] (!%p149_p3)   ;;  %v4079_v2 = vld [vmem:[%s4400_s1 + $0x10] sm:$0xff] (!%p149_p3)  }
   0x7   : > { %152 = sbr.rel (%p149_p3) target bundleno = 382 (0x17e), region = 28  ;;  %p181_p4 = scmp.lt.s32.totalorder (!%p149_p3), %s3104_s15, 255  ;;  %3893 = vmatprep.subr.bf16.mxu0 (!%p149_p3), %v4077_v0  ;;  %4037 = vmatprep.subr.bf16.mxu1 (!%p149_p3), %v4077_v0  ;;  %v4080_v3 = vld [vmem:[%s4400_s1 + $0x18] sm:$0xff] (!%p149_p3)   ;;  %v4081_v6 = vld [vmem:[%s4400_s1 + $0x20] sm:$0xff] (!%p149_p3)   ;;  %v4082_v7 = vld [vmem:[%s4400_s1 + $0x28] sm:$0xff] (!%p149_p3)  }
   0x8   : > { %3894 = vmatpush3.bf16.msra.mxu0 (!%p149_p3), %v4077_v0  ;;  %4045 = vmatpush3.bf16.msra.mxu1 (!%p149_p3), %v4077_v0  ;;  %v4083_v8 = vld [vmem:[%s4400_s1 + $0x30] sm:$0xff] (!%p149_p3)   ;;  %v4084_v9 = vld [vmem:[%s4400_s1 + $0x38] sm:$0xff] (!%p149_p3)  }
   0x9   : > { %3895 = vmatprep.subr.bf16.mxu0 (!%p149_p3), %v4078_v1  ;;  %4038 = vmatprep.subr.bf16.mxu1 (!%p149_p3), %v4078_v1 }
   0xc   : > { %3896 = vmatpush3.bf16.msra.mxu0 (!%p149_p3), %v4078_v1  ;;  %4046 = vmatpush3.bf16.msra.mxu1 (!%p149_p3), %v4078_v1 }
   0xd   : > { %3897 = vmatprep.subr.bf16.mxu0 (!%p149_p3), %v4079_v2  ;;  %4039 = vmatprep.subr.bf16.mxu1 (!%p149_p3), %v4079_v2 }
   0xe   : > { %s4407_s15 = smov (!%p181_p4, %s3104_s15), 255 }
   0xf   : > { %s3105_s20 = sshll.u32 %s4407_s15, 2 }
  0x10   : > { %s4223_s23 = scalar_lea.vmem %s4399_s0, %s3105_s20  ;;  %3898 = vmatpush3.bf16.msra.mxu0 %v4079_v2  ;;  %4047 = vmatpush3.bf16.msra.mxu1 %v4079_v2  ;;  %s4309_s8 = scalar_lea.vmem %s4401_s2, %s3105_s20 }
  0x11   : > { %v4085_v4 = vld [vmem:[%s4223_s23] sm:$0xff]   ;;  %3899 = vmatprep.subr.bf16.mxu0 %v4080_v3  ;;  %4040 = vmatprep.subr.bf16.mxu1 %v4080_v3  ;;  %v4087_v10 = vld [vmem:[%s4223_s23 + $0x8] sm:$0xff]   ;;  %v4089_v12 = vld [vmem:[%s4223_s23 + $0x10] sm:$0xff]  }
  0x12   : > { %v4086_v5 = vld [vmem:[%s4223_s23 + $0x100] sm:$0xff]   ;;  %3909 = vmatprep.mubr.bf16.mxu0 %v4085_v4  ;;  %v4088_v11 = vld [vmem:[%s4223_s23 + $0x108] sm:$0xff]   ;;  %v4090_v13 = vld [vmem:[%s4223_s23 + $0x110] sm:$0xff]  }
  0x13   : > { %3973 = vmatprep.mubr.bf16.mxu1 %v4086_v5  ;;  %v4091_v14 = vld [vmem:[%s4223_s23 + $0x18] sm:$0xff]   ;;  %v4093_v16 = vld [vmem:[%s4223_s23 + $0x20] sm:$0xff]   ;;  %v4095_v18 = vld [vmem:[%s4223_s23 + $0x28] sm:$0xff]  }
  0x14   : > { %3900 = vmatpush3.bf16.msra.mxu0 %v4080_v3  ;;  %4048 = vmatpush3.bf16.msra.mxu1 %v4080_v3  ;;  %v4092_v15 = vld [vmem:[%s4223_s23 + $0x118] sm:$0xff]   ;;  %v4094_v17 = vld [vmem:[%s4223_s23 + $0x120] sm:$0xff]   ;;  %v4096_v19 = vld [vmem:[%s4223_s23 + $0x128] sm:$0xff]  }
  0x15   : > { %3901 = vmatprep.subr.bf16.mxu0 %v4081_v6  ;;  %4041 = vmatprep.subr.bf16.mxu1 %v4081_v6  ;;  %v4097_v20 = vld [vmem:[%s4223_s23 + $0x30] sm:$0xff]   ;;  %v4099_v22 = vld [vmem:[%s4223_s23 + $0x38] sm:$0xff]   ;;  %v4101_v24 = vld [vmem:[%s4223_s23 + $0x40] sm:$0xff]  }
  0x16   : > { %v4098_v21 = vld [vmem:[%s4223_s23 + $0x130] sm:$0xff]   ;;  %v4100_v23 = vld [vmem:[%s4223_s23 + $0x138] sm:$0xff]   ;;  %v4102_v25 = vld [vmem:[%s4223_s23 + $0x140] sm:$0xff]  }
  0x17   : > { %v4103_v26 = vld [vmem:[%s4223_s23 + $0x48] sm:$0xff]   ;;  %v4105_v28 = vld [vmem:[%s4223_s23 + $0x50] sm:$0xff]   ;;  %v4107_v30 = vld [vmem:[%s4223_s23 + $0x58] sm:$0xff]  }
  0x18   : > { %3902 = vmatpush3.bf16.msra.mxu0 %v4081_v6  ;;  %4049 = vmatpush3.bf16.msra.mxu1 %v4081_v6  ;;  %v4104_v27 = vld [vmem:[%s4223_s23 + $0x148] sm:$0xff]   ;;  %v4106_v29 = vld [vmem:[%s4223_s23 + $0x150] sm:$0xff]   ;;  %v4108_v31 = vld [vmem:[%s4223_s23 + $0x158] sm:$0xff]  }
  0x19   : > { %3903 = vmatprep.subr.bf16.mxu0 %v4082_v7  ;;  %4042 = vmatprep.subr.bf16.mxu1 %v4082_v7  ;;  %v4109_v32 = vld [vmem:[%s4223_s23 + $0x60] sm:$0xff]   ;;  %v4111_v34 = vld [vmem:[%s4223_s23 + $0x68] sm:$0xff]   ;;  %v4113_v36 = vld [vmem:[%s4223_s23 + $0x70] sm:$0xff]  }
  0x1a   : > { %v4110_v33 = vld [vmem:[%s4223_s23 + $0x160] sm:$0xff]   ;;  %v4112_v35 = vld [vmem:[%s4223_s23 + $0x168] sm:$0xff]   ;;  %v4114_v37 = vld [vmem:[%s4223_s23 + $0x170] sm:$0xff]  }
  0x1b   : > { %v4115_v38 = vld [vmem:[%s4223_s23 + $0x78] sm:$0xff]   ;;  %v4117_v40 = vld [vmem:[%s4223_s23 + $0x80] sm:$0xff]   ;;  %v4119_v42 = vld [vmem:[%s4223_s23 + $0x88] sm:$0xff]  }
  0x1c   : > { %3904 = vmatpush3.bf16.msra.mxu0 %v4082_v7  ;;  %4050 = vmatpush3.bf16.msra.mxu1 %v4082_v7  ;;  %v4116_v39 = vld [vmem:[%s4223_s23 + $0x178] sm:$0xff]   ;;  %v4118_v41 = vld [vmem:[%s4223_s23 + $0x180] sm:$0xff]   ;;  %v4120_v43 = vld [vmem:[%s4223_s23 + $0x188] sm:$0xff]  }
  0x1d   : > { %3905 = vmatprep.subr.bf16.mxu0 %v4083_v8  ;;  %4043 = vmatprep.subr.bf16.mxu1 %v4083_v8  ;;  %v4121_v44 = vld [vmem:[%s4223_s23 + $0x90] sm:$0xff]   ;;  %v4123_v46 = vld [vmem:[%s4223_s23 + $0x98] sm:$0xff]   ;;  %v4125_v48 = vld [vmem:[%s4223_s23 + $0xa0] sm:$0xff]  }
  0x1e   : > { %v4122_v45 = vld [vmem:[%s4223_s23 + $0x190] sm:$0xff]   ;;  %v4124_v47 = vld [vmem:[%s4223_s23 + $0x198] sm:$0xff]   ;;  %v4126_v49 = vld [vmem:[%s4223_s23 + $0x1a0] sm:$0xff]  }
  0x1f   : > { %v4127_v50 = vld [vmem:[%s4223_s23 + $0xa8] sm:$0xff]   ;;  %v4129_v52 = vld [vmem:[%s4223_s23 + $0xb0] sm:$0xff]   ;;  %v4131_v54 = vld [vmem:[%s4223_s23 + $0xb8] sm:$0xff]  }
  0x20   : > { %3906 = vmatpush3.bf16.msra.mxu0 %v4083_v8  ;;  %4051 = vmatpush3.bf16.msra.mxu1 %v4083_v8  ;;  %v4128_v51 = vld [vmem:[%s4223_s23 + $0x1a8] sm:$0xff]   ;;  %v4130_v53 = vld [vmem:[%s4223_s23 + $0x1b0] sm:$0xff]   ;;  %v4132_v55 = vld [vmem:[%s4223_s23 + $0x1b8] sm:$0xff]  }
  0x21   : > { %3907 = vmatprep.subr.bf16.mxu0 %v4084_v9  ;;  %4044 = vmatprep.subr.bf16.mxu1 %v4084_v9  ;;  %v4133_v56 = vld [vmem:[%s4223_s23 + $0xc0] sm:$0xff]   ;;  %v4135_v58 = vld [vmem:[%s4223_s23 + $0xc8] sm:$0xff]   ;;  %v4137_v60 = vld [vmem:[%s4223_s23 + $0xd0] sm:$0xff]  }
  0x22   : > { %v4134_v57 = vld [vmem:[%s4223_s23 + $0x1c0] sm:$0xff]   ;;  %v4136_v59 = vld [vmem:[%s4223_s23 + $0x1c8] sm:$0xff]   ;;  %v4138_v61 = vld [vmem:[%s4223_s23 + $0x1d0] sm:$0xff]  }
  0x23   : > { %v4139_v62 = vld [vmem:[%s4223_s23 + $0xd8] sm:$0xff]   ;;  %v4141_v0 = vld [vmem:[%s4223_s23 + $0xe0] sm:$0xff]   ;;  %v4143_v2 = vld [vmem:[%s4223_s23 + $0xe8] sm:$0xff]  }
  0x24   : > { %3908 = vmatpush3.bf16.msra.mxu0 %v4084_v9  ;;  %4052 = vmatpush3.bf16.msra.mxu1 %v4084_v9  ;;  %v4140_v63 = vld [vmem:[%s4223_s23 + $0x1d8] sm:$0xff]   ;;  %v4142_v1 = vld [vmem:[%s4223_s23 + $0x1e0] sm:$0xff]   ;;  %v4144_v3 = vld [vmem:[%s4223_s23 + $0x1e8] sm:$0xff]  }
  0x25   : > { %v4145_v4 = vld [vmem:[%s4223_s23 + $0xf0] sm:$0xff]   ;;  %v4147_v6 = vld [vmem:[%s4223_s23 + $0xf8] sm:$0xff]  }
  0x26   : > { %v4146_v5 = vld [vmem:[%s4223_s23 + $0x1f0] sm:$0xff]   ;;  %v4148_v7 = vld [vmem:[%s4223_s23 + $0x1f8] sm:$0xff]  }
  0x27   : > { %3910 = vmatmul.mubr.bf16.vlgmr.msra.gmra.mrb[0].mxu0 %v4087_v10  ;;  %3974 = vmatmul.mubr.bf16.vlgmr.msra.gmra.mrb[0].mxu1 %v4088_v11 }
  0x28   : > { %3913 = vmatprep.mubr.bf16.mxu0 %v4089_v12  ;;  %3977 = vmatprep.mubr.bf16.mxu1 %v4090_v13 }
  0x2f   : > { %3914 = vmatmul.mubr.bf16.gmra.mrb[4].mxu0 %v4091_v14  ;;  %3978 = vmatmul.mubr.bf16.gmra.mrb[4].mxu1 %v4092_v15 }
  0x30   : > { %3917 = vmatprep.mubr.bf16.mxu0 %v4093_v16  ;;  %3981 = vmatprep.mubr.bf16.mxu1 %v4094_v17 }
  0x37   : > { %3918 = vmatmul.mubr.bf16.gmra.mrb[8].mxu0 %v4095_v18  ;;  %3982 = vmatmul.mubr.bf16.gmra.mrb[8].mxu1 %v4096_v19 }
  0x38   : > { %3921 = vmatprep.mubr.bf16.mxu0 %v4097_v20  ;;  %3985 = vmatprep.mubr.bf16.mxu1 %v4098_v21 }
  0x3f   : > { %3922 = vmatmul.mubr.bf16.gmra.mrb[12].mxu0 %v4099_v22  ;;  %3986 = vmatmul.mubr.bf16.gmra.mrb[12].mxu1 %v4100_v23 }
  0x40   : > { %3925 = vmatprep.mubr.bf16.mxu0 %v4101_v24  ;;  %3989 = vmatprep.mubr.bf16.mxu1 %v4102_v25 }
  0x47   : > { %3926 = vmatmul.mubr.bf16.gmra.mrb[16].mxu0 %v4103_v26  ;;  %3990 = vmatmul.mubr.bf16.gmra.mrb[16].mxu1 %v4104_v27 }
  0x48   : > { %3929 = vmatprep.mubr.bf16.mxu0 %v4105_v28  ;;  %3993 = vmatprep.mubr.bf16.mxu1 %v4106_v29 }
  0x4f   : > { %3930 = vmatmul.mubr.bf16.gmra.mrb[20].mxu0 %v4107_v30  ;;  %3994 = vmatmul.mubr.bf16.gmra.mrb[20].mxu1 %v4108_v31 }
  0x50   : > { %3933 = vmatprep.mubr.bf16.mxu0 %v4109_v32  ;;  %3997 = vmatprep.mubr.bf16.mxu1 %v4110_v33 }
  0x57   : > { %3934 = vmatmul.mubr.bf16.gmra.mrb[24].mxu0 %v4111_v34  ;;  %3998 = vmatmul.mubr.bf16.gmra.mrb[24].mxu1 %v4112_v35 }
  0x58   : > { %3937 = vmatprep.mubr.bf16.mxu0 %v4113_v36  ;;  %4001 = vmatprep.mubr.bf16.mxu1 %v4114_v37 }
  0x5f   : > { %3938 = vmatmul.mubr.bf16.gmra.mrb[28].mxu0 %v4115_v38  ;;  %4002 = vmatmul.mubr.bf16.gmra.mrb[28].mxu1 %v4116_v39 }
  0x60   : > { %3941 = vmatprep.mubr.bf16.mxu0 %v4117_v40  ;;  %4005 = vmatprep.mubr.bf16.mxu1 %v4118_v41 }
  0x67   : > { %3942 = vmatmul.mubr.bf16.gmra.mrb[32].mxu0 %v4119_v42  ;;  %4006 = vmatmul.mubr.bf16.gmra.mrb[32].mxu1 %v4120_v43 }
  0x68   : > { %3945 = vmatprep.mubr.bf16.mxu0 %v4121_v44  ;;  %4009 = vmatprep.mubr.bf16.mxu1 %v4122_v45 }
  0x6f   : > { %3946 = vmatmul.mubr.bf16.gmra.mrb[36].mxu0 %v4123_v46  ;;  %4010 = vmatmul.mubr.bf16.gmra.mrb[36].mxu1 %v4124_v47 }
  0x70   : > { %3949 = vmatprep.mubr.bf16.mxu0 %v4125_v48  ;;  %4013 = vmatprep.mubr.bf16.mxu1 %v4126_v49 }
  0x77   : > { %3950 = vmatmul.mubr.bf16.gmra.mrb[40].mxu0 %v4127_v50  ;;  %4014 = vmatmul.mubr.bf16.gmra.mrb[40].mxu1 %v4128_v51 }
  0x78   : > { %3953 = vmatprep.mubr.bf16.mxu0 %v4129_v52  ;;  %4017 = vmatprep.mubr.bf16.mxu1 %v4130_v53 }
  0x7f   : > { %3954 = vmatmul.mubr.bf16.gmra.mrb[44].mxu0 %v4131_v54  ;;  %4018 = vmatmul.mubr.bf16.gmra.mrb[44].mxu1 %v4132_v55 }
  0x80   : > { %3957 = vmatprep.mubr.bf16.mxu0 %v4133_v56  ;;  %4021 = vmatprep.mubr.bf16.mxu1 %v4134_v57 }
  0x87   : > { %3958 = vmatmul.mubr.bf16.gmra.mrb[48].mxu0 %v4135_v58  ;;  %4022 = vmatmul.mubr.bf16.gmra.mrb[48].mxu1 %v4136_v59 }
  0x88   : > { %3961 = vmatprep.mubr.bf16.mxu0 %v4137_v60  ;;  %4025 = vmatprep.mubr.bf16.mxu1 %v4138_v61 }
  0x8f   : > { %3962 = vmatmul.mubr.bf16.gmra.mrb[52].mxu0 %v4139_v62  ;;  %4026 = vmatmul.mubr.bf16.gmra.mrb[52].mxu1 %v4140_v63 }
  0x90   : > { %3965 = vmatprep.mubr.bf16.mxu0 %v4141_v0  ;;  %4029 = vmatprep.mubr.bf16.mxu1 %v4142_v1 }
  0x97   : > { %3966 = vmatmul.mubr.bf16.gmra.mrb[56].mxu0 %v4143_v2  ;;  %4030 = vmatmul.mubr.bf16.gmra.mrb[56].mxu1 %v4144_v3 }
  0x98   : > { %3969 = vmatprep.mubr.bf16.mxu0 %v4145_v4  ;;  %4033 = vmatprep.mubr.bf16.mxu1 %v4146_v5 }
  0x9f   : > { %3970 = vmatmul.mubr.bf16.gmra.mrb[60].mxu0 %v4147_v6  ;;  %4034 = vmatmul.mubr.bf16.gmra.mrb[60].mxu1 %v4148_v7 }
  0xfa   : > { %v3911_v8 = vpop.f32.mrb[0].mxu0  ;;  %v3975_v9 = vpop.f32.mrb[0].mxu1 }
  0xfb   : > { %vm1978_vm0 = vcmp.ge.f32.partialorder %v3911_v8, 0.0  ;;  %v2106_v10 = vmul.f32 0.2, %v3911_v8  ;;  %v2170_v11 = vmul.f32 0.2, %v3975_v9  ;;  %vm2042_vm1 = vcmp.ge.f32.partialorder %v3975_v9, 0.0 }
  0xfc   : > { %v1078_v12 = vpop.f32.mrb[1].mxu0  ;;  %v1334_v13 = vpop.f32.mrb[1].mxu1 }
  0xfd   : > { %v2104_v14 = vmul.f32 0.2, %v1078_v12  ;;  %v3912_v15 = vpop.f32.mrb[2].mxu0  ;;  %v3976_v16 = vpop.f32.mrb[2].mxu1  ;;  %v2234_v17 = vsel %vm1978_vm0, %v3911_v8, %v2106_v10  ;;  %v2168_v18 = vmul.f32 0.2, %v1334_v13  ;;  %v2298_v20 = vsel %vm2042_vm1, %v3975_v9, %v2170_v11 }
  0xfe   : > { %vm1979_vm2 = vcmp.ge.f32.partialorder %v3912_v15, 0.0  ;;  %v2107_v19 = vmul.f32 0.2, %v3912_v15  ;;  %vm1976_vm3 = vcmp.ge.f32.partialorder %v1078_v12, 0.0  ;;  %vm2043_vm4 = vcmp.ge.f32.partialorder %v3976_v16, 0.0  ;;  %v1081_v22 = vpop.f32.mrb[3].mxu0 }
  0xff   : > { %v2171_v21 = vmul.f32 0.2, %v3976_v16  ;;  %v1337_v23 = vpop.f32.mrb[3].mxu1  ;;  %vm2040_vm5 = vcmp.ge.f32.partialorder %v1334_v13, 0.0  ;;  %vm1977_vm6 = vcmp.ge.f32.partialorder %v1081_v22, 0.0  ;;  %v2232_v29 = vsel %vm1976_vm3, %v1078_v12, %v2104_v14 }
 0x100   : > { %v2235_v24 = vsel %vm1979_vm2, %v3912_v15, %v2107_v19  ;;  %v2105_v25 = vmul.f32 0.2, %v1081_v22  ;;  %vm2041_vm7 = vcmp.ge.f32.partialorder %v1337_v23, 0.0  ;;  %v2169_v28 = vmul.f32 0.2, %v1337_v23 }
 0x101   : > { %v3446_v26 = vpack.c.bf16 %v2235_v24, %v2234_v17  ;;  %v2299_v27 = vsel %vm2043_vm4, %v3976_v16, %v2171_v21  ;;  %v2296_v34 = vsel %vm2040_vm5, %v1334_v13, %v2168_v18 }
 0x102   : > { %v3606_v30 = vpack.c.bf16 %v2299_v27, %v2298_v20  ;;  %v2233_v31 = vsel %vm1977_vm6, %v1081_v22, %v2105_v25  ;;  %v3915_v32 = vpop.f32.mrb[4].mxu0  ;;  %v3979_v33 = vpop.f32.mrb[4].mxu1  ;;  %v2297_v36 = vsel %vm2041_vm7, %v1337_v23, %v2169_v28 }
 0x103   : > { %3758 = vst [vmem:[%s4309_s8 + $0x8] sm:$0xff] %v3446_v26   ;;  %v3441_v35 = vpack.c.bf16 %v2233_v31, %v2232_v29  ;;  %v2110_v37 = vmul.f32 0.2, %v3915_v32  ;;  %v1094_v38 = vpop.f32.mrb[5].mxu0  ;;  %v1350_v39 = vpop.f32.mrb[5].mxu1  ;;  %v3601_v40 = vpack.c.bf16 %v2297_v36, %v2296_v34  ;;  %vm1982_vm8 = vcmp.ge.f32.partialorder %v3915_v32, 0.0 }
 0x104   : > { %3790 = vst [vmem:[%s4309_s8 + $0x108] sm:$0xff] %v3606_v30   ;;  %v2174_v41 = vmul.f32 0.2, %v3979_v33  ;;  %v3916_v42 = vpop.f32.mrb[6].mxu0  ;;  %v3980_v43 = vpop.f32.mrb[6].mxu1  ;;  %vm2046_vm9 = vcmp.ge.f32.partialorder %v3979_v33, 0.0 }
 0x105   : > { %3442 = vst [vmem:[%s4309_s8] sm:$0xff] %v3441_v35   ;;  %v2108_v44 = vmul.f32 0.2, %v1094_v38  ;;  %v2172_v45 = vmul.f32 0.2, %v1350_v39  ;;  %v1097_v46 = vpop.f32.mrb[7].mxu0  ;;  %3789 = vst [vmem:[%s4309_s8 + $0x100] sm:$0xff] %v3601_v40   ;;  %v2238_v49 = vsel %vm1982_vm8, %v3915_v32, %v2110_v37 }
 0x106   : > { %vm1980_vm10 = vcmp.ge.f32.partialorder %v1094_v38, 0.0  ;;  %vm1983_vm11 = vcmp.ge.f32.partialorder %v3916_v42, 0.0  ;;  %v2111_v47 = vmul.f32 0.2, %v3916_v42  ;;  %vm2047_vm12 = vcmp.ge.f32.partialorder %v3980_v43, 0.0  ;;  %v1353_v48 = vpop.f32.mrb[7].mxu1 }
 0x107   : > { %vm2044_vm13 = vcmp.ge.f32.partialorder %v1350_v39, 0.0  ;;  %v2175_v50 = vmul.f32 0.2, %v3980_v43  ;;  %vm1981_vm14 = vcmp.ge.f32.partialorder %v1097_v46, 0.0  ;;  %v2109_v52 = vmul.f32 0.2, %v1097_v46 }
 0x108   : > { %v2239_v51 = vsel %vm1983_vm11, %v3916_v42, %v2111_v47  ;;  %vm2045_vm15 = vcmp.ge.f32.partialorder %v1353_v48, 0.0  ;;  %v2173_v53 = vmul.f32 0.2, %v1353_v48  ;;  %v2302_v54 = vsel %vm2046_vm9, %v3979_v33, %v2174_v41 }
 0x109   : > { %v2236_v55 = vsel %vm1980_vm10, %v1094_v38, %v2108_v44  ;;  %v3456_v56 = vpack.c.bf16 %v2239_v51, %v2238_v49  ;;  %v2303_v57 = vsel %vm2047_vm12, %v3980_v43, %v2175_v50  ;;  %v2300_v58 = vsel %vm2044_vm13, %v1350_v39, %v2172_v45 }
 0x10a   : > { %v3616_v59 = vpack.c.bf16 %v2303_v57, %v2302_v54  ;;  %v2237_v60 = vsel %vm1981_vm14, %v1097_v46, %v2109_v52  ;;  %v2301_v61 = vsel %vm2045_vm15, %v1353_v48, %v2173_v53  ;;  %v3919_v62 = vpop.f32.mrb[8].mxu0  ;;  %v3983_v63 = vpop.f32.mrb[8].mxu1 }
 0x10b   : > { %3760 = vst [vmem:[%s4309_s8 + $0x18] sm:$0xff] %v3456_v56   ;;  %v3451_v0 = vpack.c.bf16 %v2237_v60, %v2236_v55  ;;  %v3611_v1 = vpack.c.bf16 %v2301_v61, %v2300_v58  ;;  %vm1986_vm0 = vcmp.ge.f32.partialorder %v3919_v62, 0.0  ;;  %v2114_v2 = vmul.f32 0.2, %v3919_v62  ;;  %v1110_v3 = vpop.f32.mrb[9].mxu0  ;;  %v1366_v4 = vpop.f32.mrb[9].mxu1 }
 0x10c   : > { %3792 = vst [vmem:[%s4309_s8 + $0x118] sm:$0xff] %v3616_v59   ;;  %vm2050_vm1 = vcmp.ge.f32.partialorder %v3983_v63, 0.0  ;;  %v2178_v5 = vmul.f32 0.2, %v3983_v63  ;;  %v2112_v6 = vmul.f32 0.2, %v1110_v3 }
 0x10d   : > { %3759 = vst [vmem:[%s4309_s8 + $0x10] sm:$0xff] %v3451_v0   ;;  %3791 = vst [vmem:[%s4309_s8 + $0x110] sm:$0xff] %v3611_v1   ;;  %v2176_v7 = vmul.f32 0.2, %v1366_v4  ;;  %v3920_v8 = vpop.f32.mrb[10].mxu0  ;;  %v3984_v9 = vpop.f32.mrb[10].mxu1  ;;  %v2242_v10 = vsel %vm1986_vm0, %v3919_v62, %v2114_v2 }
 0x10e   : > { %vm1984_vm2 = vcmp.ge.f32.partialorder %v1110_v3, 0.0  ;;  %vm1987_vm3 = vcmp.ge.f32.partialorder %v3920_v8, 0.0  ;;  %v2115_v11 = vmul.f32 0.2, %v3920_v8  ;;  %v1113_v12 = vpop.f32.mrb[11].mxu0  ;;  %v1369_v13 = vpop.f32.mrb[11].mxu1  ;;  %v2306_v18 = vsel %vm2050_vm1, %v3983_v63, %v2178_v5 }
 0x10f   : > { %vm2048_vm4 = vcmp.ge.f32.partialorder %v1366_v4, 0.0  ;;  %vm2051_vm5 = vcmp.ge.f32.partialorder %v3984_v9, 0.0  ;;  %v2179_v14 = vmul.f32 0.2, %v3984_v9  ;;  %vm1985_vm6 = vcmp.ge.f32.partialorder %v1113_v12, 0.0 }
 0x110   : > { %v2243_v15 = vsel %vm1987_vm3, %v3920_v8, %v2115_v11  ;;  %v2113_v16 = vmul.f32 0.2, %v1113_v12  ;;  %vm2049_vm7 = vcmp.ge.f32.partialorder %v1369_v13, 0.0  ;;  %v2177_v17 = vmul.f32 0.2, %v1369_v13 }
 0x111   : > { %v2240_v19 = vsel %vm1984_vm2, %v1110_v3, %v2112_v6  ;;  %v3466_v20 = vpack.c.bf16 %v2243_v15, %v2242_v10  ;;  %v2307_v21 = vsel %vm2051_vm5, %v3984_v9, %v2179_v14  ;;  %v2304_v22 = vsel %vm2048_vm4, %v1366_v4, %v2176_v7 }
 0x112   : > { %v3626_v23 = vpack.c.bf16 %v2307_v21, %v2306_v18  ;;  %v2241_v24 = vsel %vm1985_vm6, %v1113_v12, %v2113_v16  ;;  %v2305_v25 = vsel %vm2049_vm7, %v1369_v13, %v2177_v17  ;;  %v3923_v26 = vpop.f32.mrb[12].mxu0  ;;  %v3987_v27 = vpop.f32.mrb[12].mxu1 }
 0x113   : > { %3762 = vst [vmem:[%s4309_s8 + $0x28] sm:$0xff] %v3466_v20   ;;  %v3461_v28 = vpack.c.bf16 %v2241_v24, %v2240_v19  ;;  %v3621_v29 = vpack.c.bf16 %v2305_v25, %v2304_v22  ;;  %vm1990_vm8 = vcmp.ge.f32.partialorder %v3923_v26, 0.0  ;;  %v2118_v30 = vmul.f32 0.2, %v3923_v26  ;;  %v1126_v31 = vpop.f32.mrb[13].mxu0  ;;  %v1382_v32 = vpop.f32.mrb[13].mxu1 }
 0x114   : > { %3794 = vst [vmem:[%s4309_s8 + $0x128] sm:$0xff] %v3626_v23   ;;  %vm2054_vm9 = vcmp.ge.f32.partialorder %v3987_v27, 0.0  ;;  %v2182_v33 = vmul.f32 0.2, %v3987_v27  ;;  %v2116_v34 = vmul.f32 0.2, %v1126_v31 }
 0x115   : > { %3761 = vst [vmem:[%s4309_s8 + $0x20] sm:$0xff] %v3461_v28   ;;  %3793 = vst [vmem:[%s4309_s8 + $0x120] sm:$0xff] %v3621_v29   ;;  %v2180_v35 = vmul.f32 0.2, %v1382_v32  ;;  %v3924_v36 = vpop.f32.mrb[14].mxu0  ;;  %v3988_v37 = vpop.f32.mrb[14].mxu1  ;;  %v2246_v38 = vsel %vm1990_vm8, %v3923_v26, %v2118_v30 }
 0x116   : > { %vm1988_vm10 = vcmp.ge.f32.partialorder %v1126_v31, 0.0  ;;  %vm1991_vm11 = vcmp.ge.f32.partialorder %v3924_v36, 0.0  ;;  %v2119_v39 = vmul.f32 0.2, %v3924_v36  ;;  %v1129_v40 = vpop.f32.mrb[15].mxu0  ;;  %v1385_v41 = vpop.f32.mrb[15].mxu1  ;;  %v2310_v46 = vsel %vm2054_vm9, %v3987_v27, %v2182_v33 }
 0x117   : > { %vm2052_vm12 = vcmp.ge.f32.partialorder %v1382_v32, 0.0  ;;  %vm2055_vm13 = vcmp.ge.f32.partialorder %v3988_v37, 0.0  ;;  %v2183_v42 = vmul.f32 0.2, %v3988_v37  ;;  %vm1989_vm14 = vcmp.ge.f32.partialorder %v1129_v40, 0.0 }
 0x118   : > { %v2247_v43 = vsel %vm1991_vm11, %v3924_v36, %v2119_v39  ;;  %v2117_v44 = vmul.f32 0.2, %v1129_v40  ;;  %vm2053_vm15 = vcmp.ge.f32.partialorder %v1385_v41, 0.0  ;;  %v2181_v45 = vmul.f32 0.2, %v1385_v41 }
 0x119   : > { %v2244_v47 = vsel %vm1988_vm10, %v1126_v31, %v2116_v34  ;;  %v3476_v48 = vpack.c.bf16 %v2247_v43, %v2246_v38  ;;  %v2311_v49 = vsel %vm2055_vm13, %v3988_v37, %v2183_v42  ;;  %v2308_v50 = vsel %vm2052_vm12, %v1382_v32, %v2180_v35 }
 0x11a   : > { %v3636_v51 = vpack.c.bf16 %v2311_v49, %v2310_v46  ;;  %v2245_v52 = vsel %vm1989_vm14, %v1129_v40, %v2117_v44  ;;  %v2309_v53 = vsel %vm2053_vm15, %v1385_v41, %v2181_v45  ;;  %v3927_v54 = vpop.f32.mrb[16].mxu0  ;;  %v3991_v55 = vpop.f32.mrb[16].mxu1 }
 0x11b   : > { %3764 = vst [vmem:[%s4309_s8 + $0x38] sm:$0xff] %v3476_v48   ;;  %v3471_v56 = vpack.c.bf16 %v2245_v52, %v2244_v47  ;;  %v3631_v57 = vpack.c.bf16 %v2309_v53, %v2308_v50  ;;  %vm1994_vm0 = vcmp.ge.f32.partialorder %v3927_v54, 0.0  ;;  %v2122_v58 = vmul.f32 0.2, %v3927_v54  ;;  %v1142_v59 = vpop.f32.mrb[17].mxu0  ;;  %v1398_v60 = vpop.f32.mrb[17].mxu1 }
 0x11c   : > { %3796 = vst [vmem:[%s4309_s8 + $0x138] sm:$0xff] %v3636_v51   ;;  %vm2058_vm1 = vcmp.ge.f32.partialorder %v3991_v55, 0.0  ;;  %v2186_v61 = vmul.f32 0.2, %v3991_v55  ;;  %v2120_v62 = vmul.f32 0.2, %v1142_v59 }
 0x11d   : > { %3763 = vst [vmem:[%s4309_s8 + $0x30] sm:$0xff] %v3471_v56   ;;  %3795 = vst [vmem:[%s4309_s8 + $0x130] sm:$0xff] %v3631_v57   ;;  %v2184_v63 = vmul.f32 0.2, %v1398_v60  ;;  %v3928_v0 = vpop.f32.mrb[18].mxu0  ;;  %v3992_v1 = vpop.f32.mrb[18].mxu1  ;;  %v2250_v2 = vsel %vm1994_vm0, %v3927_v54, %v2122_v58 }
 0x11e   : > { %vm1992_vm2 = vcmp.ge.f32.partialorder %v1142_v59, 0.0  ;;  %vm1995_vm3 = vcmp.ge.f32.partialorder %v3928_v0, 0.0  ;;  %v2123_v3 = vmul.f32 0.2, %v3928_v0  ;;  %v1145_v4 = vpop.f32.mrb[19].mxu0  ;;  %v1401_v5 = vpop.f32.mrb[19].mxu1  ;;  %v2314_v10 = vsel %vm2058_vm1, %v3991_v55, %v2186_v61 }
 0x11f   : > { %vm2056_vm4 = vcmp.ge.f32.partialorder %v1398_v60, 0.0  ;;  %vm2059_vm5 = vcmp.ge.f32.partialorder %v3992_v1, 0.0  ;;  %v2187_v6 = vmul.f32 0.2, %v3992_v1  ;;  %vm1993_vm6 = vcmp.ge.f32.partialorder %v1145_v4, 0.0 }
 0x120   : > { %v2251_v7 = vsel %vm1995_vm3, %v3928_v0, %v2123_v3  ;;  %v2121_v8 = vmul.f32 0.2, %v1145_v4  ;;  %vm2057_vm7 = vcmp.ge.f32.partialorder %v1401_v5, 0.0  ;;  %v2185_v9 = vmul.f32 0.2, %v1401_v5 }
 0x121   : > { %v2248_v11 = vsel %vm1992_vm2, %v1142_v59, %v2120_v62  ;;  %v3486_v12 = vpack.c.bf16 %v2251_v7, %v2250_v2  ;;  %v2315_v13 = vsel %vm2059_vm5, %v3992_v1, %v2187_v6  ;;  %v2312_v14 = vsel %vm2056_vm4, %v1398_v60, %v2184_v63 }
 0x122   : > { %v3646_v15 = vpack.c.bf16 %v2315_v13, %v2314_v10  ;;  %v2249_v16 = vsel %vm1993_vm6, %v1145_v4, %v2121_v8  ;;  %v2313_v17 = vsel %vm2057_vm7, %v1401_v5, %v2185_v9  ;;  %v3931_v18 = vpop.f32.mrb[20].mxu0  ;;  %v3995_v19 = vpop.f32.mrb[20].mxu1 }
 0x123   : > { %3766 = vst [vmem:[%s4309_s8 + $0x48] sm:$0xff] %v3486_v12   ;;  %v3481_v20 = vpack.c.bf16 %v2249_v16, %v2248_v11  ;;  %v3641_v21 = vpack.c.bf16 %v2313_v17, %v2312_v14  ;;  %vm1998_vm8 = vcmp.ge.f32.partialorder %v3931_v18, 0.0  ;;  %v2126_v22 = vmul.f32 0.2, %v3931_v18  ;;  %v1158_v23 = vpop.f32.mrb[21].mxu0  ;;  %v1414_v24 = vpop.f32.mrb[21].mxu1 }
 0x124   : > { %3798 = vst [vmem:[%s4309_s8 + $0x148] sm:$0xff] %v3646_v15   ;;  %vm2062_vm9 = vcmp.ge.f32.partialorder %v3995_v19, 0.0  ;;  %v2190_v25 = vmul.f32 0.2, %v3995_v19  ;;  %v2124_v26 = vmul.f32 0.2, %v1158_v23 }
 0x125   : > { %3765 = vst [vmem:[%s4309_s8 + $0x40] sm:$0xff] %v3481_v20   ;;  %3797 = vst [vmem:[%s4309_s8 + $0x140] sm:$0xff] %v3641_v21   ;;  %v2188_v27 = vmul.f32 0.2, %v1414_v24  ;;  %v3932_v28 = vpop.f32.mrb[22].mxu0  ;;  %v3996_v29 = vpop.f32.mrb[22].mxu1  ;;  %v2254_v30 = vsel %vm1998_vm8, %v3931_v18, %v2126_v22 }
 0x126   : > { %vm1996_vm10 = vcmp.ge.f32.partialorder %v1158_v23, 0.0  ;;  %vm1999_vm11 = vcmp.ge.f32.partialorder %v3932_v28, 0.0  ;;  %v2127_v31 = vmul.f32 0.2, %v3932_v28  ;;  %v1161_v32 = vpop.f32.mrb[23].mxu0  ;;  %v1417_v33 = vpop.f32.mrb[23].mxu1  ;;  %v2318_v38 = vsel %vm2062_vm9, %v3995_v19, %v2190_v25 }
 0x127   : > { %vm2060_vm12 = vcmp.ge.f32.partialorder %v1414_v24, 0.0  ;;  %vm2063_vm13 = vcmp.ge.f32.partialorder %v3996_v29, 0.0  ;;  %v2191_v34 = vmul.f32 0.2, %v3996_v29  ;;  %vm1997_vm14 = vcmp.ge.f32.partialorder %v1161_v32, 0.0 }
 0x128   : > { %v2255_v35 = vsel %vm1999_vm11, %v3932_v28, %v2127_v31  ;;  %v2125_v36 = vmul.f32 0.2, %v1161_v32  ;;  %vm2061_vm15 = vcmp.ge.f32.partialorder %v1417_v33, 0.0  ;;  %v2189_v37 = vmul.f32 0.2, %v1417_v33 }
 0x129   : > { %v2252_v39 = vsel %vm1996_vm10, %v1158_v23, %v2124_v26  ;;  %v3496_v40 = vpack.c.bf16 %v2255_v35, %v2254_v30  ;;  %v2319_v41 = vsel %vm2063_vm13, %v3996_v29, %v2191_v34  ;;  %v2316_v42 = vsel %vm2060_vm12, %v1414_v24, %v2188_v27 }
 0x12a   : > { %v3656_v43 = vpack.c.bf16 %v2319_v41, %v2318_v38  ;;  %v2253_v44 = vsel %vm1997_vm14, %v1161_v32, %v2125_v36  ;;  %v2317_v45 = vsel %vm2061_vm15, %v1417_v33, %v2189_v37  ;;  %v3935_v46 = vpop.f32.mrb[24].mxu0  ;;  %v3999_v47 = vpop.f32.mrb[24].mxu1 }
 0x12b   : > { %3768 = vst [vmem:[%s4309_s8 + $0x58] sm:$0xff] %v3496_v40   ;;  %v3491_v48 = vpack.c.bf16 %v2253_v44, %v2252_v39  ;;  %v3651_v49 = vpack.c.bf16 %v2317_v45, %v2316_v42  ;;  %vm2002_vm0 = vcmp.ge.f32.partialorder %v3935_v46, 0.0  ;;  %v2130_v50 = vmul.f32 0.2, %v3935_v46  ;;  %v1174_v51 = vpop.f32.mrb[25].mxu0  ;;  %v1430_v52 = vpop.f32.mrb[25].mxu1 }
 0x12c   : > { %3800 = vst [vmem:[%s4309_s8 + $0x158] sm:$0xff] %v3656_v43   ;;  %vm2066_vm1 = vcmp.ge.f32.partialorder %v3999_v47, 0.0  ;;  %v2194_v53 = vmul.f32 0.2, %v3999_v47  ;;  %v2128_v54 = vmul.f32 0.2, %v1174_v51 }
 0x12d   : > { %3767 = vst [vmem:[%s4309_s8 + $0x50] sm:$0xff] %v3491_v48   ;;  %3799 = vst [vmem:[%s4309_s8 + $0x150] sm:$0xff] %v3651_v49   ;;  %v2192_v55 = vmul.f32 0.2, %v1430_v52  ;;  %v3936_v56 = vpop.f32.mrb[26].mxu0  ;;  %v4000_v57 = vpop.f32.mrb[26].mxu1  ;;  %v2258_v58 = vsel %vm2002_vm0, %v3935_v46, %v2130_v50 }
 0x12e   : > { %vm2000_vm2 = vcmp.ge.f32.partialorder %v1174_v51, 0.0  ;;  %vm2003_vm3 = vcmp.ge.f32.partialorder %v3936_v56, 0.0  ;;  %v2131_v59 = vmul.f32 0.2, %v3936_v56  ;;  %v1177_v60 = vpop.f32.mrb[27].mxu0  ;;  %v1433_v61 = vpop.f32.mrb[27].mxu1  ;;  %v2322_v2 = vsel %vm2066_vm1, %v3999_v47, %v2194_v53 }
 0x12f   : > { %vm2064_vm4 = vcmp.ge.f32.partialorder %v1430_v52, 0.0  ;;  %vm2067_vm5 = vcmp.ge.f32.partialorder %v4000_v57, 0.0  ;;  %v2195_v62 = vmul.f32 0.2, %v4000_v57  ;;  %vm2001_vm6 = vcmp.ge.f32.partialorder %v1177_v60, 0.0 }
 0x130   : > { %v2259_v63 = vsel %vm2003_vm3, %v3936_v56, %v2131_v59  ;;  %v2129_v0 = vmul.f32 0.2, %v1177_v60  ;;  %vm2065_vm7 = vcmp.ge.f32.partialorder %v1433_v61, 0.0  ;;  %v2193_v1 = vmul.f32 0.2, %v1433_v61 }
 0x131   : > { %v2256_v3 = vsel %vm2000_vm2, %v1174_v51, %v2128_v54  ;;  %v3506_v4 = vpack.c.bf16 %v2259_v63, %v2258_v58  ;;  %v2323_v5 = vsel %vm2067_vm5, %v4000_v57, %v2195_v62  ;;  %v2320_v6 = vsel %vm2064_vm4, %v1430_v52, %v2192_v55 }
 0x132   : > { %v3666_v7 = vpack.c.bf16 %v2323_v5, %v2322_v2  ;;  %v2257_v8 = vsel %vm2001_vm6, %v1177_v60, %v2129_v0  ;;  %v2321_v9 = vsel %vm2065_vm7, %v1433_v61, %v2193_v1  ;;  %v3939_v10 = vpop.f32.mrb[28].mxu0  ;;  %v4003_v11 = vpop.f32.mrb[28].mxu1 }
 0x133   : > { %3770 = vst [vmem:[%s4309_s8 + $0x68] sm:$0xff] %v3506_v4   ;;  %v3501_v12 = vpack.c.bf16 %v2257_v8, %v2256_v3  ;;  %v3661_v13 = vpack.c.bf16 %v2321_v9, %v2320_v6  ;;  %vm2006_vm8 = vcmp.ge.f32.partialorder %v3939_v10, 0.0  ;;  %v2134_v14 = vmul.f32 0.2, %v3939_v10  ;;  %v1190_v15 = vpop.f32.mrb[29].mxu0  ;;  %v1446_v16 = vpop.f32.mrb[29].mxu1 }
 0x134   : > { %3802 = vst [vmem:[%s4309_s8 + $0x168] sm:$0xff] %v3666_v7   ;;  %vm2070_vm9 = vcmp.ge.f32.partialorder %v4003_v11, 0.0  ;;  %v2198_v17 = vmul.f32 0.2, %v4003_v11  ;;  %v2132_v18 = vmul.f32 0.2, %v1190_v15 }
 0x135   : > { %3769 = vst [vmem:[%s4309_s8 + $0x60] sm:$0xff] %v3501_v12   ;;  %3801 = vst [vmem:[%s4309_s8 + $0x160] sm:$0xff] %v3661_v13   ;;  %v2196_v19 = vmul.f32 0.2, %v1446_v16  ;;  %v3940_v20 = vpop.f32.mrb[30].mxu0  ;;  %v4004_v21 = vpop.f32.mrb[30].mxu1  ;;  %v2262_v22 = vsel %vm2006_vm8, %v3939_v10, %v2134_v14 }
 0x136   : > { %vm2004_vm10 = vcmp.ge.f32.partialorder %v1190_v15, 0.0  ;;  %vm2007_vm11 = vcmp.ge.f32.partialorder %v3940_v20, 0.0  ;;  %v2135_v23 = vmul.f32 0.2, %v3940_v20  ;;  %v1193_v24 = vpop.f32.mrb[31].mxu0  ;;  %v1449_v25 = vpop.f32.mrb[31].mxu1  ;;  %v2326_v30 = vsel %vm2070_vm9, %v4003_v11, %v2198_v17 }
 0x137   : > { %vm2068_vm12 = vcmp.ge.f32.partialorder %v1446_v16, 0.0  ;;  %vm2071_vm13 = vcmp.ge.f32.partialorder %v4004_v21, 0.0  ;;  %v2199_v26 = vmul.f32 0.2, %v4004_v21  ;;  %vm2005_vm14 = vcmp.ge.f32.partialorder %v1193_v24, 0.0 }
 0x138   : > { %v2263_v27 = vsel %vm2007_vm11, %v3940_v20, %v2135_v23  ;;  %v2133_v28 = vmul.f32 0.2, %v1193_v24  ;;  %vm2069_vm15 = vcmp.ge.f32.partialorder %v1449_v25, 0.0  ;;  %v2197_v29 = vmul.f32 0.2, %v1449_v25 }
 0x139   : > { %v2260_v31 = vsel %vm2004_vm10, %v1190_v15, %v2132_v18  ;;  %v3516_v32 = vpack.c.bf16 %v2263_v27, %v2262_v22  ;;  %v2327_v33 = vsel %vm2071_vm13, %v4004_v21, %v2199_v26  ;;  %v2324_v34 = vsel %vm2068_vm12, %v1446_v16, %v2196_v19 }
 0x13a   : > { %v3676_v35 = vpack.c.bf16 %v2327_v33, %v2326_v30  ;;  %v2261_v36 = vsel %vm2005_vm14, %v1193_v24, %v2133_v28  ;;  %v2325_v37 = vsel %vm2069_vm15, %v1449_v25, %v2197_v29  ;;  %v3943_v38 = vpop.f32.mrb[32].mxu0  ;;  %v4007_v39 = vpop.f32.mrb[32].mxu1 }
 0x13b   : > { %3772 = vst [vmem:[%s4309_s8 + $0x78] sm:$0xff] %v3516_v32   ;;  %v3511_v40 = vpack.c.bf16 %v2261_v36, %v2260_v31  ;;  %v3671_v41 = vpack.c.bf16 %v2325_v37, %v2324_v34  ;;  %vm2010_vm0 = vcmp.ge.f32.partialorder %v3943_v38, 0.0  ;;  %v2138_v42 = vmul.f32 0.2, %v3943_v38  ;;  %v1206_v43 = vpop.f32.mrb[33].mxu0  ;;  %v1462_v44 = vpop.f32.mrb[33].mxu1 }
 0x13c   : > { %3804 = vst [vmem:[%s4309_s8 + $0x178] sm:$0xff] %v3676_v35   ;;  %vm2074_vm1 = vcmp.ge.f32.partialorder %v4007_v39, 0.0  ;;  %v2202_v45 = vmul.f32 0.2, %v4007_v39  ;;  %v2136_v46 = vmul.f32 0.2, %v1206_v43 }
 0x13d   : > { %3771 = vst [vmem:[%s4309_s8 + $0x70] sm:$0xff] %v3511_v40   ;;  %3803 = vst [vmem:[%s4309_s8 + $0x170] sm:$0xff] %v3671_v41   ;;  %v2200_v47 = vmul.f32 0.2, %v1462_v44  ;;  %v3944_v48 = vpop.f32.mrb[34].mxu0  ;;  %v4008_v49 = vpop.f32.mrb[34].mxu1  ;;  %v2266_v50 = vsel %vm2010_vm0, %v3943_v38, %v2138_v42 }
 0x13e   : > { %vm2008_vm2 = vcmp.ge.f32.partialorder %v1206_v43, 0.0  ;;  %vm2011_vm3 = vcmp.ge.f32.partialorder %v3944_v48, 0.0  ;;  %v2139_v51 = vmul.f32 0.2, %v3944_v48  ;;  %v1209_v52 = vpop.f32.mrb[35].mxu0  ;;  %v1465_v53 = vpop.f32.mrb[35].mxu1  ;;  %v2330_v58 = vsel %vm2074_vm1, %v4007_v39, %v2202_v45 }
 0x13f   : > { %vm2072_vm4 = vcmp.ge.f32.partialorder %v1462_v44, 0.0  ;;  %vm2075_vm5 = vcmp.ge.f32.partialorder %v4008_v49, 0.0  ;;  %v2203_v54 = vmul.f32 0.2, %v4008_v49  ;;  %vm2009_vm6 = vcmp.ge.f32.partialorder %v1209_v52, 0.0 }
 0x140   : > { %v2267_v55 = vsel %vm2011_vm3, %v3944_v48, %v2139_v51  ;;  %v2137_v56 = vmul.f32 0.2, %v1209_v52  ;;  %vm2073_vm7 = vcmp.ge.f32.partialorder %v1465_v53, 0.0  ;;  %v2201_v57 = vmul.f32 0.2, %v1465_v53 }
 0x141   : > { %v2264_v59 = vsel %vm2008_vm2, %v1206_v43, %v2136_v46  ;;  %v3526_v60 = vpack.c.bf16 %v2267_v55, %v2266_v50  ;;  %v2331_v61 = vsel %vm2075_vm5, %v4008_v49, %v2203_v54  ;;  %v2328_v62 = vsel %vm2072_vm4, %v1462_v44, %v2200_v47 }
 0x142   : > { %v3686_v63 = vpack.c.bf16 %v2331_v61, %v2330_v58  ;;  %v2265_v0 = vsel %vm2009_vm6, %v1209_v52, %v2137_v56  ;;  %v2329_v1 = vsel %vm2073_vm7, %v1465_v53, %v2201_v57  ;;  %v3947_v2 = vpop.f32.mrb[36].mxu0  ;;  %v4011_v3 = vpop.f32.mrb[36].mxu1 }
 0x143   : > { %3774 = vst [vmem:[%s4309_s8 + $0x88] sm:$0xff] %v3526_v60   ;;  %v3521_v4 = vpack.c.bf16 %v2265_v0, %v2264_v59  ;;  %v3681_v5 = vpack.c.bf16 %v2329_v1, %v2328_v62  ;;  %vm2014_vm8 = vcmp.ge.f32.partialorder %v3947_v2, 0.0  ;;  %v2142_v6 = vmul.f32 0.2, %v3947_v2  ;;  %v1222_v7 = vpop.f32.mrb[37].mxu0  ;;  %v1478_v8 = vpop.f32.mrb[37].mxu1 }
 0x144   : > { %3806 = vst [vmem:[%s4309_s8 + $0x188] sm:$0xff] %v3686_v63   ;;  %vm2078_vm9 = vcmp.ge.f32.partialorder %v4011_v3, 0.0  ;;  %v2206_v9 = vmul.f32 0.2, %v4011_v3  ;;  %v2140_v10 = vmul.f32 0.2, %v1222_v7 }
 0x145   : > { %3773 = vst [vmem:[%s4309_s8 + $0x80] sm:$0xff] %v3521_v4   ;;  %3805 = vst [vmem:[%s4309_s8 + $0x180] sm:$0xff] %v3681_v5   ;;  %v2204_v11 = vmul.f32 0.2, %v1478_v8  ;;  %v3948_v12 = vpop.f32.mrb[38].mxu0  ;;  %v4012_v13 = vpop.f32.mrb[38].mxu1  ;;  %v2270_v14 = vsel %vm2014_vm8, %v3947_v2, %v2142_v6 }
 0x146   : > { %vm2012_vm10 = vcmp.ge.f32.partialorder %v1222_v7, 0.0  ;;  %vm2015_vm11 = vcmp.ge.f32.partialorder %v3948_v12, 0.0  ;;  %v2143_v15 = vmul.f32 0.2, %v3948_v12  ;;  %v1225_v16 = vpop.f32.mrb[39].mxu0  ;;  %v1481_v17 = vpop.f32.mrb[39].mxu1  ;;  %v2334_v22 = vsel %vm2078_vm9, %v4011_v3, %v2206_v9 }
 0x147   : > { %vm2076_vm12 = vcmp.ge.f32.partialorder %v1478_v8, 0.0  ;;  %vm2079_vm13 = vcmp.ge.f32.partialorder %v4012_v13, 0.0  ;;  %v2207_v18 = vmul.f32 0.2, %v4012_v13  ;;  %vm2013_vm14 = vcmp.ge.f32.partialorder %v1225_v16, 0.0 }
 0x148   : > { %v2271_v19 = vsel %vm2015_vm11, %v3948_v12, %v2143_v15  ;;  %v2141_v20 = vmul.f32 0.2, %v1225_v16  ;;  %vm2077_vm15 = vcmp.ge.f32.partialorder %v1481_v17, 0.0  ;;  %v2205_v21 = vmul.f32 0.2, %v1481_v17 }
 0x149   : > { %v2268_v23 = vsel %vm2012_vm10, %v1222_v7, %v2140_v10  ;;  %v3536_v24 = vpack.c.bf16 %v2271_v19, %v2270_v14  ;;  %v2335_v25 = vsel %vm2079_vm13, %v4012_v13, %v2207_v18  ;;  %v2332_v26 = vsel %vm2076_vm12, %v1478_v8, %v2204_v11 }
 0x14a   : > { %v3696_v27 = vpack.c.bf16 %v2335_v25, %v2334_v22  ;;  %v2269_v28 = vsel %vm2013_vm14, %v1225_v16, %v2141_v20  ;;  %v2333_v29 = vsel %vm2077_vm15, %v1481_v17, %v2205_v21  ;;  %v3951_v30 = vpop.f32.mrb[40].mxu0  ;;  %v4015_v31 = vpop.f32.mrb[40].mxu1 }
 0x14b   : > { %3776 = vst [vmem:[%s4309_s8 + $0x98] sm:$0xff] %v3536_v24   ;;  %v3531_v32 = vpack.c.bf16 %v2269_v28, %v2268_v23  ;;  %v3691_v33 = vpack.c.bf16 %v2333_v29, %v2332_v26  ;;  %vm2018_vm0 = vcmp.ge.f32.partialorder %v3951_v30, 0.0  ;;  %v2146_v34 = vmul.f32 0.2, %v3951_v30  ;;  %v1238_v35 = vpop.f32.mrb[41].mxu0  ;;  %v1494_v36 = vpop.f32.mrb[41].mxu1 }
 0x14c   : > { %3808 = vst [vmem:[%s4309_s8 + $0x198] sm:$0xff] %v3696_v27   ;;  %vm2082_vm1 = vcmp.ge.f32.partialorder %v4015_v31, 0.0  ;;  %v2210_v37 = vmul.f32 0.2, %v4015_v31  ;;  %v2144_v38 = vmul.f32 0.2, %v1238_v35 }
 0x14d   : > { %3775 = vst [vmem:[%s4309_s8 + $0x90] sm:$0xff] %v3531_v32   ;;  %3807 = vst [vmem:[%s4309_s8 + $0x190] sm:$0xff] %v3691_v33   ;;  %v2208_v39 = vmul.f32 0.2, %v1494_v36  ;;  %v3952_v40 = vpop.f32.mrb[42].mxu0  ;;  %v4016_v41 = vpop.f32.mrb[42].mxu1  ;;  %v2274_v42 = vsel %vm2018_vm0, %v3951_v30, %v2146_v34 }
 0x14e   : > { %vm2016_vm2 = vcmp.ge.f32.partialorder %v1238_v35, 0.0  ;;  %vm2019_vm3 = vcmp.ge.f32.partialorder %v3952_v40, 0.0  ;;  %v2147_v43 = vmul.f32 0.2, %v3952_v40  ;;  %v1241_v44 = vpop.f32.mrb[43].mxu0  ;;  %v1497_v45 = vpop.f32.mrb[43].mxu1  ;;  %v2338_v50 = vsel %vm2082_vm1, %v4015_v31, %v2210_v37 }
 0x14f   : > { %vm2080_vm4 = vcmp.ge.f32.partialorder %v1494_v36, 0.0  ;;  %vm2083_vm5 = vcmp.ge.f32.partialorder %v4016_v41, 0.0  ;;  %v2211_v46 = vmul.f32 0.2, %v4016_v41  ;;  %vm2017_vm6 = vcmp.ge.f32.partialorder %v1241_v44, 0.0 }
 0x150   : > { %v2275_v47 = vsel %vm2019_vm3, %v3952_v40, %v2147_v43  ;;  %v2145_v48 = vmul.f32 0.2, %v1241_v44  ;;  %vm2081_vm7 = vcmp.ge.f32.partialorder %v1497_v45, 0.0  ;;  %v2209_v49 = vmul.f32 0.2, %v1497_v45 }
 0x151   : > { %v2272_v51 = vsel %vm2016_vm2, %v1238_v35, %v2144_v38  ;;  %v3546_v52 = vpack.c.bf16 %v2275_v47, %v2274_v42  ;;  %v2339_v53 = vsel %vm2083_vm5, %v4016_v41, %v2211_v46  ;;  %v2336_v54 = vsel %vm2080_vm4, %v1494_v36, %v2208_v39 }
 0x152   : > { %v3706_v55 = vpack.c.bf16 %v2339_v53, %v2338_v50  ;;  %v2273_v56 = vsel %vm2017_vm6, %v1241_v44, %v2145_v48  ;;  %v2337_v57 = vsel %vm2081_vm7, %v1497_v45, %v2209_v49  ;;  %v3955_v58 = vpop.f32.mrb[44].mxu0  ;;  %v4019_v59 = vpop.f32.mrb[44].mxu1 }
 0x153   : > { %3778 = vst [vmem:[%s4309_s8 + $0xa8] sm:$0xff] %v3546_v52   ;;  %v3541_v60 = vpack.c.bf16 %v2273_v56, %v2272_v51  ;;  %v3701_v61 = vpack.c.bf16 %v2337_v57, %v2336_v54  ;;  %vm2022_vm8 = vcmp.ge.f32.partialorder %v3955_v58, 0.0  ;;  %v2150_v62 = vmul.f32 0.2, %v3955_v58  ;;  %v1254_v63 = vpop.f32.mrb[45].mxu0  ;;  %v1510_v0 = vpop.f32.mrb[45].mxu1 }
 0x154   : > { %3810 = vst [vmem:[%s4309_s8 + $0x1a8] sm:$0xff] %v3706_v55   ;;  %vm2086_vm9 = vcmp.ge.f32.partialorder %v4019_v59, 0.0  ;;  %v2214_v1 = vmul.f32 0.2, %v4019_v59  ;;  %v2148_v2 = vmul.f32 0.2, %v1254_v63 }
 0x155   : > { %3777 = vst [vmem:[%s4309_s8 + $0xa0] sm:$0xff] %v3541_v60   ;;  %3809 = vst [vmem:[%s4309_s8 + $0x1a0] sm:$0xff] %v3701_v61   ;;  %v2212_v3 = vmul.f32 0.2, %v1510_v0  ;;  %v3956_v4 = vpop.f32.mrb[46].mxu0  ;;  %v4020_v5 = vpop.f32.mrb[46].mxu1  ;;  %v2278_v6 = vsel %vm2022_vm8, %v3955_v58, %v2150_v62 }
 0x156   : > { %vm2020_vm10 = vcmp.ge.f32.partialorder %v1254_v63, 0.0  ;;  %vm2023_vm11 = vcmp.ge.f32.partialorder %v3956_v4, 0.0  ;;  %v2151_v7 = vmul.f32 0.2, %v3956_v4  ;;  %v1257_v8 = vpop.f32.mrb[47].mxu0  ;;  %v1513_v9 = vpop.f32.mrb[47].mxu1  ;;  %v2342_v14 = vsel %vm2086_vm9, %v4019_v59, %v2214_v1 }
 0x157   : > { %vm2084_vm12 = vcmp.ge.f32.partialorder %v1510_v0, 0.0  ;;  %vm2087_vm13 = vcmp.ge.f32.partialorder %v4020_v5, 0.0  ;;  %v2215_v10 = vmul.f32 0.2, %v4020_v5  ;;  %vm2021_vm14 = vcmp.ge.f32.partialorder %v1257_v8, 0.0 }
 0x158   : > { %v2279_v11 = vsel %vm2023_vm11, %v3956_v4, %v2151_v7  ;;  %v2149_v12 = vmul.f32 0.2, %v1257_v8  ;;  %vm2085_vm15 = vcmp.ge.f32.partialorder %v1513_v9, 0.0  ;;  %v2213_v13 = vmul.f32 0.2, %v1513_v9 }
 0x159   : > { %v2276_v15 = vsel %vm2020_vm10, %v1254_v63, %v2148_v2  ;;  %v3556_v16 = vpack.c.bf16 %v2279_v11, %v2278_v6  ;;  %v2343_v17 = vsel %vm2087_vm13, %v4020_v5, %v2215_v10  ;;  %v2340_v18 = vsel %vm2084_vm12, %v1510_v0, %v2212_v3 }
 0x15a   : > { %v3716_v19 = vpack.c.bf16 %v2343_v17, %v2342_v14  ;;  %v2277_v20 = vsel %vm2021_vm14, %v1257_v8, %v2149_v12  ;;  %v2341_v21 = vsel %vm2085_vm15, %v1513_v9, %v2213_v13  ;;  %v3959_v22 = vpop.f32.mrb[48].mxu0  ;;  %v4023_v23 = vpop.f32.mrb[48].mxu1 }
 0x15b   : > { %3780 = vst [vmem:[%s4309_s8 + $0xb8] sm:$0xff] %v3556_v16   ;;  %v3551_v24 = vpack.c.bf16 %v2277_v20, %v2276_v15  ;;  %v3711_v25 = vpack.c.bf16 %v2341_v21, %v2340_v18  ;;  %vm2026_vm0 = vcmp.ge.f32.partialorder %v3959_v22, 0.0  ;;  %v2154_v26 = vmul.f32 0.2, %v3959_v22  ;;  %v1270_v27 = vpop.f32.mrb[49].mxu0  ;;  %v1526_v28 = vpop.f32.mrb[49].mxu1 }
 0x15c   : > { %3812 = vst [vmem:[%s4309_s8 + $0x1b8] sm:$0xff] %v3716_v19   ;;  %vm2090_vm1 = vcmp.ge.f32.partialorder %v4023_v23, 0.0  ;;  %v2218_v29 = vmul.f32 0.2, %v4023_v23  ;;  %v2152_v30 = vmul.f32 0.2, %v1270_v27 }
 0x15d   : > { %3779 = vst [vmem:[%s4309_s8 + $0xb0] sm:$0xff] %v3551_v24   ;;  %3811 = vst [vmem:[%s4309_s8 + $0x1b0] sm:$0xff] %v3711_v25   ;;  %v2216_v31 = vmul.f32 0.2, %v1526_v28  ;;  %v3960_v32 = vpop.f32.mrb[50].mxu0  ;;  %v4024_v33 = vpop.f32.mrb[50].mxu1  ;;  %v2282_v34 = vsel %vm2026_vm0, %v3959_v22, %v2154_v26 }
 0x15e   : > { %vm2024_vm2 = vcmp.ge.f32.partialorder %v1270_v27, 0.0  ;;  %vm2027_vm3 = vcmp.ge.f32.partialorder %v3960_v32, 0.0  ;;  %v2155_v35 = vmul.f32 0.2, %v3960_v32  ;;  %v1273_v36 = vpop.f32.mrb[51].mxu0  ;;  %v1529_v37 = vpop.f32.mrb[51].mxu1  ;;  %v2346_v42 = vsel %vm2090_vm1, %v4023_v23, %v2218_v29 }
 0x15f   : > { %vm2088_vm4 = vcmp.ge.f32.partialorder %v1526_v28, 0.0  ;;  %vm2091_vm5 = vcmp.ge.f32.partialorder %v4024_v33, 0.0  ;;  %v2219_v38 = vmul.f32 0.2, %v4024_v33  ;;  %vm2025_vm6 = vcmp.ge.f32.partialorder %v1273_v36, 0.0 }
 0x160   : > { %v2283_v39 = vsel %vm2027_vm3, %v3960_v32, %v2155_v35  ;;  %v2153_v40 = vmul.f32 0.2, %v1273_v36  ;;  %vm2089_vm7 = vcmp.ge.f32.partialorder %v1529_v37, 0.0  ;;  %v2217_v41 = vmul.f32 0.2, %v1529_v37 }
 0x161   : > { %v2280_v43 = vsel %vm2024_vm2, %v1270_v27, %v2152_v30  ;;  %v3566_v44 = vpack.c.bf16 %v2283_v39, %v2282_v34  ;;  %v2347_v45 = vsel %vm2091_vm5, %v4024_v33, %v2219_v38  ;;  %v2344_v46 = vsel %vm2088_vm4, %v1526_v28, %v2216_v31 }
 0x162   : > { %v3726_v47 = vpack.c.bf16 %v2347_v45, %v2346_v42  ;;  %v2281_v48 = vsel %vm2025_vm6, %v1273_v36, %v2153_v40  ;;  %v2345_v49 = vsel %vm2089_vm7, %v1529_v37, %v2217_v41  ;;  %v3963_v50 = vpop.f32.mrb[52].mxu0  ;;  %v4027_v51 = vpop.f32.mrb[52].mxu1 }
 0x163   : > { %3782 = vst [vmem:[%s4309_s8 + $0xc8] sm:$0xff] %v3566_v44   ;;  %v3561_v52 = vpack.c.bf16 %v2281_v48, %v2280_v43  ;;  %v3721_v53 = vpack.c.bf16 %v2345_v49, %v2344_v46  ;;  %vm2030_vm8 = vcmp.ge.f32.partialorder %v3963_v50, 0.0  ;;  %v2158_v54 = vmul.f32 0.2, %v3963_v50  ;;  %v1286_v55 = vpop.f32.mrb[53].mxu0  ;;  %v1542_v56 = vpop.f32.mrb[53].mxu1 }
 0x164   : > { %3814 = vst [vmem:[%s4309_s8 + $0x1c8] sm:$0xff] %v3726_v47   ;;  %vm2094_vm9 = vcmp.ge.f32.partialorder %v4027_v51, 0.0  ;;  %v2222_v57 = vmul.f32 0.2, %v4027_v51  ;;  %v2156_v58 = vmul.f32 0.2, %v1286_v55 }
 0x165   : > { %3781 = vst [vmem:[%s4309_s8 + $0xc0] sm:$0xff] %v3561_v52   ;;  %3813 = vst [vmem:[%s4309_s8 + $0x1c0] sm:$0xff] %v3721_v53   ;;  %v2220_v59 = vmul.f32 0.2, %v1542_v56  ;;  %v3964_v60 = vpop.f32.mrb[54].mxu0  ;;  %v4028_v61 = vpop.f32.mrb[54].mxu1  ;;  %v2286_v62 = vsel %vm2030_vm8, %v3963_v50, %v2158_v54 }
 0x166   : > { %vm2028_vm10 = vcmp.ge.f32.partialorder %v1286_v55, 0.0  ;;  %vm2031_vm11 = vcmp.ge.f32.partialorder %v3964_v60, 0.0  ;;  %v2159_v63 = vmul.f32 0.2, %v3964_v60  ;;  %v1289_v0 = vpop.f32.mrb[55].mxu0  ;;  %v1545_v1 = vpop.f32.mrb[55].mxu1  ;;  %v2350_v6 = vsel %vm2094_vm9, %v4027_v51, %v2222_v57 }
 0x167   : > { %vm2092_vm12 = vcmp.ge.f32.partialorder %v1542_v56, 0.0  ;;  %vm2095_vm13 = vcmp.ge.f32.partialorder %v4028_v61, 0.0  ;;  %v2223_v2 = vmul.f32 0.2, %v4028_v61  ;;  %vm2029_vm14 = vcmp.ge.f32.partialorder %v1289_v0, 0.0 }
 0x168   : > { %v2287_v3 = vsel %vm2031_vm11, %v3964_v60, %v2159_v63  ;;  %v2157_v4 = vmul.f32 0.2, %v1289_v0  ;;  %vm2093_vm15 = vcmp.ge.f32.partialorder %v1545_v1, 0.0  ;;  %v2221_v5 = vmul.f32 0.2, %v1545_v1 }
 0x169   : > { %v2284_v7 = vsel %vm2028_vm10, %v1286_v55, %v2156_v58  ;;  %v3576_v8 = vpack.c.bf16 %v2287_v3, %v2286_v62  ;;  %v2351_v9 = vsel %vm2095_vm13, %v4028_v61, %v2223_v2  ;;  %v2348_v10 = vsel %vm2092_vm12, %v1542_v56, %v2220_v59 }
 0x16a   : > { %v3736_v11 = vpack.c.bf16 %v2351_v9, %v2350_v6  ;;  %v2285_v12 = vsel %vm2029_vm14, %v1289_v0, %v2157_v4  ;;  %v2349_v13 = vsel %vm2093_vm15, %v1545_v1, %v2221_v5  ;;  %v3967_v14 = vpop.f32.mrb[56].mxu0  ;;  %v4031_v15 = vpop.f32.mrb[56].mxu1 }
 0x16b   : > { %3784 = vst [vmem:[%s4309_s8 + $0xd8] sm:$0xff] %v3576_v8   ;;  %v3571_v16 = vpack.c.bf16 %v2285_v12, %v2284_v7  ;;  %v3731_v17 = vpack.c.bf16 %v2349_v13, %v2348_v10  ;;  %vm2034_vm0 = vcmp.ge.f32.partialorder %v3967_v14, 0.0  ;;  %v2162_v18 = vmul.f32 0.2, %v3967_v14  ;;  %v1302_v19 = vpop.f32.mrb[57].mxu0  ;;  %v1558_v20 = vpop.f32.mrb[57].mxu1 }
 0x16c   : > { %3816 = vst [vmem:[%s4309_s8 + $0x1d8] sm:$0xff] %v3736_v11   ;;  %vm2098_vm1 = vcmp.ge.f32.partialorder %v4031_v15, 0.0  ;;  %v2226_v21 = vmul.f32 0.2, %v4031_v15  ;;  %v2160_v22 = vmul.f32 0.2, %v1302_v19 }
 0x16d   : > { %3783 = vst [vmem:[%s4309_s8 + $0xd0] sm:$0xff] %v3571_v16   ;;  %3815 = vst [vmem:[%s4309_s8 + $0x1d0] sm:$0xff] %v3731_v17   ;;  %v2224_v23 = vmul.f32 0.2, %v1558_v20  ;;  %v3968_v24 = vpop.f32.mrb[58].mxu0  ;;  %v4032_v25 = vpop.f32.mrb[58].mxu1  ;;  %v2290_v26 = vsel %vm2034_vm0, %v3967_v14, %v2162_v18 }
 0x16e   : > { %vm2032_vm2 = vcmp.ge.f32.partialorder %v1302_v19, 0.0  ;;  %vm2035_vm3 = vcmp.ge.f32.partialorder %v3968_v24, 0.0  ;;  %v2163_v27 = vmul.f32 0.2, %v3968_v24  ;;  %v1305_v28 = vpop.f32.mrb[59].mxu0  ;;  %v1561_v29 = vpop.f32.mrb[59].mxu1  ;;  %v2354_v34 = vsel %vm2098_vm1, %v4031_v15, %v2226_v21 }
 0x16f   : > { %vm2096_vm4 = vcmp.ge.f32.partialorder %v1558_v20, 0.0  ;;  %vm2099_vm5 = vcmp.ge.f32.partialorder %v4032_v25, 0.0  ;;  %v2227_v30 = vmul.f32 0.2, %v4032_v25  ;;  %vm2033_vm6 = vcmp.ge.f32.partialorder %v1305_v28, 0.0 }
 0x170   : > { %v2291_v31 = vsel %vm2035_vm3, %v3968_v24, %v2163_v27  ;;  %v2161_v32 = vmul.f32 0.2, %v1305_v28  ;;  %vm2097_vm7 = vcmp.ge.f32.partialorder %v1561_v29, 0.0  ;;  %v2225_v33 = vmul.f32 0.2, %v1561_v29 }
 0x171   : > { %v2288_v35 = vsel %vm2032_vm2, %v1302_v19, %v2160_v22  ;;  %v3586_v36 = vpack.c.bf16 %v2291_v31, %v2290_v26  ;;  %v2355_v37 = vsel %vm2099_vm5, %v4032_v25, %v2227_v30  ;;  %v2352_v38 = vsel %vm2096_vm4, %v1558_v20, %v2224_v23 }
 0x172   : > { %v3746_v39 = vpack.c.bf16 %v2355_v37, %v2354_v34  ;;  %v2289_v40 = vsel %vm2033_vm6, %v1305_v28, %v2161_v32  ;;  %v2353_v41 = vsel %vm2097_vm7, %v1561_v29, %v2225_v33  ;;  %v3971_v42 = vpop.f32.mrb[60].mxu0  ;;  %v4035_v43 = vpop.f32.mrb[60].mxu1 }
 0x173   : > { %3786 = vst [vmem:[%s4309_s8 + $0xe8] sm:$0xff] %v3586_v36   ;;  %v3581_v44 = vpack.c.bf16 %v2289_v40, %v2288_v35  ;;  %v3741_v45 = vpack.c.bf16 %v2353_v41, %v2352_v38  ;;  %vm2038_vm8 = vcmp.ge.f32.partialorder %v3971_v42, 0.0  ;;  %v2166_v46 = vmul.f32 0.2, %v3971_v42  ;;  %v1318_v47 = vpop.f32.mrb[61].mxu0  ;;  %v1574_v48 = vpop.f32.mrb[61].mxu1 }
 0x174   : > { %3818 = vst [vmem:[%s4309_s8 + $0x1e8] sm:$0xff] %v3746_v39   ;;  %vm2102_vm9 = vcmp.ge.f32.partialorder %v4035_v43, 0.0  ;;  %v2230_v49 = vmul.f32 0.2, %v4035_v43  ;;  %v2164_v50 = vmul.f32 0.2, %v1318_v47 }
 0x175   : > { %3785 = vst [vmem:[%s4309_s8 + $0xe0] sm:$0xff] %v3581_v44   ;;  %3817 = vst [vmem:[%s4309_s8 + $0x1e0] sm:$0xff] %v3741_v45   ;;  %v2228_v51 = vmul.f32 0.2, %v1574_v48  ;;  %v3972_v52 = vpop.f32.mrb[62].mxu0  ;;  %v4036_v53 = vpop.f32.mrb[62].mxu1  ;;  %v2294_v54 = vsel %vm2038_vm8, %v3971_v42, %v2166_v46 }
 0x176   : > { %vm2036_vm10 = vcmp.ge.f32.partialorder %v1318_v47, 0.0  ;;  %vm2039_vm11 = vcmp.ge.f32.partialorder %v3972_v52, 0.0  ;;  %v2167_v55 = vmul.f32 0.2, %v3972_v52  ;;  %v1321_v56 = vpop.f32.mrb[63].mxu0  ;;  %v1577_v57 = vpop.f32.mrb[63].mxu1  ;;  %v2358_v62 = vsel %vm2102_vm9, %v4035_v43, %v2230_v49 }
 0x177   : > { %vm2100_vm12 = vcmp.ge.f32.partialorder %v1574_v48, 0.0  ;;  %vm2103_vm13 = vcmp.ge.f32.partialorder %v4036_v53, 0.0  ;;  %v2231_v58 = vmul.f32 0.2, %v4036_v53  ;;  %vm2037_vm14 = vcmp.ge.f32.partialorder %v1321_v56, 0.0 }
 0x178   : > { %v2295_v59 = vsel %vm2039_vm11, %v3972_v52, %v2167_v55  ;;  %v2165_v60 = vmul.f32 0.2, %v1321_v56  ;;  %vm2101_vm15 = vcmp.ge.f32.partialorder %v1577_v57, 0.0  ;;  %v2229_v61 = vmul.f32 0.2, %v1577_v57 }
 0x179   : > { %v2292_v63 = vsel %vm2036_vm10, %v1318_v47, %v2164_v50  ;;  %v3596_v0 = vpack.c.bf16 %v2295_v59, %v2294_v54  ;;  %v2359_v1 = vsel %vm2103_vm13, %v4036_v53, %v2231_v58  ;;  %v2356_v2 = vsel %vm2100_vm12, %v1574_v48, %v2228_v51 }
 0x17a   : > { %v3756_v3 = vpack.c.bf16 %v2359_v1, %v2358_v62  ;;  %v2293_v4 = vsel %vm2037_vm14, %v1321_v56, %v2165_v60  ;;  %v2357_v5 = vsel %vm2101_vm15, %v1577_v57, %v2229_v61 }
 0x17b   : > { %3788 = vst [vmem:[%s4309_s8 + $0xf8] sm:$0xff] %v3596_v0   ;;  %v3591_v6 = vpack.c.bf16 %v2293_v4, %v2292_v63  ;;  %v3751_v7 = vpack.c.bf16 %v2357_v5, %v2356_v2 }
 0x17c   : > { %3820 = vst [vmem:[%s4309_s8 + $0x1f8] sm:$0xff] %v3756_v3  }
 0x17d   : > { %3787 = vst [vmem:[%s4309_s8 + $0xf0] sm:$0xff] %v3591_v6   ;;  %3819 = vst [vmem:[%s4309_s8 + $0x1f0] sm:$0xff] %v3751_v7  }
 0x17e PF: > { %s12_s11 = sadd.s32 1, %s4171_s11   ;;  %s4402_s9 = smov %s4167_s10 }
 0x17f   : > { %p9_p5 = scmp.ge.s32.totalorder %s12_s11, 4   ;;  %s4403_s10 = smov %s4405_s12 }
 0x181   :  { %11 = sbr.rel (!%p9_p5) target bundleno = 2 (0x2), region = 70 }

// kernel: dnet_forward.6
= control target key start
LH: loop header
LB: loop body
LE: loop exit
PB: predicated region body
PF: predicated region fallthrough
CT: control target
= control target key end

     0   :  { %s2458_s1 = inlined_call_operand.vmem [shape: bf16[128,128], index: 1, kind: input, shape index: {}]   ;;  %s2459_s0 = inlined_call_operand.vmem [shape: bf16[512,128], index: 0, kind: input, shape index: {}]   ;;  %s2460_s2 = inlined_call_operand.vmem [shape: bf16[512,128], index: 2, kind: output, shape index: {0}]   ;;  %s2461_s3 = inlined_call_operand.vmem [shape: f32[1,8,128], index: 3, kind: output, shape index: {1}]  }
   0x1   :  { %v1984_v0 = vld [vmem:[%s2458_s1] sm:$0xff]   ;;  %v1985_v1 = vld [vmem:[%s2458_s1 + $0x8] sm:$0xff]   ;;  %v1986_v2 = vld [vmem:[%s2458_s1 + $0x10] sm:$0xff]  }
   0x2   :  { %1888 = vmatprep.subr.bf16.mxu0 %v1984_v0  ;;  %1968 = vmatprep.subr.bf16.mxu1 %v1984_v0  ;;  %v1987_v3 = vld [vmem:[%s2458_s1 + $0x18] sm:$0xff]   ;;  %v1992_v4 = vld [vmem:[%s2459_s0] sm:$0xff]   ;;  %v1989_v6 = vld [vmem:[%s2458_s1 + $0x28] sm:$0xff]  }
   0x3   :  { %1889 = vmatpush3.bf16.msra.mxu0 %v1984_v0  ;;  %1976 = vmatpush3.bf16.msra.mxu1 %v1984_v0  ;;  %v1988_v5 = vld [vmem:[%s2458_s1 + $0x20] sm:$0xff]   ;;  %v1990_v7 = vld [vmem:[%s2458_s1 + $0x30] sm:$0xff]   ;;  %v1991_v8 = vld [vmem:[%s2458_s1 + $0x38] sm:$0xff]  }
   0x4   :  { %1890 = vmatprep.subr.bf16.mxu0 %v1985_v1  ;;  %1969 = vmatprep.subr.bf16.mxu1 %v1985_v1  ;;  %v2008_v9 = vld [vmem:[%s2459_s0 + $0x80] sm:$0xff]   ;;  %v1993_v10 = vld [vmem:[%s2459_s0 + $0x8] sm:$0xff]   ;;  %v1994_v11 = vld [vmem:[%s2459_s0 + $0x10] sm:$0xff]  }
   0x5   :  { %1904 = vmatprep.mubr.bf16.mxu0 %v1992_v4  ;;  %1936 = vmatprep.mubr.bf16.mxu1 %v2008_v9  ;;  %v2009_v12 = vld [vmem:[%s2459_s0 + $0x88] sm:$0xff]   ;;  %v2010_v13 = vld [vmem:[%s2459_s0 + $0x90] sm:$0xff]   ;;  %v1995_v14 = vld [vmem:[%s2459_s0 + $0x18] sm:$0xff]  }
   0x6   :  { %v1996_v15 = vld [vmem:[%s2459_s0 + $0x20] sm:$0xff]   ;;  %v2011_v16 = vld [vmem:[%s2459_s0 + $0x98] sm:$0xff]   ;;  %v1997_v18 = vld [vmem:[%s2459_s0 + $0x28] sm:$0xff]  }
   0x7   :  { %1891 = vmatpush3.bf16.msra.mxu0 %v1985_v1  ;;  %1977 = vmatpush3.bf16.msra.mxu1 %v1985_v1  ;;  %v2012_v17 = vld [vmem:[%s2459_s0 + $0xa0] sm:$0xff]   ;;  %v2013_v19 = vld [vmem:[%s2459_s0 + $0xa8] sm:$0xff]   ;;  %v1998_v20 = vld [vmem:[%s2459_s0 + $0x30] sm:$0xff]  }
   0x8   :  { %1892 = vmatprep.subr.bf16.mxu0 %v1986_v2  ;;  %1970 = vmatprep.subr.bf16.mxu1 %v1986_v2  ;;  %v2014_v21 = vld [vmem:[%s2459_s0 + $0xb0] sm:$0xff]   ;;  %v1999_v22 = vld [vmem:[%s2459_s0 + $0x38] sm:$0xff]   ;;  %v2000_v24 = vld [vmem:[%s2459_s0 + $0x40] sm:$0xff]  }
   0x9   :  { %v2015_v23 = vld [vmem:[%s2459_s0 + $0xb8] sm:$0xff]   ;;  %v2016_v25 = vld [vmem:[%s2459_s0 + $0xc0] sm:$0xff]   ;;  %v2001_v26 = vld [vmem:[%s2459_s0 + $0x48] sm:$0xff]  }
   0xa   :  { %v2017_v27 = vld [vmem:[%s2459_s0 + $0xc8] sm:$0xff]   ;;  %v2002_v28 = vld [vmem:[%s2459_s0 + $0x50] sm:$0xff]   ;;  %v2003_v30 = vld [vmem:[%s2459_s0 + $0x58] sm:$0xff]  }
   0xb   :  { %1893 = vmatpush3.bf16.msra.mxu0 %v1986_v2  ;;  %1978 = vmatpush3.bf16.msra.mxu1 %v1986_v2  ;;  %v2018_v29 = vld [vmem:[%s2459_s0 + $0xd0] sm:$0xff]   ;;  %v2019_v31 = vld [vmem:[%s2459_s0 + $0xd8] sm:$0xff]   ;;  %v2004_v32 = vld [vmem:[%s2459_s0 + $0x60] sm:$0xff]  }
   0xc   :  { %1894 = vmatprep.subr.bf16.mxu0 %v1987_v3  ;;  %1971 = vmatprep.subr.bf16.mxu1 %v1987_v3  ;;  %v2020_v33 = vld [vmem:[%s2459_s0 + $0xe0] sm:$0xff]   ;;  %v2005_v34 = vld [vmem:[%s2459_s0 + $0x68] sm:$0xff]   ;;  %v2006_v36 = vld [vmem:[%s2459_s0 + $0x70] sm:$0xff]  }
   0xd   :  { %v2021_v35 = vld [vmem:[%s2459_s0 + $0xe8] sm:$0xff]   ;;  %v2022_v37 = vld [vmem:[%s2459_s0 + $0xf0] sm:$0xff]   ;;  %v2007_v38 = vld [vmem:[%s2459_s0 + $0x78] sm:$0xff]  }
   0xe   :  { %v2023_v39 = vld [vmem:[%s2459_s0 + $0xf8] sm:$0xff]  }
   0xf   :  { %1895 = vmatpush3.bf16.msra.mxu0 %v1987_v3  ;;  %1979 = vmatpush3.bf16.msra.mxu1 %v1987_v3 }
  0x10   :  { %1896 = vmatprep.subr.bf16.mxu0 %v1988_v5  ;;  %1972 = vmatprep.subr.bf16.mxu1 %v1988_v5 }
  0x13   :  { %1897 = vmatpush3.bf16.msra.mxu0 %v1988_v5  ;;  %1980 = vmatpush3.bf16.msra.mxu1 %v1988_v5 }
  0x14   :  { %1898 = vmatprep.subr.bf16.mxu0 %v1989_v6  ;;  %1973 = vmatprep.subr.bf16.mxu1 %v1989_v6 }
  0x17   :  { %1899 = vmatpush3.bf16.msra.mxu0 %v1989_v6  ;;  %1981 = vmatpush3.bf16.msra.mxu1 %v1989_v6 }
  0x18   :  { %1900 = vmatprep.subr.bf16.mxu0 %v1990_v7  ;;  %1974 = vmatprep.subr.bf16.mxu1 %v1990_v7 }
  0x1b   :  { %1901 = vmatpush3.bf16.msra.mxu0 %v1990_v7  ;;  %1982 = vmatpush3.bf16.msra.mxu1 %v1990_v7 }
  0x1c   :  { %1902 = vmatprep.subr.bf16.mxu0 %v1991_v8  ;;  %1975 = vmatprep.subr.bf16.mxu1 %v1991_v8 }
  0x1f   :  { %1903 = vmatpush3.bf16.msra.mxu0 %v1991_v8  ;;  %1983 = vmatpush3.bf16.msra.mxu1 %v1991_v8 }
  0x22   :  { %1905 = vmatmul.mubr.bf16.vlgmr.msra.gmra.mrb[0].mxu0 %v1993_v10  ;;  %1937 = vmatmul.mubr.bf16.vlgmr.msra.gmra.mrb[0].mxu1 %v2009_v12 }
  0x23   :  { %1908 = vmatprep.mubr.bf16.mxu0 %v1994_v11  ;;  %1940 = vmatprep.mubr.bf16.mxu1 %v2010_v13 }
  0x2a   :  { %1909 = vmatmul.mubr.bf16.gmra.mrb[4].mxu0 %v1995_v14  ;;  %1941 = vmatmul.mubr.bf16.gmra.mrb[4].mxu1 %v2011_v16 }
  0x2b   :  { %1912 = vmatprep.mubr.bf16.mxu0 %v1996_v15  ;;  %1944 = vmatprep.mubr.bf16.mxu1 %v2012_v17 }
  0x32   :  { %1913 = vmatmul.mubr.bf16.gmra.mrb[8].mxu0 %v1997_v18  ;;  %1945 = vmatmul.mubr.bf16.gmra.mrb[8].mxu1 %v2013_v19 }
  0x33   :  { %1916 = vmatprep.mubr.bf16.mxu0 %v1998_v20  ;;  %1948 = vmatprep.mubr.bf16.mxu1 %v2014_v21 }
  0x3a   :  { %1917 = vmatmul.mubr.bf16.gmra.mrb[12].mxu0 %v1999_v22  ;;  %1949 = vmatmul.mubr.bf16.gmra.mrb[12].mxu1 %v2015_v23 }
  0x3b   :  { %1920 = vmatprep.mubr.bf16.mxu0 %v2000_v24  ;;  %1952 = vmatprep.mubr.bf16.mxu1 %v2016_v25 }
  0x42   :  { %1921 = vmatmul.mubr.bf16.gmra.mrb[16].mxu0 %v2001_v26  ;;  %1953 = vmatmul.mubr.bf16.gmra.mrb[16].mxu1 %v2017_v27 }
  0x43   :  { %1924 = vmatprep.mubr.bf16.mxu0 %v2002_v28  ;;  %1956 = vmatprep.mubr.bf16.mxu1 %v2018_v29 }
  0x4a   :  { %1925 = vmatmul.mubr.bf16.gmra.mrb[20].mxu0 %v2003_v30  ;;  %1957 = vmatmul.mubr.bf16.gmra.mrb[20].mxu1 %v2019_v31 }
  0x4b   :  { %1928 = vmatprep.mubr.bf16.mxu0 %v2004_v32  ;;  %1960 = vmatprep.mubr.bf16.mxu1 %v2020_v33 }
  0x52   :  { %1929 = vmatmul.mubr.bf16.gmra.mrb[24].mxu0 %v2005_v34  ;;  %1961 = vmatmul.mubr.bf16.gmra.mrb[24].mxu1 %v2021_v35 }
  0x53   :  { %1932 = vmatprep.mubr.bf16.mxu0 %v2006_v36  ;;  %1964 = vmatprep.mubr.bf16.mxu1 %v2022_v37 }
  0x5a   :  { %1933 = vmatmul.mubr.bf16.gmra.mrb[28].mxu0 %v2007_v38  ;;  %1965 = vmatmul.mubr.bf16.gmra.mrb[28].mxu1 %v2023_v39 }
  0xf5   :  { %v1906_v40 = vpop.f32.mrb[0].mxu0  ;;  %v2164_v41 = vpop.f32.mrb[0].mxu1 }
  0xf6   :  { %v505_v42 = vpop.f32.mrb[1].mxu0  ;;  %v2166_v43 = vpop.f32.mrb[1].mxu1  ;;  %v1026_v55 = vmul.f32 %v1906_v40, %v1906_v40 }
  0xf7   :  { %v1907_v44 = vpop.f32.mrb[2].mxu0  ;;  %v2168_v45 = vpop.f32.mrb[2].mxu1  ;;  %v1024_v50 = vmul.f32 %v505_v42, %v505_v42 }
  0xf8   :  { %v1665_v46 = vpack.c.bf16 %v1907_v44, %v1906_v40  ;;  %v508_v47 = vpop.f32.mrb[3].mxu0  ;;  %v1745_v48 = vpack.c.bf16 %v2168_v45, %v2164_v41  ;;  %v2172_v49 = vpop.f32.mrb[3].mxu1  ;;  %v1027_v58 = vmul.f32 %v1907_v44, %v1907_v44 }
  0xf9   :  { %v955_v51 = vadd.f32 %v508_v47, %v505_v42  ;;  %v1025_v52 = vmul.f32 %v508_v47, %v508_v47  ;;  %v1660_v53 = vpack.c.bf16 %v508_v47, %v505_v42  ;;  %v1740_v54 = vpack.c.bf16 %v2172_v49, %v2166_v43 }
  0xfa   :  { %1817 = vst [vmem:[%s2460_s2 + $0x8] sm:$0xff] %v1665_v46   ;;  %1833 = vst [vmem:[%s2460_s2 + $0x88] sm:$0xff] %v1745_v48  }
  0xfb   :  { %v956_v56 = vadd.f32 %v1906_v40, %v955_v51  ;;  %v1088_v57 = vadd.f32 %v1025_v52, %v1024_v50  ;;  %1661 = vst [vmem:[%s2460_s2] sm:$0xff] %v1660_v53   ;;  %1832 = vst [vmem:[%s2460_s2 + $0x80] sm:$0xff] %v1740_v54  }
  0xfd   :  { %v1089_v59 = vadd.f32 %v1088_v57, %v1026_v55  ;;  %v1910_v60 = vpop.f32.mrb[4].mxu0  ;;  %v957_v61 = vadd.f32 %v1907_v44, %v956_v56  ;;  %v2188_v62 = vpop.f32.mrb[4].mxu1 }
  0xfe   :  { %v521_v63 = vpop.f32.mrb[5].mxu0  ;;  %v2190_v0 = vpop.f32.mrb[5].mxu1  ;;  %v1030_v15 = vmul.f32 %v1910_v60, %v1910_v60 }
  0xff   :  { %v958_v1 = vadd.f32 %v957_v61, %v521_v63  ;;  %v1028_v2 = vmul.f32 %v521_v63, %v521_v63  ;;  %v1090_v3 = vadd.f32 %v1089_v59, %v1027_v58  ;;  %v1911_v4 = vpop.f32.mrb[6].mxu0  ;;  %v2192_v5 = vpop.f32.mrb[6].mxu1 }
 0x100   :  { %v1675_v6 = vpack.c.bf16 %v1911_v4, %v1910_v60  ;;  %v524_v7 = vpop.f32.mrb[7].mxu0  ;;  %v1755_v8 = vpack.c.bf16 %v2192_v5, %v2188_v62  ;;  %v2196_v9 = vpop.f32.mrb[7].mxu1  ;;  %v1031_v18 = vmul.f32 %v1911_v4, %v1911_v4 }
 0x101   :  { %v1091_v10 = vadd.f32 %v1090_v3, %v1028_v2  ;;  %v959_v11 = vadd.f32 %v958_v1, %v524_v7  ;;  %v1029_v12 = vmul.f32 %v524_v7, %v524_v7  ;;  %v1670_v13 = vpack.c.bf16 %v524_v7, %v521_v63 }
 0x102   :  { %1819 = vst [vmem:[%s2460_s2 + $0x18] sm:$0xff] %v1675_v6   ;;  %1835 = vst [vmem:[%s2460_s2 + $0x98] sm:$0xff] %v1755_v8   ;;  %v1750_v14 = vpack.c.bf16 %v2196_v9, %v2190_v0 }
 0x103   :  { %v960_v16 = vadd.f32 %v1910_v60, %v959_v11  ;;  %v1092_v17 = vadd.f32 %v1091_v10, %v1029_v12  ;;  %1818 = vst [vmem:[%s2460_s2 + $0x10] sm:$0xff] %v1670_v13  }
 0x104   :  { %1834 = vst [vmem:[%s2460_s2 + $0x90] sm:$0xff] %v1750_v14  }
 0x105   :  { %v1093_v19 = vadd.f32 %v1092_v17, %v1030_v15  ;;  %v1914_v20 = vpop.f32.mrb[8].mxu0  ;;  %v961_v21 = vadd.f32 %v1911_v4, %v960_v16  ;;  %v2212_v22 = vpop.f32.mrb[8].mxu1 }
 0x106   :  { %v537_v23 = vpop.f32.mrb[9].mxu0  ;;  %v2214_v24 = vpop.f32.mrb[9].mxu1  ;;  %v1034_v39 = vmul.f32 %v1914_v20, %v1914_v20 }
 0x107   :  { %v962_v25 = vadd.f32 %v961_v21, %v537_v23  ;;  %v1032_v26 = vmul.f32 %v537_v23, %v537_v23  ;;  %v1094_v27 = vadd.f32 %v1093_v19, %v1031_v18  ;;  %v1915_v28 = vpop.f32.mrb[10].mxu0  ;;  %v2216_v29 = vpop.f32.mrb[10].mxu1 }
 0x108   :  { %v1685_v30 = vpack.c.bf16 %v1915_v28, %v1914_v20  ;;  %v540_v31 = vpop.f32.mrb[11].mxu0  ;;  %v1765_v32 = vpack.c.bf16 %v2216_v29, %v2212_v22  ;;  %v2220_v33 = vpop.f32.mrb[11].mxu1  ;;  %v1035_v44 = vmul.f32 %v1915_v28, %v1915_v28 }
 0x109   :  { %v1095_v34 = vadd.f32 %v1094_v27, %v1032_v26  ;;  %v963_v35 = vadd.f32 %v962_v25, %v540_v31  ;;  %v1033_v36 = vmul.f32 %v540_v31, %v540_v31  ;;  %v1680_v37 = vpack.c.bf16 %v540_v31, %v537_v23 }
 0x10a   :  { %1821 = vst [vmem:[%s2460_s2 + $0x28] sm:$0xff] %v1685_v30   ;;  %1837 = vst [vmem:[%s2460_s2 + $0xa8] sm:$0xff] %v1765_v32   ;;  %v1760_v38 = vpack.c.bf16 %v2220_v33, %v2214_v24 }
 0x10b   :  { %v964_v40 = vadd.f32 %v1914_v20, %v963_v35  ;;  %v1096_v42 = vadd.f32 %v1095_v34, %v1033_v36  ;;  %1820 = vst [vmem:[%s2460_s2 + $0x20] sm:$0xff] %v1680_v37  }
 0x10c   :  { %1836 = vst [vmem:[%s2460_s2 + $0xa0] sm:$0xff] %v1760_v38  }
 0x10d   :  { %v1097_v46 = vadd.f32 %v1096_v42, %v1034_v39  ;;  %v1918_v47 = vpop.f32.mrb[12].mxu0  ;;  %v965_v48 = vadd.f32 %v1915_v28, %v964_v40  ;;  %v2236_v50 = vpop.f32.mrb[12].mxu1 }
 0x10e   :  { %v553_v51 = vpop.f32.mrb[13].mxu0  ;;  %v2238_v52 = vpop.f32.mrb[13].mxu1  ;;  %v1038_v6 = vmul.f32 %v1918_v47, %v1918_v47 }
 0x10f   :  { %v966_v53 = vadd.f32 %v965_v48, %v553_v51  ;;  %v1036_v54 = vmul.f32 %v553_v51, %v553_v51  ;;  %v1098_v55 = vadd.f32 %v1097_v46, %v1035_v44  ;;  %v1919_v56 = vpop.f32.mrb[14].mxu0  ;;  %v2240_v57 = vpop.f32.mrb[14].mxu1 }
 0x110   :  { %v1695_v58 = vpack.c.bf16 %v1919_v56, %v1918_v47  ;;  %v556_v59 = vpop.f32.mrb[15].mxu0  ;;  %v1775_v60 = vpack.c.bf16 %v2240_v57, %v2236_v50  ;;  %v2244_v61 = vpop.f32.mrb[15].mxu1  ;;  %v1039_v10 = vmul.f32 %v1919_v56, %v1919_v56 }
 0x111   :  { %v1099_v63 = vadd.f32 %v1098_v55, %v1036_v54  ;;  %v967_v1 = vadd.f32 %v966_v53, %v556_v59  ;;  %v1037_v2 = vmul.f32 %v556_v59, %v556_v59  ;;  %v1690_v3 = vpack.c.bf16 %v556_v59, %v553_v51 }
 0x112   :  { %1823 = vst [vmem:[%s2460_s2 + $0x38] sm:$0xff] %v1695_v58   ;;  %1839 = vst [vmem:[%s2460_s2 + $0xb8] sm:$0xff] %v1775_v60   ;;  %v1770_v4 = vpack.c.bf16 %v2244_v61, %v2238_v52 }
 0x113   :  { %v968_v7 = vadd.f32 %v1918_v47, %v967_v1  ;;  %v1100_v8 = vadd.f32 %v1099_v63, %v1037_v2  ;;  %1822 = vst [vmem:[%s2460_s2 + $0x30] sm:$0xff] %v1690_v3  }
 0x114   :  { %1838 = vst [vmem:[%s2460_s2 + $0xb0] sm:$0xff] %v1770_v4  }
 0x115   :  { %v1101_v11 = vadd.f32 %v1100_v8, %v1038_v6  ;;  %v1922_v12 = vpop.f32.mrb[16].mxu0  ;;  %v969_v13 = vadd.f32 %v1919_v56, %v968_v7  ;;  %v2260_v14 = vpop.f32.mrb[16].mxu1 }
 0x116   :  { %v569_v15 = vpop.f32.mrb[17].mxu0  ;;  %v2262_v16 = vpop.f32.mrb[17].mxu1  ;;  %v1042_v35 = vmul.f32 %v1922_v12, %v1922_v12 }
 0x117   :  { %v970_v17 = vadd.f32 %v969_v13, %v569_v15  ;;  %v1040_v18 = vmul.f32 %v569_v15, %v569_v15  ;;  %v1102_v19 = vadd.f32 %v1101_v11, %v1039_v10  ;;  %v1923_v20 = vpop.f32.mrb[18].mxu0  ;;  %v2264_v21 = vpop.f32.mrb[18].mxu1 }
 0x118   :  { %v1705_v23 = vpack.c.bf16 %v1923_v20, %v1922_v12  ;;  %v572_v25 = vpop.f32.mrb[19].mxu0  ;;  %v1785_v26 = vpack.c.bf16 %v2264_v21, %v2260_v14  ;;  %v2268_v27 = vpop.f32.mrb[19].mxu1  ;;  %v1043_v38 = vmul.f32 %v1923_v20, %v1923_v20 }
 0x119   :  { %v1103_v28 = vadd.f32 %v1102_v19, %v1040_v18  ;;  %v971_v30 = vadd.f32 %v970_v17, %v572_v25  ;;  %v1041_v31 = vmul.f32 %v572_v25, %v572_v25  ;;  %v1700_v32 = vpack.c.bf16 %v572_v25, %v569_v15 }
 0x11a   :  { %1825 = vst [vmem:[%s2460_s2 + $0x48] sm:$0xff] %v1705_v23   ;;  %1841 = vst [vmem:[%s2460_s2 + $0xc8] sm:$0xff] %v1785_v26   ;;  %v1780_v34 = vpack.c.bf16 %v2268_v27, %v2262_v16 }
 0x11b   :  { %v972_v36 = vadd.f32 %v1922_v12, %v971_v30  ;;  %v1104_v37 = vadd.f32 %v1103_v28, %v1041_v31  ;;  %1824 = vst [vmem:[%s2460_s2 + $0x40] sm:$0xff] %v1700_v32  }
 0x11c   :  { %1840 = vst [vmem:[%s2460_s2 + $0xc0] sm:$0xff] %v1780_v34  }
 0x11d   :  { %v1105_v39 = vadd.f32 %v1104_v37, %v1042_v35  ;;  %v1926_v40 = vpop.f32.mrb[20].mxu0  ;;  %v973_v42 = vadd.f32 %v1923_v20, %v972_v36  ;;  %v2284_v44 = vpop.f32.mrb[20].mxu1 }
 0x11e   :  { %v585_v46 = vpop.f32.mrb[21].mxu0  ;;  %v2286_v47 = vpop.f32.mrb[21].mxu1  ;;  %v1046_v6 = vmul.f32 %v1926_v40, %v1926_v40 }
 0x11f   :  { %v974_v48 = vadd.f32 %v973_v42, %v585_v46  ;;  %v1044_v51 = vmul.f32 %v585_v46, %v585_v46  ;;  %v1106_v53 = vadd.f32 %v1105_v39, %v1043_v38  ;;  %v1927_v54 = vpop.f32.mrb[22].mxu0  ;;  %v2288_v55 = vpop.f32.mrb[22].mxu1 }
 0x120   :  { %v1715_v56 = vpack.c.bf16 %v1927_v54, %v1926_v40  ;;  %v588_v58 = vpop.f32.mrb[23].mxu0  ;;  %v1795_v59 = vpack.c.bf16 %v2288_v55, %v2284_v44  ;;  %v2292_v60 = vpop.f32.mrb[23].mxu1  ;;  %v1047_v10 = vmul.f32 %v1927_v54, %v1927_v54 }
 0x121   :  { %v1107_v63 = vadd.f32 %v1106_v53, %v1044_v51  ;;  %v975_v1 = vadd.f32 %v974_v48, %v588_v58  ;;  %v1045_v2 = vmul.f32 %v588_v58, %v588_v58  ;;  %v1710_v3 = vpack.c.bf16 %v588_v58, %v585_v46 }
 0x122   :  { %1827 = vst [vmem:[%s2460_s2 + $0x58] sm:$0xff] %v1715_v56   ;;  %1843 = vst [vmem:[%s2460_s2 + $0xd8] sm:$0xff] %v1795_v59   ;;  %v1790_v4 = vpack.c.bf16 %v2292_v60, %v2286_v47 }
 0x123   :  { %v976_v7 = vadd.f32 %v1926_v40, %v975_v1  ;;  %v1108_v8 = vadd.f32 %v1107_v63, %v1045_v2  ;;  %1826 = vst [vmem:[%s2460_s2 + $0x50] sm:$0xff] %v1710_v3  }
 0x124   :  { %1842 = vst [vmem:[%s2460_s2 + $0xd0] sm:$0xff] %v1790_v4  }
 0x125   :  { %v1109_v11 = vadd.f32 %v1108_v8, %v1046_v6  ;;  %v1930_v12 = vpop.f32.mrb[24].mxu0  ;;  %v977_v13 = vadd.f32 %v1927_v54, %v976_v7  ;;  %v2308_v15 = vpop.f32.mrb[24].mxu1 }
 0x126   :  { %v601_v17 = vpop.f32.mrb[25].mxu0  ;;  %v2310_v18 = vpop.f32.mrb[25].mxu1  ;;  %v1050_v39 = vmul.f32 %v1930_v12, %v1930_v12 }
 0x127   :  { %v978_v19 = vadd.f32 %v977_v13, %v601_v17  ;;  %v1048_v20 = vmul.f32 %v601_v17, %v601_v17  ;;  %v1110_v23 = vadd.f32 %v1109_v11, %v1047_v10  ;;  %v1931_v25 = vpop.f32.mrb[26].mxu0  ;;  %v2312_v26 = vpop.f32.mrb[26].mxu1 }
 0x128   :  { %v1725_v28 = vpack.c.bf16 %v1931_v25, %v1930_v12  ;;  %v604_v30 = vpop.f32.mrb[27].mxu0  ;;  %v1805_v31 = vpack.c.bf16 %v2312_v26, %v2308_v15  ;;  %v2316_v32 = vpop.f32.mrb[27].mxu1  ;;  %v1051_v46 = vmul.f32 %v1931_v25, %v1931_v25 }
 0x129   :  { %v1111_v34 = vadd.f32 %v1110_v23, %v1048_v20  ;;  %v979_v35 = vadd.f32 %v978_v19, %v604_v30  ;;  %v1049_v36 = vmul.f32 %v604_v30, %v604_v30  ;;  %v1720_v37 = vpack.c.bf16 %v604_v30, %v601_v17 }
 0x12a   :  { %1829 = vst [vmem:[%s2460_s2 + $0x68] sm:$0xff] %v1725_v28   ;;  %1845 = vst [vmem:[%s2460_s2 + $0xe8] sm:$0xff] %v1805_v31   ;;  %v1800_v38 = vpack.c.bf16 %v2316_v32, %v2310_v18  ;;  %v1056_v31 = vmul.f32 %v2166_v43, %v2166_v43 }
 0x12b   :  { %v980_v40 = vadd.f32 %v1930_v12, %v979_v35  ;;  %v1112_v42 = vadd.f32 %v1111_v34, %v1049_v36  ;;  %1828 = vst [vmem:[%s2460_s2 + $0x60] sm:$0xff] %v1720_v37  }
 0x12c   :  { %1844 = vst [vmem:[%s2460_s2 + $0xe0] sm:$0xff] %v1800_v38   ;;  %v1057_v38 = vmul.f32 %v2172_v49, %v2172_v49 }
 0x12d   :  { %v1113_v48 = vadd.f32 %v1112_v42, %v1050_v39  ;;  %v1934_v51 = vpop.f32.mrb[28].mxu0  ;;  %v981_v53 = vadd.f32 %v1931_v25, %v980_v40  ;;  %v2332_v54 = vpop.f32.mrb[28].mxu1  ;;  %v1058_v39 = vmul.f32 %v2164_v41, %v2164_v41 }
 0x12e   :  { %v617_v56 = vpop.f32.mrb[29].mxu0  ;;  %v2334_v58 = vpop.f32.mrb[29].mxu1  ;;  %v1054_v19 = vmul.f32 %v1934_v51, %v1934_v51 }
 0x12f   :  { %v982_v59 = vadd.f32 %v981_v53, %v617_v56  ;;  %v1052_v63 = vmul.f32 %v617_v56, %v617_v56  ;;  %v1114_v1 = vadd.f32 %v1113_v48, %v1051_v46  ;;  %v1935_v2 = vpop.f32.mrb[30].mxu0  ;;  %v2336_v3 = vpop.f32.mrb[30].mxu1  ;;  %v1059_v46 = vmul.f32 %v2168_v45, %v2168_v45 }
 0x130   :  { %v1735_v4 = vpack.c.bf16 %v1935_v2, %v1934_v51  ;;  %v620_v6 = vpop.f32.mrb[31].mxu0  ;;  %v1815_v7 = vpack.c.bf16 %v2336_v3, %v2332_v54  ;;  %v2340_v8 = vpop.f32.mrb[31].mxu1  ;;  %v1055_v25 = vmul.f32 %v1935_v2, %v1935_v2 }
 0x131   :  { %v1115_v10 = vadd.f32 %v1114_v1, %v1052_v63  ;;  %v983_v11 = vadd.f32 %v982_v59, %v620_v6  ;;  %v1053_v12 = vmul.f32 %v620_v6, %v620_v6  ;;  %v1730_v13 = vpack.c.bf16 %v620_v6, %v617_v56 }
 0x132   :  { %1831 = vst [vmem:[%s2460_s2 + $0x78] sm:$0xff] %v1735_v4   ;;  %1847 = vst [vmem:[%s2460_s2 + $0xf8] sm:$0xff] %v1815_v7   ;;  %v1810_v17 = vpack.c.bf16 %v2340_v8, %v2334_v58  ;;  %v1061_v63 = vmul.f32 %v2196_v9, %v2196_v9 }
 0x133   :  { %v984_v20 = vadd.f32 %v1934_v51, %v983_v11  ;;  %v1116_v23 = vadd.f32 %v1115_v10, %v1053_v12  ;;  %1830 = vst [vmem:[%s2460_s2 + $0x70] sm:$0xff] %v1730_v13   ;;  %v1065_v12 = vmul.f32 %v2220_v33, %v2220_v33 }
 0x134   :  { %1846 = vst [vmem:[%s2460_s2 + $0xf0] sm:$0xff] %v1810_v17  }
 0x135   :  { %v1117_v28 = vadd.f32 %v1116_v23, %v1054_v19  ;;  %v985_v30 = vadd.f32 %v1935_v2, %v984_v20 }
 0x137   :  { %v986_v34 = vadd.f32 %v985_v30, %v2166_v43  ;;  %v1118_v35 = vadd.f32 %v1117_v28, %v1055_v25  ;;  %v1060_v43 = vmul.f32 %v2190_v0, %v2190_v0  ;;  %v1069_v30 = vmul.f32 %v2244_v61, %v2244_v61 }
 0x139   :  { %v1119_v36 = vadd.f32 %v1118_v35, %v1056_v31  ;;  %v987_v37 = vadd.f32 %v986_v34, %v2172_v49 }
 0x13b   :  { %v988_v40 = vadd.f32 %v2164_v41, %v987_v37  ;;  %v1120_v42 = vadd.f32 %v1119_v36, %v1057_v38  ;;  %v1062_v41 = vmul.f32 %v2188_v62, %v2188_v62 }
 0x13d   :  { %v1121_v48 = vadd.f32 %v1120_v42, %v1058_v39  ;;  %v989_v51 = vadd.f32 %v2168_v45, %v988_v40  ;;  %v1063_v45 = vmul.f32 %v2192_v5, %v2192_v5  ;;  %v1073_v40 = vmul.f32 %v2268_v27, %v2268_v27 }
 0x13f   :  { %v990_v53 = vadd.f32 %v989_v51, %v2190_v0  ;;  %v1122_v56 = vadd.f32 %v1121_v48, %v1059_v46  ;;  %v1064_v0 = vmul.f32 %v2214_v24, %v2214_v24 }
 0x141   :  { %v1123_v59 = vadd.f32 %v1122_v56, %v1060_v43  ;;  %v991_v49 = vadd.f32 %v990_v53, %v2196_v9 }
 0x143   :  { %v992_v1 = vadd.f32 %v2188_v62, %v991_v49  ;;  %v1124_v2 = vadd.f32 %v1123_v59, %v1061_v63  ;;  %v1066_v62 = vmul.f32 %v2212_v22, %v2212_v22  ;;  %v1077_v59 = vmul.f32 %v2292_v60, %v2292_v60 }
 0x145   :  { %v1125_v4 = vadd.f32 %v1124_v2, %v1062_v41  ;;  %v993_v6 = vadd.f32 %v2192_v5, %v992_v1  ;;  %v1067_v5 = vmul.f32 %v2216_v29, %v2216_v29 }
 0x147   :  { %v994_v7 = vadd.f32 %v993_v6, %v2214_v24  ;;  %v1126_v10 = vadd.f32 %v1125_v4, %v1063_v45  ;;  %v1068_v24 = vmul.f32 %v2238_v52, %v2238_v52  ;;  %v1081_v6 = vmul.f32 %v2316_v32, %v2316_v32 }
 0x149   :  { %v1127_v11 = vadd.f32 %v1126_v10, %v1064_v0  ;;  %v995_v9 = vadd.f32 %v994_v7, %v2220_v33 }
 0x14b   :  { %v996_v13 = vadd.f32 %v2212_v22, %v995_v9  ;;  %v1128_v17 = vadd.f32 %v1127_v11, %v1065_v12  ;;  %v1070_v22 = vmul.f32 %v2236_v50, %v2236_v50 }
 0x14d   :  { %v1129_v19 = vadd.f32 %v1128_v17, %v1066_v62  ;;  %v997_v20 = vadd.f32 %v2216_v29, %v996_v13  ;;  %v1071_v29 = vmul.f32 %v2240_v57, %v2240_v57  ;;  %v1085_v13 = vmul.f32 %v2340_v8, %v2340_v8 }
 0x14f   :  { %v998_v23 = vadd.f32 %v997_v20, %v2238_v52  ;;  %v1130_v25 = vadd.f32 %v1129_v19, %v1067_v5  ;;  %v1072_v52 = vmul.f32 %v2262_v16, %v2262_v16 }
 0x151   :  { %v1131_v28 = vadd.f32 %v1130_v25, %v1068_v24  ;;  %v999_v33 = vadd.f32 %v998_v23, %v2244_v61 }
 0x153   :  { %v1000_v31 = vadd.f32 %v2236_v50, %v999_v33  ;;  %v1132_v34 = vadd.f32 %v1131_v28, %v1069_v30  ;;  %v1074_v50 = vmul.f32 %v2260_v14, %v2260_v14 }
 0x155   :  { %v1133_v35 = vadd.f32 %v1132_v34, %v1070_v22  ;;  %v1001_v36 = vadd.f32 %v2240_v57, %v1000_v31  ;;  %v1075_v57 = vmul.f32 %v2264_v21, %v2264_v21 }
 0x157   :  { %v1002_v37 = vadd.f32 %v1001_v36, %v2262_v16  ;;  %v1134_v38 = vadd.f32 %v1133_v35, %v1071_v29  ;;  %v1076_v16 = vmul.f32 %v2286_v47, %v2286_v47 }
 0x159   :  { %v1135_v39 = vadd.f32 %v1134_v38, %v1072_v52  ;;  %v1003_v61 = vadd.f32 %v1002_v37, %v2268_v27 }
 0x15b   :  { %v1004_v42 = vadd.f32 %v2260_v14, %v1003_v61  ;;  %v1136_v46 = vadd.f32 %v1135_v39, %v1073_v40  ;;  %v1078_v14 = vmul.f32 %v2284_v44, %v2284_v44 }
 0x15d   :  { %v1137_v48 = vadd.f32 %v1136_v46, %v1074_v50  ;;  %v1005_v51 = vadd.f32 %v2264_v21, %v1004_v42  ;;  %v1079_v21 = vmul.f32 %v2288_v55, %v2288_v55 }
 0x15f   :  { %v1006_v43 = vadd.f32 %v1005_v51, %v2286_v47  ;;  %v1138_v53 = vadd.f32 %v1137_v48, %v1075_v57  ;;  %v1080_v47 = vmul.f32 %v2310_v18, %v2310_v18 }
 0x161   :  { %v1139_v56 = vadd.f32 %v1138_v53, %v1076_v16  ;;  %v1007_v27 = vadd.f32 %v1006_v43, %v2292_v60 }
 0x163   :  { %v1008_v49 = vadd.f32 %v2284_v44, %v1007_v27  ;;  %v1140_v63 = vadd.f32 %v1139_v56, %v1077_v59  ;;  %v1082_v44 = vmul.f32 %v2308_v15, %v2308_v15 }
 0x165   :  { %v1141_v41 = vadd.f32 %v1140_v63, %v1078_v14  ;;  %v1009_v1 = vadd.f32 %v2288_v55, %v1008_v49  ;;  %v1083_v55 = vmul.f32 %v2312_v26, %v2312_v26 }
 0x167   :  { %v1010_v2 = vadd.f32 %v1009_v1, %v2310_v18  ;;  %v1142_v45 = vadd.f32 %v1141_v41, %v1079_v21  ;;  %v1084_v18 = vmul.f32 %v2334_v58, %v2334_v58 }
 0x169   :  { %v1143_v4 = vadd.f32 %v1142_v45, %v1080_v47  ;;  %v1011_v60 = vadd.f32 %v1010_v2, %v2316_v32 }
 0x16b   :  { %v1012_v0 = vadd.f32 %v2308_v15, %v1011_v60  ;;  %v1144_v7 = vadd.f32 %v1143_v4, %v1081_v6  ;;  %v1086_v15 = vmul.f32 %v2332_v54, %v2332_v54 }
 0x16d   :  { %v1145_v10 = vadd.f32 %v1144_v7, %v1082_v44  ;;  %v1013_v11 = vadd.f32 %v2312_v26, %v1012_v0  ;;  %v1087_v26 = vmul.f32 %v2336_v3, %v2336_v3 }
 0x16f   :  { %v1014_v9 = vadd.f32 %v1013_v11, %v2334_v58  ;;  %v1146_v12 = vadd.f32 %v1145_v10, %v1083_v55 }
 0x171   :  { %v1147_v62 = vadd.f32 %v1146_v12, %v1084_v18  ;;  %v1015_v32 = vadd.f32 %v1014_v9, %v2340_v8 }
 0x173   :  { %v1016_v17 = vadd.f32 %v2332_v54, %v1015_v32  ;;  %v1148_v5 = vadd.f32 %v1147_v62, %v1085_v13 }
 0x175   :  { %v1017_v19 = vadd.f32 %v2336_v3, %v1016_v17  ;;  %v1149_v20 = vadd.f32 %v1148_v5, %v1086_v15 }
 0x177   :  { %v1018_v58 = vrot.slane %v1017_v19, 4  ;;  %v1150_v24 = vadd.f32 %v1149_v20, %v1087_v26 }
 0x179   :  { %v1019_v23 = vadd.f32 %v1018_v58, %v1017_v19  ;;  %v1151_v25 = vrot.slane %v1150_v24, 4 }
 0x17b   :  { %v1020_v28 = vrot.slane %v1019_v23, 2  ;;  %v1152_v33 = vadd.f32 %v1151_v25, %v1150_v24 }
 0x17d   :  { %v1021_v30 = vadd.f32 %v1020_v28, %v1019_v23  ;;  %v1153_v8 = vrot.slane %v1152_v33, 2 }
 0x17f   :  { %v1022_v22 = vrot.slane %v1021_v30, 1  ;;  %v1154_v31 = vadd.f32 %v1153_v8, %v1152_v33 }
 0x181   :  { %v1023_v34 = vadd.f32 %v1022_v22, %v1021_v30  ;;  %v1155_v29 = vrot.slane %v1154_v31, 1 }
 0x183   :  { %v1156_v54 = vadd.f32 %v1155_v29, %v1154_v31  ;;  %1157 = vst [vmem:[%s2461_s3] sm:$0x1] %v1023_v34 }
 0x185   :  { %1158 = vst [vmem:[%s2461_s3 + $0x1] sm:$0x1] %v1156_v54 }

// kernel: dnet_forward.7
= control target key start
LH: loop header
LB: loop body
LE: loop exit
PB: predicated region body
PF: predicated region fallthrough
CT: control target
= control target key end

     0   :  { %s972_s1 = inlined_call_operand.vmem [shape: bf16[256,128], index: 1, kind: input, shape index: {}]   ;;  %s973_s0 = inlined_call_operand.vmem [shape: bf16[128,256], index: 0, kind: input, shape index: {}]   ;;  %s974_s2 = inlined_call_operand.vmem [shape: bf16[128,128], index: 2, kind: output, shape index: {0}]   ;;  %s975_s3 = inlined_call_operand.vmem [shape: f32[1,8,128], index: 3, kind: output, shape index: {1}]  }
   0x1   :  { %v768_v0 = vld [vmem:[%s972_s1 + $0x40] sm:$0xff]   ;;  %v770_v2 = vld [vmem:[%s972_s1 + $0x48] sm:$0xff]   ;;  %v772_v4 = vld [vmem:[%s972_s1 + $0x50] sm:$0xff]  }
   0x2   :  { %v769_v1 = vld [vmem:[%s972_s1] sm:$0xff]   ;;  %688 = vmatprep.subr.bf16.mxu0 %v768_v0  ;;  %752 = vmatprep.subr.bf16.mxu1 %v768_v0  ;;  %v771_v3 = vld [vmem:[%s972_s1 + $0x8] sm:$0xff]   ;;  %v773_v5 = vld [vmem:[%s972_s1 + $0x10] sm:$0xff]  }
   0x3   :  { %689 = vmatpush3.bf16.msra.mxu0 %v769_v1  ;;  %760 = vmatpush3.bf16.msra.mxu1 %v769_v1  ;;  %v774_v6 = vld [vmem:[%s972_s1 + $0x58] sm:$0xff]   ;;  %v776_v8 = vld [vmem:[%s972_s1 + $0x60] sm:$0xff]   ;;  %v778_v10 = vld [vmem:[%s972_s1 + $0x68] sm:$0xff]  }
   0x4   :  { %690 = vmatprep.subr.bf16.mxu0 %v770_v2  ;;  %753 = vmatprep.subr.bf16.mxu1 %v770_v2  ;;  %v775_v7 = vld [vmem:[%s972_s1 + $0x18] sm:$0xff]   ;;  %v777_v9 = vld [vmem:[%s972_s1 + $0x20] sm:$0xff]   ;;  %v779_v12 = vld [vmem:[%s972_s1 + $0x28] sm:$0xff]  }
   0x5   :  { %v786_v11 = vld [vmem:[%s973_s0 + $0x4] ss:$8 sps:$4 sm:$0xff]   ;;  %v780_v14 = vld [vmem:[%s972_s1 + $0x70] sm:$0xff]   ;;  %v782_v16 = vld [vmem:[%s972_s1 + $0x78] sm:$0xff]  }
   0x6   :  { %v792_v13 = vld [vmem:[%s973_s0 + $0x44] ss:$8 sps:$4 sm:$0xff]   ;;  %311 = vmatprep.mubr.bf16.mxu0 %v786_v11  ;;  %v781_v15 = vld [vmem:[%s972_s1 + $0x30] sm:$0xff]   ;;  %v783_v17 = vld [vmem:[%s972_s1 + $0x38] sm:$0xff]  }
   0x7   :  { %691 = vmatpush3.bf16.msra.mxu0 %v771_v3  ;;  %761 = vmatpush3.bf16.msra.mxu1 %v771_v3  ;;  %v784_v18 = vld [vmem:[%s973_s0] ss:$8 sps:$4 sm:$0xff]   ;;  %v787_v20 = vld [vmem:[%s973_s0 + $0x14] ss:$8 sps:$4 sm:$0xff]   ;;  %v789_v22 = vld [vmem:[%s973_s0 + $0x10] ss:$8 sps:$4 sm:$0xff]  }
   0x8   :  { %692 = vmatprep.subr.bf16.mxu0 %v772_v4  ;;  %754 = vmatprep.subr.bf16.mxu1 %v772_v4  ;;  %v790_v19 = vld [vmem:[%s973_s0 + $0x40] ss:$8 sps:$4 sm:$0xff]   ;;  %v796_v21 = vld [vmem:[%s973_s0 + $0x54] ss:$8 sps:$4 sm:$0xff]   ;;  %v798_v23 = vld [vmem:[%s973_s0 + $0x50] ss:$8 sps:$4 sm:$0xff]  }
   0x9   :  { %343 = vmatprep.mubr.bf16.mxu1 %v792_v13  ;;  %v793_v24 = vld [vmem:[%s973_s0 + $0x24] ss:$8 sps:$4 sm:$0xff]   ;;  %v795_v26 = vld [vmem:[%s973_s0 + $0x20] ss:$8 sps:$4 sm:$0xff]   ;;  %v799_v28 = vld [vmem:[%s973_s0 + $0x34] ss:$8 sps:$4 sm:$0xff]  }
   0xa   :  { %v802_v25 = vld [vmem:[%s973_s0 + $0x64] ss:$8 sps:$4 sm:$0xff]   ;;  %v804_v27 = vld [vmem:[%s973_s0 + $0x60] ss:$8 sps:$4 sm:$0xff]   ;;  %v805_v29 = vld [vmem:[%s973_s0 + $0x74] ss:$8 sps:$4 sm:$0xff]  }
   0xb   :  { %693 = vmatpush3.bf16.msra.mxu0 %v773_v5  ;;  %762 = vmatpush3.bf16.msra.mxu1 %v773_v5  ;;  %v801_v30 = vld [vmem:[%s973_s0 + $0x30] ss:$8 sps:$4 sm:$0xff]  }
   0xc   :  { %694 = vmatprep.subr.bf16.mxu0 %v774_v6  ;;  %755 = vmatprep.subr.bf16.mxu1 %v774_v6  ;;  %v807_v31 = vld [vmem:[%s973_s0 + $0x70] ss:$8 sps:$4 sm:$0xff]  }
   0xf   :  { %695 = vmatpush3.bf16.msra.mxu0 %v775_v7  ;;  %763 = vmatpush3.bf16.msra.mxu1 %v775_v7 }
  0x10   :  { %696 = vmatprep.subr.bf16.mxu0 %v776_v8  ;;  %756 = vmatprep.subr.bf16.mxu1 %v776_v8 }
  0x13   :  { %697 = vmatpush3.bf16.msra.mxu0 %v777_v9  ;;  %764 = vmatpush3.bf16.msra.mxu1 %v777_v9 }
  0x14   :  { %698 = vmatprep.subr.bf16.mxu0 %v778_v10  ;;  %757 = vmatprep.subr.bf16.mxu1 %v778_v10 }
  0x17   :  { %699 = vmatpush3.bf16.msra.mxu0 %v779_v12  ;;  %765 = vmatpush3.bf16.msra.mxu1 %v779_v12 }
  0x18   :  { %700 = vmatprep.subr.bf16.mxu0 %v780_v14  ;;  %758 = vmatprep.subr.bf16.mxu1 %v780_v14 }
  0x1b   :  { %701 = vmatpush3.bf16.msra.mxu0 %v781_v15  ;;  %766 = vmatpush3.bf16.msra.mxu1 %v781_v15 }
  0x1c   :  { %702 = vmatprep.subr.bf16.mxu0 %v782_v16  ;;  %759 = vmatprep.subr.bf16.mxu1 %v782_v16 }
  0x1f   :  { %703 = vmatpush3.bf16.msra.mxu0 %v783_v17  ;;  %767 = vmatpush3.bf16.msra.mxu1 %v783_v17 }
  0x22   :  { %312 = vmatmul.mubr.bf16.vlgmr.msra.gmra.mrb[0].mxu0 %v784_v18  ;;  %344 = vmatmul.mubr.bf16.vlgmr.msra.gmra.mrb[0].mxu1 %v790_v19 }
  0x23   :  { %319 = vmatprep.mubr.bf16.mxu0 %v787_v20  ;;  %351 = vmatprep.mubr.bf16.mxu1 %v796_v21 }
  0x2a   :  { %320 = vmatmul.mubr.bf16.gmra.mrb[4].mxu0 %v789_v22  ;;  %352 = vmatmul.mubr.bf16.gmra.mrb[4].mxu1 %v798_v23 }
  0x2b   :  { %327 = vmatprep.mubr.bf16.mxu0 %v793_v24  ;;  %359 = vmatprep.mubr.bf16.mxu1 %v802_v25 }
  0x32   :  { %328 = vmatmul.mubr.bf16.gmra.mrb[8].mxu0 %v795_v26  ;;  %360 = vmatmul.mubr.bf16.gmra.mrb[8].mxu1 %v804_v27 }
  0x33   :  { %335 = vmatprep.mubr.bf16.mxu0 %v799_v28  ;;  %367 = vmatprep.mubr.bf16.mxu1 %v805_v29 }
  0x3a   :  { %336 = vmatmul.mubr.bf16.gmra.mrb[12].mxu0 %v801_v30  ;;  %368 = vmatmul.mubr.bf16.gmra.mrb[12].mxu1 %v807_v31 }
  0xf5   :  { %v704_v32 = vpop.f32.mrb[0].mxu0  ;;  %v728_v33 = vpop.f32.mrb[0].mxu1 }
  0xf6   :  { %v705_v34 = vpop.f32.mrb[1].mxu0  ;;  %v729_v35 = vpop.f32.mrb[1].mxu1 }
  0xf7   :  { %v706_v36 = vadd.f32 %v705_v34, %v704_v32  ;;  %v707_v37 = vpop.f32.mrb[2].mxu0  ;;  %v924_v38 = vadd.f32 %v729_v35, %v728_v33  ;;  %v731_v39 = vpop.f32.mrb[2].mxu1 }
  0xf8   :  { %v708_v40 = vpop.f32.mrb[3].mxu0  ;;  %v732_v41 = vpop.f32.mrb[3].mxu1 }
  0xf9   :  { %v709_v42 = vadd.f32 %v708_v40, %v707_v37  ;;  %v926_v43 = vadd.f32 %v732_v41, %v731_v39  ;;  %v448_v44 = vmul.f32 %v706_v36, %v706_v36 }
  0xfb   :  { %v427_v45 = vadd.f32 %v709_v42, %v706_v36  ;;  %v449_v46 = vmul.f32 %v709_v42, %v709_v42  ;;  %v644_v47 = vpack.c.bf16 %v709_v42, %v706_v36  ;;  %v664_v48 = vpack.c.bf16 %v926_v43, %v924_v38 }
  0xfd   :  { %v464_v49 = vadd.f32 %v449_v46, %v448_v44  ;;  %645 = vst [vmem:[%s974_s2] sm:$0xff] %v644_v47   ;;  %v710_v50 = vpop.f32.mrb[4].mxu0  ;;  %v734_v51 = vpop.f32.mrb[4].mxu1  ;;  %684 = vst [vmem:[%s974_s2 + $0x20] sm:$0xff] %v664_v48   ;;  %v456_v47 = vmul.f32 %v924_v38, %v924_v38 }
  0xfe   :  { %v711_v52 = vpop.f32.mrb[5].mxu0  ;;  %v735_v53 = vpop.f32.mrb[5].mxu1 }
  0xff   :  { %v712_v54 = vadd.f32 %v711_v52, %v710_v50  ;;  %v713_v55 = vpop.f32.mrb[6].mxu0  ;;  %v936_v56 = vadd.f32 %v735_v53, %v734_v51  ;;  %v737_v57 = vpop.f32.mrb[6].mxu1  ;;  %v457_v50 = vmul.f32 %v926_v43, %v926_v43 }
 0x100   :  { %v714_v58 = vpop.f32.mrb[7].mxu0  ;;  %v738_v59 = vpop.f32.mrb[7].mxu1 }
 0x101   :  { %v428_v60 = vadd.f32 %v712_v54, %v427_v45  ;;  %v450_v61 = vmul.f32 %v712_v54, %v712_v54  ;;  %v715_v62 = vadd.f32 %v714_v58, %v713_v55  ;;  %v739_v63 = vadd.f32 %v738_v59, %v737_v57 }
 0x102   :  { %v458_v53 = vmul.f32 %v936_v56, %v936_v56 }
 0x103   :  { %v465_v0 = vadd.f32 %v464_v49, %v450_v61  ;;  %v429_v1 = vadd.f32 %v715_v62, %v428_v60  ;;  %v451_v2 = vmul.f32 %v715_v62, %v715_v62  ;;  %v649_v3 = vpack.c.bf16 %v715_v62, %v712_v54 }
 0x104   :  { %v669_v4 = vpack.c.bf16 %v739_v63, %v936_v56  ;;  %v459_v55 = vmul.f32 %v739_v63, %v739_v63 }
 0x105   :  { %v466_v5 = vadd.f32 %v465_v0, %v451_v2  ;;  %681 = vst [vmem:[%s974_s2 + $0x8] sm:$0xff] %v649_v3   ;;  %v716_v6 = vpop.f32.mrb[8].mxu0  ;;  %v740_v7 = vpop.f32.mrb[8].mxu1 }
 0x106   :  { %v717_v8 = vpop.f32.mrb[9].mxu0  ;;  %685 = vst [vmem:[%s974_s2 + $0x28] sm:$0xff] %v669_v4   ;;  %v741_v9 = vpop.f32.mrb[9].mxu1 }
 0x107   :  { %v718_v10 = vadd.f32 %v717_v8, %v716_v6  ;;  %v719_v11 = vpop.f32.mrb[10].mxu0  ;;  %v742_v12 = vadd.f32 %v741_v9, %v740_v7  ;;  %v743_v13 = vpop.f32.mrb[10].mxu1 }
 0x108   :  { %v720_v14 = vpop.f32.mrb[11].mxu0  ;;  %v744_v15 = vpop.f32.mrb[11].mxu1 }
 0x109   :  { %v430_v16 = vadd.f32 %v718_v10, %v429_v1  ;;  %v452_v17 = vmul.f32 %v718_v10, %v718_v10  ;;  %v721_v18 = vadd.f32 %v720_v14, %v719_v11  ;;  %v745_v19 = vadd.f32 %v744_v15, %v743_v13 }
 0x10a   :  { %v460_v60 = vmul.f32 %v742_v12, %v742_v12 }
 0x10b   :  { %v467_v20 = vadd.f32 %v466_v5, %v452_v17  ;;  %v431_v21 = vadd.f32 %v721_v18, %v430_v16  ;;  %v453_v22 = vmul.f32 %v721_v18, %v721_v18  ;;  %v654_v23 = vpack.c.bf16 %v721_v18, %v718_v10 }
 0x10c   :  { %v674_v24 = vpack.c.bf16 %v745_v19, %v742_v12  ;;  %v461_v1 = vmul.f32 %v745_v19, %v745_v19 }
 0x10d   :  { %v468_v25 = vadd.f32 %v467_v20, %v453_v22  ;;  %682 = vst [vmem:[%s974_s2 + $0x10] sm:$0xff] %v654_v23   ;;  %v722_v26 = vpop.f32.mrb[12].mxu0  ;;  %v746_v27 = vpop.f32.mrb[12].mxu1 }
 0x10e   :  { %v723_v28 = vpop.f32.mrb[13].mxu0  ;;  %686 = vst [vmem:[%s974_s2 + $0x30] sm:$0xff] %v674_v24   ;;  %v747_v29 = vpop.f32.mrb[13].mxu1 }
 0x10f   :  { %v724_v30 = vadd.f32 %v723_v28, %v722_v26  ;;  %v725_v31 = vpop.f32.mrb[14].mxu0  ;;  %v748_v32 = vadd.f32 %v747_v29, %v746_v27  ;;  %v749_v33 = vpop.f32.mrb[14].mxu1 }
 0x110   :  { %v726_v34 = vpop.f32.mrb[15].mxu0  ;;  %v750_v35 = vpop.f32.mrb[15].mxu1 }
 0x111   :  { %v432_v36 = vadd.f32 %v724_v30, %v431_v21  ;;  %v454_v37 = vmul.f32 %v724_v30, %v724_v30  ;;  %v727_v39 = vadd.f32 %v726_v34, %v725_v31  ;;  %v751_v40 = vadd.f32 %v750_v35, %v749_v33 }
 0x112   :  { %v462_v2 = vmul.f32 %v748_v32, %v748_v32 }
 0x113   :  { %v469_v41 = vadd.f32 %v468_v25, %v454_v37  ;;  %v433_v42 = vadd.f32 %v727_v39, %v432_v36  ;;  %v455_v44 = vmul.f32 %v727_v39, %v727_v39  ;;  %v659_v45 = vpack.c.bf16 %v727_v39, %v724_v30 }
 0x114   :  { %v679_v46 = vpack.c.bf16 %v751_v40, %v748_v32  ;;  %v463_v6 = vmul.f32 %v751_v40, %v751_v40 }
 0x115   :  { %v434_v48 = vadd.f32 %v924_v38, %v433_v42  ;;  %v470_v49 = vadd.f32 %v469_v41, %v455_v44  ;;  %683 = vst [vmem:[%s974_s2 + $0x18] sm:$0xff] %v659_v45  }
 0x116   :  { %687 = vst [vmem:[%s974_s2 + $0x38] sm:$0xff] %v679_v46  }
 0x117   :  { %v435_v51 = vadd.f32 %v926_v43, %v434_v48  ;;  %v471_v52 = vadd.f32 %v470_v49, %v456_v47 }
 0x119   :  { %v472_v54 = vadd.f32 %v471_v52, %v457_v50  ;;  %v436_v38 = vadd.f32 %v936_v56, %v435_v51 }
 0x11b   :  { %v437_v57 = vadd.f32 %v739_v63, %v436_v38  ;;  %v473_v58 = vadd.f32 %v472_v54, %v458_v53 }
 0x11d   :  { %v438_v59 = vadd.f32 %v742_v12, %v437_v57  ;;  %v474_v61 = vadd.f32 %v473_v58, %v459_v55 }
 0x11f   :  { %v475_v62 = vadd.f32 %v474_v61, %v460_v60  ;;  %v439_v0 = vadd.f32 %v745_v19, %v438_v59 }
 0x121   :  { %v476_v3 = vadd.f32 %v475_v62, %v461_v1  ;;  %v440_v4 = vadd.f32 %v748_v32, %v439_v0 }
 0x123   :  { %v477_v43 = vadd.f32 %v476_v3, %v462_v2  ;;  %v441_v5 = vadd.f32 %v751_v40, %v440_v4 }
 0x125   :  { %v442_v7 = vrot.slane %v441_v5, 4  ;;  %v478_v8 = vadd.f32 %v477_v43, %v463_v6 }
 0x127   :  { %v443_v9 = vadd.f32 %v442_v7, %v441_v5  ;;  %v479_v10 = vrot.slane %v478_v8, 4 }
 0x129   :  { %v444_v56 = vrot.slane %v443_v9, 2  ;;  %v480_v11 = vadd.f32 %v479_v10, %v478_v8 }
 0x12b   :  { %v445_v63 = vadd.f32 %v444_v56, %v443_v9  ;;  %v481_v13 = vrot.slane %v480_v11, 2 }
 0x12d   :  { %v446_v14 = vrot.slane %v445_v63, 1  ;;  %v482_v12 = vadd.f32 %v481_v13, %v480_v11 }
 0x12f   :  { %v447_v15 = vadd.f32 %v446_v14, %v445_v63  ;;  %v483_v16 = vrot.slane %v482_v12, 1 }
 0x131   :  { %v484_v17 = vadd.f32 %v483_v16, %v482_v12  ;;  %485 = vst [vmem:[%s975_s3] sm:$0x1] %v447_v15 }
 0x133   :  { %486 = vst [vmem:[%s975_s3 + $0x1] sm:$0x1] %v484_v17 }

// kernel: dnet_forward.8
= control target key start
LH: loop header
LB: loop body
LE: loop exit
PB: predicated region body
PF: predicated region fallthrough
CT: control target
= control target key end

     0   :  { %s813_s1 = inlined_call_operand.vmem [shape: bf16[512,128], index: 1, kind: input, shape index: {}]   ;;  %s814_s0 = inlined_call_operand.vmem [shape: bf16[32,512], index: 0, kind: input, shape index: {}]   ;;  %s815_s2 = inlined_call_operand.vmem [shape: bf16[32,128], index: 2, kind: output, shape index: {0}]   ;;  %s816_s3 = inlined_call_operand.vmem [shape: f32[1,8,128], index: 3, kind: output, shape index: {1}]  }
   0x1   :  { %v617_v0 = vld [vmem:[%s813_s1 + $0x40] sm:$0xff]   ;;  %v621_v4 = vld [vmem:[%s813_s1 + $0x48] sm:$0xff]   ;;  %v625_v8 = vld [vmem:[%s813_s1 + $0x50] sm:$0xff]  }
   0x2   :  { %v618_v1 = vld [vmem:[%s813_s1 + $0xc0] sm:$0xff]   ;;  %561 = vmatprep.subr.bf16.mxu0 %v617_v0  ;;  %v622_v5 = vld [vmem:[%s813_s1 + $0xc8] sm:$0xff]   ;;  %v626_v9 = vld [vmem:[%s813_s1 + $0xd0] sm:$0xff]  }
   0x3   :  { %v619_v2 = vld [vmem:[%s813_s1] sm:$0xff]   ;;  %589 = vmatprep.subr.bf16.mxu1 %v618_v1  ;;  %v623_v6 = vld [vmem:[%s813_s1 + $0x8] sm:$0xff]   ;;  %v627_v10 = vld [vmem:[%s813_s1 + $0x10] sm:$0xff]  }
   0x4   :  { %v620_v3 = vld [vmem:[%s813_s1 + $0x80] sm:$0xff]   ;;  %562 = vmatpush3.bf16.msra.mxu0 %v619_v2  ;;  %v624_v7 = vld [vmem:[%s813_s1 + $0x88] sm:$0xff]   ;;  %v628_v11 = vld [vmem:[%s813_s1 + $0x90] sm:$0xff]  }
   0x5   :  { %590 = vmatpush3.bf16.msra.mxu1 %v620_v3  ;;  %563 = vmatprep.subr.bf16.mxu0 %v621_v4  ;;  %v629_v12 = vld [vmem:[%s813_s1 + $0x58] sm:$0xff]   ;;  %v633_v16 = vld [vmem:[%s813_s1 + $0x60] sm:$0xff]   ;;  %v637_v20 = vld [vmem:[%s813_s1 + $0x68] sm:$0xff]  }
   0x6   :  { %591 = vmatprep.subr.bf16.mxu1 %v622_v5  ;;  %v630_v13 = vld [vmem:[%s813_s1 + $0xd8] sm:$0xff]   ;;  %v634_v17 = vld [vmem:[%s813_s1 + $0xe0] sm:$0xff]   ;;  %v638_v21 = vld [vmem:[%s813_s1 + $0xe8] sm:$0xff]  }
   0x7   :  { %v631_v14 = vld [vmem:[%s813_s1 + $0x18] sm:$0xff]   ;;  %v635_v18 = vld [vmem:[%s813_s1 + $0x20] sm:$0xff]   ;;  %v639_v22 = vld [vmem:[%s813_s1 + $0x28] sm:$0xff]  }
   0x8   :  { %564 = vmatpush3.bf16.msra.mxu0 %v623_v6  ;;  %v632_v15 = vld [vmem:[%s813_s1 + $0x98] sm:$0xff]   ;;  %v636_v19 = vld [vmem:[%s813_s1 + $0xa0] sm:$0xff]   ;;  %v640_v23 = vld [vmem:[%s813_s1 + $0xa8] sm:$0xff]  }
   0x9   :  { %592 = vmatpush3.bf16.msra.mxu1 %v624_v7  ;;  %565 = vmatprep.subr.bf16.mxu0 %v625_v8  ;;  %v641_v24 = vld [vmem:[%s813_s1 + $0x70] sm:$0xff]   ;;  %v645_v28 = vld [vmem:[%s813_s1 + $0x78] sm:$0xff]  }
   0xa   :  { %593 = vmatprep.subr.bf16.mxu1 %v626_v9  ;;  %v642_v25 = vld [vmem:[%s813_s1 + $0xf0] sm:$0xff]   ;;  %v646_v29 = vld [vmem:[%s813_s1 + $0xf8] sm:$0xff]  }
   0xb   :  { %v643_v26 = vld [vmem:[%s813_s1 + $0x30] sm:$0xff]   ;;  %v647_v30 = vld [vmem:[%s813_s1 + $0x38] sm:$0xff]  }
   0xc   :  { %566 = vmatpush3.bf16.msra.mxu0 %v627_v10  ;;  %v644_v27 = vld [vmem:[%s813_s1 + $0xb0] sm:$0xff]   ;;  %v648_v31 = vld [vmem:[%s813_s1 + $0xb8] sm:$0xff]  }
   0xd   :  { %594 = vmatpush3.bf16.msra.mxu1 %v628_v11  ;;  %567 = vmatprep.subr.bf16.mxu0 %v629_v12  ;;  %v649_v32 = vld [vmem:[%s814_s0] ss:$16 sps:$4 sm:$0xff]   ;;  %v651_v33 = vld [vmem:[%s814_s0 + $0x4] ss:$16 sps:$4 sm:$0xff]   ;;  %v652_v34 = vld [vmem:[%s814_s0 + $0x8] ss:$16 sps:$4 sm:$0xff]  }
   0xe   :  { %595 = vmatprep.subr.bf16.mxu1 %v630_v13  ;;  %v654_v35 = vld [vmem:[%s814_s0 + $0xc] ss:$16 sps:$4 sm:$0xff]   ;;  %367 = vmatprep.mubr.bf16.mxu0 %v651_v33  ;;  %v655_v36 = vld [vmem:[%s814_s0 + $0x24] ss:$16 sps:$4 sm:$0xff]   ;;  %v659_v38 = vld [vmem:[%s814_s0 + $0x20] ss:$16 sps:$4 sm:$0xff]  }
   0xf   :  { %416 = vmatprep.mubr.bf16.mxu1 %v654_v35  ;;  %v657_v37 = vld [vmem:[%s814_s0 + $0x2c] ss:$16 sps:$4 sm:$0xff]   ;;  %v660_v39 = vld [vmem:[%s814_s0 + $0x28] ss:$16 sps:$4 sm:$0xff]  }
  0x10   :  { %568 = vmatpush3.bf16.msra.mxu0 %v631_v14 }
  0x11   :  { %596 = vmatpush3.bf16.msra.mxu1 %v632_v15  ;;  %569 = vmatprep.subr.bf16.mxu0 %v633_v16 }
  0x12   :  { %597 = vmatprep.subr.bf16.mxu1 %v634_v17 }
  0x14   :  { %570 = vmatpush3.bf16.msra.mxu0 %v635_v18 }
  0x15   :  { %598 = vmatpush3.bf16.msra.mxu1 %v636_v19  ;;  %571 = vmatprep.subr.bf16.mxu0 %v637_v20 }
  0x16   :  { %599 = vmatprep.subr.bf16.mxu1 %v638_v21 }
  0x18   :  { %572 = vmatpush3.bf16.msra.mxu0 %v639_v22 }
  0x19   :  { %600 = vmatpush3.bf16.msra.mxu1 %v640_v23  ;;  %573 = vmatprep.subr.bf16.mxu0 %v641_v24 }
  0x1a   :  { %601 = vmatprep.subr.bf16.mxu1 %v642_v25 }
  0x1c   :  { %574 = vmatpush3.bf16.msra.mxu0 %v643_v26 }
  0x1d   :  { %602 = vmatpush3.bf16.msra.mxu1 %v644_v27  ;;  %575 = vmatprep.subr.bf16.mxu0 %v645_v28 }
  0x1e   :  { %603 = vmatprep.subr.bf16.mxu1 %v646_v29 }
  0x20   :  { %576 = vmatpush3.bf16.msra.mxu0 %v647_v30 }
  0x21   :  { %604 = vmatpush3.bf16.msra.mxu1 %v648_v31 }
  0x23   :  { %368 = vmatmul.mubr.bf16.vlgmr.msra.gmra.mrb[0].mxu0 %v649_v32 }
  0x24   :  { %417 = vmatmul.mubr.bf16.vlgmr.msra.gmra.mrb[0].mxu1 %v652_v34  ;;  %375 = vmatprep.mubr.bf16.mxu0 %v655_v36 }
  0x25   :  { %424 = vmatprep.mubr.bf16.mxu1 %v657_v37 }
  0x2b   :  { %376 = vmatmul.mubr.bf16.gmra.mrb[4].mxu0 %v659_v38 }
  0x2c   :  { %425 = vmatmul.mubr.bf16.gmra.mrb[4].mxu1 %v660_v39 }
  0xf6   :  { %v577_v40 = vpop.f32.mrb[0].mxu0 }
  0xf7   :  { %v605_v41 = vpop.f32.mrb[0].mxu1  ;;  %v578_v42 = vpop.f32.mrb[1].mxu0 }
  0xf8   :  { %v579_v43 = vadd.f32 %v578_v42, %v577_v40  ;;  %v606_v44 = vpop.f32.mrb[1].mxu1  ;;  %v580_v45 = vpop.f32.mrb[2].mxu0 }
  0xf9   :  { %v607_v46 = vadd.f32 %v606_v44, %v605_v41  ;;  %v608_v47 = vpop.f32.mrb[2].mxu1  ;;  %v581_v48 = vpop.f32.mrb[3].mxu0 }
  0xfa   :  { %v582_v49 = vadd.f32 %v581_v48, %v580_v45  ;;  %v609_v50 = vpop.f32.mrb[3].mxu1 }
  0xfb   :  { %v419_v51 = vadd.f32 %v607_v46, %v579_v43  ;;  %v610_v52 = vadd.f32 %v609_v50, %v608_v47 }
  0xfd   :  { %v422_v53 = vadd.f32 %v610_v52, %v582_v49  ;;  %v457_v55 = vmul.f32 %v419_v51, %v419_v51 }
  0xfe   :  { %v583_v54 = vpop.f32.mrb[4].mxu0 }
  0xff   :  { %v448_v56 = vadd.f32 %v422_v53, %v419_v51  ;;  %v458_v57 = vmul.f32 %v422_v53, %v422_v53  ;;  %v553_v58 = vpack.c.bf16 %v422_v53, %v419_v51  ;;  %v611_v59 = vpop.f32.mrb[4].mxu1  ;;  %v584_v60 = vpop.f32.mrb[5].mxu0 }
 0x100   :  { %v585_v61 = vadd.f32 %v584_v60, %v583_v54  ;;  %v612_v62 = vpop.f32.mrb[5].mxu1  ;;  %v586_v63 = vpop.f32.mrb[6].mxu0 }
 0x101   :  { %v461_v0 = vadd.f32 %v458_v57, %v457_v55  ;;  %554 = vst [vmem:[%s815_s2] sm:$0xff] %v553_v58   ;;  %v613_v1 = vadd.f32 %v612_v62, %v611_v59  ;;  %v614_v2 = vpop.f32.mrb[6].mxu1  ;;  %v587_v3 = vpop.f32.mrb[7].mxu0 }
 0x102   :  { %v588_v4 = vadd.f32 %v587_v3, %v586_v63  ;;  %v615_v5 = vpop.f32.mrb[7].mxu1 }
 0x103   :  { %v427_v6 = vadd.f32 %v613_v1, %v585_v61  ;;  %v616_v7 = vadd.f32 %v615_v5, %v614_v2 }
 0x105   :  { %v449_v8 = vadd.f32 %v448_v56, %v427_v6  ;;  %v459_v9 = vmul.f32 %v427_v6, %v427_v6  ;;  %v430_v10 = vadd.f32 %v616_v7, %v588_v4 }
 0x107   :  { %v462_v11 = vadd.f32 %v461_v0, %v459_v9  ;;  %v450_v12 = vadd.f32 %v449_v8, %v430_v10  ;;  %v460_v13 = vmul.f32 %v430_v10, %v430_v10  ;;  %v558_v14 = vpack.c.bf16 %v430_v10, %v427_v6 }
 0x109   :  { %v451_v15 = vrot.slane %v450_v12, 4  ;;  %v463_v16 = vadd.f32 %v462_v11, %v460_v13  ;;  %560 = vst [vmem:[%s815_s2 + $0x8] sm:$0xff] %v558_v14  }
 0x10b   :  { %v452_v17 = vadd.f32 %v451_v15, %v450_v12  ;;  %v464_v18 = vrot.slane %v463_v16, 4 }
 0x10d   :  { %v453_v19 = vrot.slane %v452_v17, 2  ;;  %v465_v20 = vadd.f32 %v464_v18, %v463_v16 }
 0x10f   :  { %v454_v21 = vadd.f32 %v453_v19, %v452_v17  ;;  %v466_v22 = vrot.slane %v465_v20, 2 }
 0x111   :  { %v455_v23 = vrot.slane %v454_v21, 1  ;;  %v467_v24 = vadd.f32 %v466_v22, %v465_v20 }
 0x113   :  { %v456_v25 = vadd.f32 %v455_v23, %v454_v21  ;;  %v468_v26 = vrot.slane %v467_v24, 1 }
 0x115   :  { %v469_v27 = vadd.f32 %v468_v26, %v467_v24  ;;  %470 = vst [vmem:[%s816_s3] sm:$0x1] %v456_v25 }
 0x117   :  { %471 = vst [vmem:[%s816_s3 + $0x1] sm:$0x1] %v469_v27 }

// kernel: dnet_forward.9
= control target key start
LH: loop header
LB: loop body
LE: loop exit
PB: predicated region body
PF: predicated region fallthrough
CT: control target
= control target key end

     0   :  { %s943_s12 = smov 0   ;;  %s945_s13 = smov 0   ;;  %s1034_s0 = inlined_call_operand.vmem [shape: bf16[8,1024], index: 0, kind: input, shape index: {}]   ;;  %s1035_s1 = inlined_call_operand.vmem [shape: bf16[1024,128], index: 1, kind: input, shape index: {}]   ;;  %s1036_s2 = inlined_call_operand.vmem [shape: f32[1,128], index: 2, kind: input, shape index: {}]   ;;  %s1037_s3 = inlined_call_operand.vmem [shape: f32[8,128], index: 3, kind: output, shape index: {}]  }
   0x1   :  { %s947_s14 = smov 0  }
   0x2 LB: > { %s25_s15 = sadd.s32 1, %s916_s13  ;;  %p741_p0 = scmp.ge.s32.totalorder %s920_s14, 1  ;;  %s920_s14 = sphi %s947_s14, %s13_s14   ;;  %s916_s13 = sphi %s945_s13, %s1039_s13   ;;  %s912_s12 = sphi %s943_s12, %s1038_s12  }
   0x3   : > { %p26_p1 = scmp.ge.s32.totalorder %s25_s15, 2  ;;  %p182_p2 = scmp.lt.s32.totalorder %s920_s14, 3 }
   0x5   : > { %s1041_s15 = smov (%p26_p1, %s25_s15), 0  ;;  %p183_p3 = pnand %p741_p0, %p182_p2 }
   0x6   : > { %s742_s16 = sshll.u32 (!%p183_p3), %s912_s12, 2  ;;  %p744_p5 = scmp.ne.s32.totalorder (!%p183_p3), %s912_s12, 0 }
   0x7   : > { %186 = sbr.rel (%p183_p3) target bundleno = 316 (0x13c), region = 32  ;;  %p222_p4 = scmp.lt.s32.totalorder (!%p183_p3), %s742_s16, 7 }
   0xe   : > { %s1043_s16 = smov (!%p222_p4, %s742_s16), 7  ;;  %247 = sbr.rel (%p744_p5) target bundleno = 21 (0x15), region = 36 }
   0xf   : > { %s743_s17 = sshll.u32 %s1043_s16, 2  ;;  %v922_v0 = vmov (!%p744_p5), 0.0  }
  0x10   : > { %s227_s20 = scalar_lea.vmem %s1034_s0, %s743_s17  ;;  %248 = vst [vmem:[#allocation2] sm:$0xff] (!%p744_p5), %v922_v0 }
  0x15 PF: > { %s745_s21 = sshll.u32 %s912_s12, 9  ;;  %v969_v1 = vld [vmem:[%s227_s20] sm:$0xff]  ;;  %v971_v2 = vld [vmem:[%s227_s20 + $0x8] sm:$0xff]  ;;  %p783_p6 = scmp.ne.s32.totalorder %s912_s12, 1 }
  0x16   : > { %s253_s22 = sshra.s32 %s745_s21, 3  ;;  %v748_v3 = vcombine.high %v969_v1, %v969_v1  ;;  %v750_v4 = vcombine.high %v971_v2, %v971_v2  ;;  %v747_v37 = vcombine.low %v969_v1, %v969_v1  ;;  %v749_v38 = vcombine.low %v971_v2, %v971_v2  ;;  %v784_v53 = vld [vmem:[%s1036_s2] ss:$0 sm:$0xff] (!%p783_p6) }
  0x17   : > { %s746_s23 = sshll.u32 %s253_s22, 2  ;;  %v250_v48 = vld [vmem:[#allocation2] sm:$0xff] }
  0x18   : > { %s980_s26 = scalar_lea.vmem %s1035_s1, %s746_s23  ;;  %559 = vmatprep.mubr.bf16.mxu0 %v748_v3  ;;  %599 = vmatprep.mubr.bf16.mxu1 %v750_v4 }
  0x19   : > { %v858_v5 = vld [vmem:[%s980_s26 + $0x40] sm:$0xff]   ;;  %v862_v9 = vld [vmem:[%s980_s26 + $0x48] sm:$0xff]   ;;  %v866_v13 = vld [vmem:[%s980_s26 + $0x50] sm:$0xff]  }
  0x1a   : > { %v859_v6 = vld [vmem:[%s980_s26 + $0xc0] sm:$0xff]   ;;  %789 = vmatprep.subr.bf16.mxu0 %v858_v5  ;;  %v863_v10 = vld [vmem:[%s980_s26 + $0xc8] sm:$0xff]   ;;  %v867_v14 = vld [vmem:[%s980_s26 + $0xd0] sm:$0xff]  }
  0x1b   : > { %v860_v7 = vld [vmem:[%s980_s26] sm:$0xff]   ;;  %811 = vmatprep.subr.bf16.mxu1 %v859_v6  ;;  %v864_v11 = vld [vmem:[%s980_s26 + $0x8] sm:$0xff]   ;;  %v868_v15 = vld [vmem:[%s980_s26 + $0x10] sm:$0xff]  }
  0x1c   : > { %v861_v8 = vld [vmem:[%s980_s26 + $0x80] sm:$0xff]   ;;  %790 = vmatpush3.bf16.msra.mxu0 %v860_v7  ;;  %v865_v12 = vld [vmem:[%s980_s26 + $0x88] sm:$0xff]   ;;  %v869_v16 = vld [vmem:[%s980_s26 + $0x90] sm:$0xff]  }
  0x1d   : > { %812 = vmatpush3.bf16.msra.mxu1 %v861_v8  ;;  %791 = vmatprep.subr.bf16.mxu0 %v862_v9  ;;  %v870_v17 = vld [vmem:[%s980_s26 + $0x58] sm:$0xff]   ;;  %v874_v21 = vld [vmem:[%s980_s26 + $0x60] sm:$0xff]   ;;  %v878_v25 = vld [vmem:[%s980_s26 + $0x68] sm:$0xff]  }
  0x1e   : > { %813 = vmatprep.subr.bf16.mxu1 %v863_v10  ;;  %v871_v18 = vld [vmem:[%s980_s26 + $0xd8] sm:$0xff]   ;;  %v875_v22 = vld [vmem:[%s980_s26 + $0xe0] sm:$0xff]   ;;  %v879_v26 = vld [vmem:[%s980_s26 + $0xe8] sm:$0xff]  }
  0x1f   : > { %v872_v19 = vld [vmem:[%s980_s26 + $0x18] sm:$0xff]   ;;  %v876_v23 = vld [vmem:[%s980_s26 + $0x20] sm:$0xff]   ;;  %v880_v27 = vld [vmem:[%s980_s26 + $0x28] sm:$0xff]  }
  0x20   : > { %792 = vmatpush3.bf16.msra.mxu0 %v864_v11  ;;  %v873_v20 = vld [vmem:[%s980_s26 + $0x98] sm:$0xff]   ;;  %v877_v24 = vld [vmem:[%s980_s26 + $0xa0] sm:$0xff]   ;;  %v881_v28 = vld [vmem:[%s980_s26 + $0xa8] sm:$0xff]  }
  0x21   : > { %814 = vmatpush3.bf16.msra.mxu1 %v865_v12  ;;  %793 = vmatprep.subr.bf16.mxu0 %v866_v13  ;;  %v882_v29 = vld [vmem:[%s980_s26 + $0x70] sm:$0xff]   ;;  %v886_v33 = vld [vmem:[%s980_s26 + $0x78] sm:$0xff]  }
  0x22   : > { %815 = vmatprep.subr.bf16.mxu1 %v867_v14  ;;  %v883_v30 = vld [vmem:[%s980_s26 + $0xf0] sm:$0xff]   ;;  %v887_v34 = vld [vmem:[%s980_s26 + $0xf8] sm:$0xff]  }
  0x23   : > { %v884_v31 = vld [vmem:[%s980_s26 + $0x30] sm:$0xff]   ;;  %v888_v35 = vld [vmem:[%s980_s26 + $0x38] sm:$0xff]  }
  0x24   : > { %794 = vmatpush3.bf16.msra.mxu0 %v868_v15  ;;  %v885_v32 = vld [vmem:[%s980_s26 + $0xb0] sm:$0xff]   ;;  %v889_v36 = vld [vmem:[%s980_s26 + $0xb8] sm:$0xff]  }
  0x25   : > { %816 = vmatpush3.bf16.msra.mxu1 %v869_v16  ;;  %795 = vmatprep.subr.bf16.mxu0 %v870_v17 }
  0x26   : > { %817 = vmatprep.subr.bf16.mxu1 %v871_v18 }
  0x28   : > { %796 = vmatpush3.bf16.msra.mxu0 %v872_v19 }
  0x29   : > { %818 = vmatpush3.bf16.msra.mxu1 %v873_v20  ;;  %797 = vmatprep.subr.bf16.mxu0 %v874_v21 }
  0x2a   : > { %819 = vmatprep.subr.bf16.mxu1 %v875_v22 }
  0x2c   : > { %798 = vmatpush3.bf16.msra.mxu0 %v876_v23 }
  0x2d   : > { %820 = vmatpush3.bf16.msra.mxu1 %v877_v24  ;;  %799 = vmatprep.subr.bf16.mxu0 %v878_v25 }
  0x2e   : > { %821 = vmatprep.subr.bf16.mxu1 %v879_v26 }
  0x30   : > { %800 = vmatpush3.bf16.msra.mxu0 %v880_v27 }
  0x31   : > { %822 = vmatpush3.bf16.msra.mxu1 %v881_v28  ;;  %801 = vmatprep.subr.bf16.mxu0 %v882_v29 }
  0x32   : > { %823 = vmatprep.subr.bf16.mxu1 %v883_v30 }
  0x34   : > { %802 = vmatpush3.bf16.msra.mxu0 %v884_v31 }
  0x35   : > { %824 = vmatpush3.bf16.msra.mxu1 %v885_v32  ;;  %803 = vmatprep.subr.bf16.mxu0 %v886_v33 }
  0x36   : > { %825 = vmatprep.subr.bf16.mxu1 %v887_v34 }
  0x38   : > { %804 = vmatpush3.bf16.msra.mxu0 %v888_v35 }
  0x39   : > { %826 = vmatpush3.bf16.msra.mxu1 %v889_v36 }
  0x3b   : > { %560 = vmatmul.mubr.bf16.vlgmr.msra.gmra.mrb[0].mxu0 %v747_v37 }
  0x3c   : > { %600 = vmatmul.mubr.bf16.vlgmr.msra.gmra.mrb[0].mxu1 %v749_v38 }
 0x10e   : > { %v805_v39 = vpop.f32.mrb[0].mxu0 }
 0x10f   : > { %v827_v40 = vpop.f32.mrb[0].mxu1  ;;  %v806_v41 = vpop.f32.mrb[1].mxu0 }
 0x110   : > { %v807_v42 = vadd.f32 %v806_v41, %v805_v39  ;;  %v828_v43 = vpop.f32.mrb[1].mxu1  ;;  %v808_v44 = vpop.f32.mrb[2].mxu0 }
 0x111   : > { %v829_v45 = vadd.f32 %v828_v43, %v827_v40  ;;  %v830_v46 = vpop.f32.mrb[2].mxu1  ;;  %v809_v47 = vpop.f32.mrb[3].mxu0  ;;  %612 = sbr.rel (%p783_p6) target bundleno = 316 (0x13c), region = 40 }
 0x112   : > { %v831_v49 = vpop.f32.mrb[3].mxu1 }
 0x113   : > { %v602_v50 = vadd.f32 %v829_v45, %v807_v42 }
 0x115   : > { %v607_v51 = vadd.f32 %v602_v50, %v250_v48 }
 0x117   : > { %608 = vst [vmem:[#allocation2] sm:$0xff] %v607_v51 }
 0x11e   : > { %v613_v52 = vld [vmem:[#allocation2] sm:$0xff] }
 0x11f   : > { %v621_v54 = vadd.f32 %v784_v53, %v613_v52 }
 0x121   : > { %v785_v55 = vmul.f32 -1.442695, %v621_v54 }
 0x123   : > { %894 = vpow2.f32 %v785_v55 }
 0x12d   : > { %v895_v56 = vpop.eup %894 }
 0x12e   : > { %v625_v57 = vadd.f32 1.0, %v895_v56 }
 0x130   : > { %896 = vrcp.f32 %v625_v57 }
 0x13a   : > { %v897_v58 = vpop.eup %896 }
 0x13b   : > { %628 = vst [vmem:[%s1037_s3] sm:$0xff] %v897_v58 }
 0x13c PF: > { %s13_s14 = sadd.s32 1, %s920_s14   ;;  %s1038_s12 = smov %s916_s13 }
 0x13d   : > { %p10_p7 = scmp.ge.s32.totalorder %s13_s14, 4   ;;  %s1039_s13 = smov %s1041_s15 }
 0x13f   :  { %12 = sbr.rel (!%p10_p7) target bundleno = 2 (0x2), region = 77 }

</bundles_post_ra>
